<compile_context>
chip_gen: v6e
topology: v6e:2x2x1
jax: 0.10.0
libtpu: 0.0.40
codegen_flags: <defaults>
</compile_context>

<pallas_src>
import jax
import jax.numpy as jnp
from jax.experimental import pallas as pl
from jax.experimental.pallas import tpu as pltpu  # noqa: F401  (TPU backend)

# ---------------- small synthetic ViT config ----------------
B = 2
C = 3
IMG = 16
PATCH = 4
NPATCH = (IMG // PATCH) ** 2          # 16 patches
SEQ = NPATCH + 1                      # 17 tokens (cls + patches)
SEQ_PAD = 24                          # padded to a multiple of 8 sublanes
DIM = 32                              # embed dim (= head.in_features)
HEADS = 4
HEAD_DIM = DIM // HEADS
MLP_DIM = 4 * DIM
DEPTH = 2
NUM_CLASSES = 10
CPP = C * PATCH * PATCH               # flattened patch vector length (48)
LN_EPS = 1e-6                         # timm ViT uses LayerNorm(eps=1e-6)
NEG_INF = -1e30                       # additive mask for padded key tokens


# ---------------- in-kernel helpers ----------------
def _layernorm(v, w, b):
    mu = jnp.mean(v, axis=-1, keepdims=True)
    var = jnp.mean(jnp.square(v - mu), axis=-1, keepdims=True)
    return (v - mu) * jax.lax.rsqrt(var + LN_EPS) * w + b


# ---------------- kernel: plain linear y = x @ W + b (only_fc path) ----------
def _linear_kernel(x_ref, w_ref, b_ref, o_ref):
    o_ref[...] = (
        jnp.dot(x_ref[...], w_ref[...], preferred_element_type=jnp.float32)
        + b_ref[...]
    )


def linear(x, w, b):
    return pl.pallas_call(
        _linear_kernel,
        out_shape=jax.ShapeDtypeStruct((x.shape[0], w.shape[1]), jnp.float32),
    )(x, w, b)


# ---------------- kernel: fully fused ViT forward ----------------
def _fused_vit_kernel(patch_ref, add_ref, bias_ref, pw_ref,
                      ln1w_ref, ln1b_ref, qkvw_ref, qkvb_ref,
                      projw_ref, projb_ref, ln2w_ref, ln2b_ref,
                      fc1w_ref, fc1b_ref, fc2w_ref, fc2b_ref,
                      normw_ref, normb_ref, fcw_ref, fcb_ref,
                      feat_ref, logits_ref):
    nb = patch_ref.shape[0] // SEQ_PAD
    scale = float(HEAD_DIM) ** -0.5

    # Patch embedding + cls token + pos embed + conv bias for the whole
    # flattened (B*SEQ_PAD, DIM) token slab in one MXU matmul.  `add_ref`
    # carries cls+pos[0] on cls rows, pos[t]+patch_bias on patch rows and
    # zeros on pad rows; pad rows of patch_ref are zero so they stay zero.
    x = (jnp.dot(patch_ref[...], pw_ref[...], preferred_element_type=jnp.float32)
         + add_ref[...])

    key_bias = bias_ref[...][:, None, :]    # (1, 1, SEQ_PAD): 0 real / -1e30 pad

    for d in range(DEPTH):                  # DEPTH static -> unrolled, weights VMEM-resident
        # ---- multi-head self attention (batched over B, no batch grid) ----
        h = _layernorm(x, ln1w_ref[d], ln1b_ref[d])
        qkv = (jnp.dot(h, qkvw_ref[d], preferred_element_type=jnp.float32)
               + qkvb_ref[d])               # (B*SEQ_PAD, 3*DIM), layout [q|k|v]

        head_outs = []
        for hh in range(HEADS):
            lo, hi = hh * HEAD_DIM, (hh + 1) * HEAD_DIM
            q = qkv[:, lo:hi].reshape(nb, SEQ_PAD, HEAD_DIM)
            k = qkv[:, DIM + lo:DIM + hi].reshape(nb, SEQ_PAD, HEAD_DIM)
            v = qkv[:, 2 * DIM + lo:2 * DIM + hi].reshape(nb, SEQ_PAD, HEAD_DIM)
            # contraction over head_dim directly (no explicit k.T transpose)
            s = jnp.einsum('bqd,bkd->bqk', q, k,
                           preferred_element_type=jnp.float32) * scale
            s = s + key_bias                               # mask padded keys
            s = s - jnp.max(s, axis=-1, keepdims=True)
            p = jnp.exp(s)
            p = p * pl.reciprocal(jnp.sum(p, axis=-1, keepdims=True), approx=True)
            o = jnp.einsum('bqk,bkd->bqd', p, v,
                           preferred_element_type=jnp.float32)
            head_outs.append(o.reshape(nb * SEQ_PAD, HEAD_DIM))
        attn = jnp.concatenate(head_outs, axis=-1)         # (B*SEQ_PAD, DIM)
        attn = (jnp.dot(attn, projw_ref[d], preferred_element_type=jnp.float32)
                + projb_ref[d])
        x = x + attn

        # ---- MLP ----
        h2 = _layernorm(x, ln2w_ref[d], ln2b_ref[d])
        m = (jnp.dot(h2, fc1w_ref[d], preferred_element_type=jnp.float32)
             + fc1b_ref[d])
        # TODO(synk): timm's default nn.GELU is exact (erf); tanh-approx GELU used in-kernel.
        m = jax.nn.gelu(m, approximate=True)
        m = (jnp.dot(m, fc2w_ref[d], preferred_element_type=jnp.float32)
             + fc2b_ref[d])
        x = x + m

    # Final LayerNorm is token-wise and timm pools the cls token -> norm(cls).
    cls_rows = jnp.concatenate(
        [x[b * SEQ_PAD:b * SEQ_PAD + 1, :] for b in range(nb)], axis=0)  # (B, DIM)
    feat = _layernorm(cls_rows, normw_ref[...], normb_ref[...])
    feat_ref[...] = feat
    logits_ref[...] = (
        jnp.dot(feat, fcw_ref[...], preferred_element_type=jnp.float32)
        + fcb_ref[...])


def vit_forward_fused(patch_slab, add_slab, attn_bias, params):
    nb = patch_slab.shape[0] // SEQ_PAD
    blk = params["blocks"]
    return pl.pallas_call(
        _fused_vit_kernel,
        out_shape=(jax.ShapeDtypeStruct((nb, DIM), jnp.float32),
                   jax.ShapeDtypeStruct((nb, NUM_CLASSES), jnp.float32)),
    )(patch_slab, add_slab, attn_bias, params["patch_w"],
      blk["ln1_w"], blk["ln1_b"], blk["qkv_w"], blk["qkv_b"],
      blk["proj_w"], blk["proj_b"], blk["ln2_w"], blk["ln2_b"],
      blk["fc1_w"], blk["fc1_b"], blk["fc2_w"], blk["fc2_b"],
      params["norm_w"], params["norm_b"], params["fc_w"], params["fc_b"])


# ---------------- deterministic parameter init ----------------
def init_params(key):
    keys = iter(jax.random.split(key, 64))
    normal = lambda shp, std=0.02: std * jax.random.normal(next(keys), shp, jnp.float32)

    return {
        # Conv2d(C, DIM, kernel=stride=PATCH) folded into a (C*P*P, DIM) matmul.
        "patch_w": normal((CPP, DIM)),
        "patch_b": jnp.zeros((1, DIM), jnp.float32),
        "cls": normal((1, DIM)),
        "pos": normal((SEQ, DIM)),
        "norm_w": jnp.ones((1, DIM), jnp.float32),
        "norm_b": jnp.zeros((1, DIM), jnp.float32),
        # old_fc = nn.Linear(DIM, NUM_CLASSES)
        "fc_w": normal((DIM, NUM_CLASSES)),
        "fc_b": jnp.zeros((1, NUM_CLASSES), jnp.float32),
        # per-block weights stacked along a leading DEPTH axis
        "blocks": {
            "ln1_w": jnp.ones((DEPTH, 1, DIM), jnp.float32),
            "ln1_b": jnp.zeros((DEPTH, 1, DIM), jnp.float32),
            "qkv_w": normal((DEPTH, DIM, 3 * DIM)),
            "qkv_b": jnp.zeros((DEPTH, 1, 3 * DIM), jnp.float32),
            "proj_w": normal((DEPTH, DIM, DIM)),
            "proj_b": jnp.zeros((DEPTH, 1, DIM), jnp.float32),
            "ln2_w": jnp.ones((DEPTH, 1, DIM), jnp.float32),
            "ln2_b": jnp.zeros((DEPTH, 1, DIM), jnp.float32),
            "fc1_w": normal((DEPTH, DIM, MLP_DIM)),
            "fc1_b": jnp.zeros((DEPTH, 1, MLP_DIM), jnp.float32),
            "fc2_w": normal((DEPTH, MLP_DIM, DIM)),
            "fc2_b": jnp.zeros((DEPTH, 1, DIM), jnp.float32),
        },
    }


# ---------------- forward (mirrors Transformer.forward) ----------------
def transformer_forward(x, params, only_fc=False, only_feat=False):
    if only_fc:
        # x is already a feature tensor (B, DIM) -> old_fc(x)
        return linear(x, params["fc_w"], params["fc_b"])

    b, c, h, w = x.shape
    gh, gw = h // PATCH, w // PATCH

    # Layout glue (wrapper-side): NCHW -> per-patch flattened vectors ordered
    # (c, ph, pw) — identical to Conv2d(stride=PATCH)+flatten(2).transpose(1,2).
    patches = x.reshape(b, c, gh, PATCH, gw, PATCH)
    patches = patches.transpose(0, 2, 4, 1, 3, 5).reshape(b, gh * gw, CPP)

    # Padded token slab: row 0 = cls slot (zero patch vector), rows 1..NPATCH =
    # patch vectors, rows SEQ..SEQ_PAD-1 = pad (zeros).
    patch_slab = jnp.zeros((b, SEQ_PAD, CPP), jnp.float32)
    patch_slab = patch_slab.at[:, 1:1 + NPATCH, :].set(patches)
    patch_slab = patch_slab.reshape(b * SEQ_PAD, CPP)

    # Parameter-only additive slab: cls+pos[0] on cls rows, pos[t]+conv bias on
    # patch rows, zeros on pad rows (dropout p=0 -> identity).
    add = jnp.zeros((SEQ_PAD, DIM), jnp.float32)
    add = add.at[0:1].set(params["cls"] + params["pos"][0:1])
    add = add.at[1:SEQ].set(params["pos"][1:SEQ] + params["patch_b"])
    add_slab = jnp.broadcast_to(add[None], (b, SEQ_PAD, DIM)).reshape(b * SEQ_PAD, DIM)

    # Additive attention bias masking padded key tokens.
    attn_bias = jnp.where(jnp.arange(SEQ_PAD) < SEQ, 0.0, NEG_INF
                          ).astype(jnp.float32).reshape(1, SEQ_PAD)

    feat, logits = vit_forward_fused(patch_slab, add_slab, attn_bias, params)
    return {"logits": logits, "feat": feat}


if __name__ == "__main__":
    key = jax.random.PRNGKey(0)
    kx, kp = jax.random.split(key)
    x = jax.random.normal(kx, (B, C, IMG, IMG), jnp.float32)
    params = init_params(kp)

    out = jax.jit(lambda xx: transformer_forward(xx, params))(x)
    out = jax.block_until_ready(out)

    assert out["feat"].shape == (B, DIM)
    assert out["logits"].shape == (B, NUM_CLASSES)
    assert bool(jnp.all(jnp.isfinite(out["feat"])))
    assert bool(jnp.all(jnp.isfinite(out["logits"])))

    # exercise the only_fc path as well (old_fc applied directly to features)
    logits_fc = jax.block_until_ready(
        transformer_forward(out["feat"], params, only_fc=True)
    )
    assert logits_fc.shape == (B, NUM_CLASSES)

    print("KERNEL_OK")
</pallas_src>

<mosaic_0001>
module attributes {stable_mosaic.version = 11 : i64} {
  func.func @_fused_vit_kernel(%arg0: memref<48x48xf32, #tpu.memory_space<vmem>>, %arg1: memref<48x32xf32, #tpu.memory_space<vmem>>, %arg2: memref<1x24xf32, #tpu.memory_space<vmem>>, %arg3: memref<48x32xf32, #tpu.memory_space<vmem>>, %arg4: memref<2x1x32xf32, #tpu.memory_space<vmem>>, %arg5: memref<2x1x32xf32, #tpu.memory_space<vmem>>, %arg6: memref<2x32x96xf32, #tpu.memory_space<vmem>>, %arg7: memref<2x1x96xf32, #tpu.memory_space<vmem>>, %arg8: memref<2x32x32xf32, #tpu.memory_space<vmem>>, %arg9: memref<2x1x32xf32, #tpu.memory_space<vmem>>, %arg10: memref<2x1x32xf32, #tpu.memory_space<vmem>>, %arg11: memref<2x1x32xf32, #tpu.memory_space<vmem>>, %arg12: memref<2x32x128xf32, #tpu.memory_space<vmem>>, %arg13: memref<2x1x128xf32, #tpu.memory_space<vmem>>, %arg14: memref<2x128x32xf32, #tpu.memory_space<vmem>>, %arg15: memref<2x1x32xf32, #tpu.memory_space<vmem>>, %arg16: memref<1x32xf32, #tpu.memory_space<vmem>>, %arg17: memref<1x32xf32, #tpu.memory_space<vmem>>, %arg18: memref<32x10xf32, #tpu.memory_space<vmem>>, %arg19: memref<1x10xf32, #tpu.memory_space<vmem>>, %arg20: memref<2x32xf32, #tpu.memory_space<vmem>>, %arg21: memref<2x10xf32, #tpu.memory_space<vmem>>) attributes {dimension_semantics = [], scalar_prefetch = 0 : i64, scratch_operands = 0 : i64, tpu.core_type = #tpu.core_type<tc>} {
    %c0 = arith.constant 0 : index
    %c0_0 = arith.constant 0 : index
    %0 = vector.load %arg0[%c0, %c0_0] : memref<48x48xf32, #tpu.memory_space<vmem>>, vector<48x48xf32>
    %c0_1 = arith.constant 0 : index
    %c0_2 = arith.constant 0 : index
    %1 = vector.load %arg3[%c0_1, %c0_2] : memref<48x32xf32, #tpu.memory_space<vmem>>, vector<48x32xf32>
    %cst = arith.constant dense<0.000000e+00> : vector<48x32xf32>
    %2 = tpu.matmul %0, %1, %cst {dimension_numbers = #tpu.dot_dimension_numbers<[1], [0], [0], [1], [0, 0, 1, 1], [], []>} : vector<48x48xf32>, vector<48x32xf32>, vector<48x32xf32> -> vector<48x32xf32>
    %c0_3 = arith.constant 0 : index
    %c0_4 = arith.constant 0 : index
    %3 = vector.load %arg1[%c0_3, %c0_4] : memref<48x32xf32, #tpu.memory_space<vmem>>, vector<48x32xf32>
    %4 = arith.addf %2, %3 : vector<48x32xf32>
    %c0_5 = arith.constant 0 : index
    %c0_6 = arith.constant 0 : index
    %5 = vector.load %arg2[%c0_5, %c0_6] : memref<1x24xf32, #tpu.memory_space<vmem>>, vector<1x24xf32>
    %6 = vector.shape_cast %5 : vector<1x24xf32> to vector<1x1x24xf32>
    %c0_7 = arith.constant 0 : index
    %c0_8 = arith.constant 0 : index
    %c0_9 = arith.constant 0 : index
    %7 = vector.load %arg4[%c0_7, %c0_8, %c0_9] : memref<2x1x32xf32, #tpu.memory_space<vmem>>, vector<1x1x32xf32>
    %8 = vector.shape_cast %7 : vector<1x1x32xf32> to vector<1x32xf32>
    %c0_10 = arith.constant 0 : index
    %c0_11 = arith.constant 0 : index
    %c0_12 = arith.constant 0 : index
    %9 = vector.load %arg5[%c0_10, %c0_11, %c0_12] : memref<2x1x32xf32, #tpu.memory_space<vmem>>, vector<1x1x32xf32>
    %10 = vector.shape_cast %9 : vector<1x1x32xf32> to vector<1x32xf32>
    %cst_13 = arith.constant dense<0.000000e+00> : vector<48xf32>
    %11 = vector.multi_reduction <add>, %4, %cst_13 [1] : vector<48x32xf32> to vector<48xf32>
    %12 = vector.shape_cast %11 : vector<48xf32> to vector<48x1xf32>
    %cst_14 = arith.constant 3.200000e+01 : f32
    %13 = vector.broadcast %cst_14 : f32 to vector<48x1xf32>
    %14 = arith.divf %12, %13 : vector<48x1xf32>
    %15 = vector.broadcast %14 : vector<48x1xf32> to vector<48x32xf32>
    %16 = arith.subf %4, %15 : vector<48x32xf32>
    %17 = arith.mulf %16, %16 : vector<48x32xf32>
    %cst_15 = arith.constant dense<0.000000e+00> : vector<48xf32>
    %18 = vector.multi_reduction <add>, %17, %cst_15 [1] : vector<48x32xf32> to vector<48xf32>
    %19 = vector.shape_cast %18 : vector<48xf32> to vector<48x1xf32>
    %cst_16 = arith.constant 3.200000e+01 : f32
    %20 = vector.broadcast %cst_16 : f32 to vector<48x1xf32>
    %21 = arith.divf %19, %20 : vector<48x1xf32>
    %22 = vector.broadcast %14 : vector<48x1xf32> to vector<48x32xf32>
    %23 = arith.subf %4, %22 : vector<48x32xf32>
    %cst_17 = arith.constant 9.99999997E-7 : f32
    %24 = vector.broadcast %cst_17 : f32 to vector<48x1xf32>
    %25 = arith.addf %21, %24 : vector<48x1xf32>
    %26 = math.rsqrt %25 : vector<48x1xf32>
    %27 = vector.broadcast %26 : vector<48x1xf32> to vector<48x32xf32>
    %28 = arith.mulf %23, %27 : vector<48x32xf32>
    %29 = vector.broadcast %8 : vector<1x32xf32> to vector<48x32xf32>
    %30 = arith.mulf %28, %29 : vector<48x32xf32>
    %31 = vector.broadcast %10 : vector<1x32xf32> to vector<48x32xf32>
    %32 = arith.addf %30, %31 : vector<48x32xf32>
    %c0_18 = arith.constant 0 : index
    %c0_19 = arith.constant 0 : index
    %c0_20 = arith.constant 0 : index
    %33 = vector.load %arg6[%c0_18, %c0_19, %c0_20] : memref<2x32x96xf32, #tpu.memory_space<vmem>>, vector<1x32x96xf32>
    %34 = vector.shape_cast %33 : vector<1x32x96xf32> to vector<32x96xf32>
    %cst_21 = arith.constant dense<0.000000e+00> : vector<48x96xf32>
    %35 = tpu.matmul %32, %34, %cst_21 {dimension_numbers = #tpu.dot_dimension_numbers<[1], [0], [0], [1], [0, 0, 1, 1], [], []>} : vector<48x32xf32>, vector<32x96xf32>, vector<48x96xf32> -> vector<48x96xf32>
    %c0_22 = arith.constant 0 : index
    %c0_23 = arith.constant 0 : index
    %c0_24 = arith.constant 0 : index
    %36 = vector.load %arg7[%c0_22, %c0_23, %c0_24] : memref<2x1x96xf32, #tpu.memory_space<vmem>>, vector<1x1x96xf32>
    %37 = vector.shape_cast %36 : vector<1x1x96xf32> to vector<1x96xf32>
    %38 = vector.broadcast %37 : vector<1x96xf32> to vector<48x96xf32>
    %39 = arith.addf %35, %38 : vector<48x96xf32>
    %40 = vector.extract_strided_slice %39 {offsets = [0, 0], sizes = [48, 8], strides = [1, 1]} : vector<48x96xf32> to vector<48x8xf32>
    %41 = vector.shape_cast %40 : vector<48x8xf32> to vector<2x24x8xf32>
    %42 = vector.extract_strided_slice %39 {offsets = [0, 32], sizes = [48, 8], strides = [1, 1]} : vector<48x96xf32> to vector<48x8xf32>
    %43 = vector.shape_cast %42 : vector<48x8xf32> to vector<2x24x8xf32>
    %44 = vector.extract_strided_slice %39 {offsets = [0, 64], sizes = [48, 8], strides = [1, 1]} : vector<48x96xf32> to vector<48x8xf32>
    %45 = vector.shape_cast %44 : vector<48x8xf32> to vector<2x24x8xf32>
    "tpu.trace_start"() <{level = 10 : i32, message = "bqd,bkd->bqk"}> : () -> ()
    %cst_25 = arith.constant dense<0.000000e+00> : vector<2x24x24xf32>
    %46 = tpu.matmul %41, %43, %cst_25 {dimension_numbers = #tpu.dot_dimension_numbers<[2], [2], [1], [1], [0, 0, 0, 1, 1, 1], [0], [0]>} : vector<2x24x8xf32>, vector<2x24x8xf32>, vector<2x24x24xf32> -> vector<2x24x24xf32>
    "tpu.trace_stop"() : () -> ()
    %cst_26 = arith.constant 0.353553385 : f32
    %47 = vector.broadcast %cst_26 : f32 to vector<2x24x24xf32>
    %48 = arith.mulf %46, %47 : vector<2x24x24xf32>
    %49 = vector.broadcast %6 : vector<1x1x24xf32> to vector<2x24x24xf32>
    %50 = arith.addf %48, %49 : vector<2x24x24xf32>
    %cst_27 = arith.constant dense<0xFF800000> : vector<2x24xf32>
    %51 = vector.multi_reduction <maximumf>, %50, %cst_27 [2] : vector<2x24x24xf32> to vector<2x24xf32>
    %52 = vector.shape_cast %51 : vector<2x24xf32> to vector<2x24x1xf32>
    %53 = vector.broadcast %52 : vector<2x24x1xf32> to vector<2x24x24xf32>
    %54 = arith.subf %50, %53 : vector<2x24x24xf32>
    %55 = math.exp %54 : vector<2x24x24xf32>
    %cst_28 = arith.constant dense<0.000000e+00> : vector<2x24xf32>
    %56 = vector.multi_reduction <add>, %55, %cst_28 [2] : vector<2x24x24xf32> to vector<2x24xf32>
    %57 = vector.shape_cast %56 : vector<2x24xf32> to vector<2x24x1xf32>
    %58 = tpu.reciprocal %57 {approx = true} : vector<2x24x1xf32> -> vector<2x24x1xf32>
    %59 = vector.broadcast %58 : vector<2x24x1xf32> to vector<2x24x24xf32>
    %60 = arith.mulf %55, %59 : vector<2x24x24xf32>
    "tpu.trace_start"() <{level = 10 : i32, message = "bqk,bkd->bqd"}> : () -> ()
    %cst_29 = arith.constant dense<0.000000e+00> : vector<2x24x8xf32>
    %61 = tpu.matmul %60, %45, %cst_29 {dimension_numbers = #tpu.dot_dimension_numbers<[2], [1], [1], [2], [0, 0, 0, 1, 1, 2], [0], [0]>} : vector<2x24x24xf32>, vector<2x24x8xf32>, vector<2x24x8xf32> -> vector<2x24x8xf32>
    "tpu.trace_stop"() : () -> ()
    %62 = vector.shape_cast %61 : vector<2x24x8xf32> to vector<48x8xf32>
    %63 = vector.extract_strided_slice %39 {offsets = [0, 8], sizes = [48, 8], strides = [1, 1]} : vector<48x96xf32> to vector<48x8xf32>
    %64 = vector.shape_cast %63 : vector<48x8xf32> to vector<2x24x8xf32>
    %65 = vector.extract_strided_slice %39 {offsets = [0, 40], sizes = [48, 8], strides = [1, 1]} : vector<48x96xf32> to vector<48x8xf32>
    %66 = vector.shape_cast %65 : vector<48x8xf32> to vector<2x24x8xf32>
    %67 = vector.extract_strided_slice %39 {offsets = [0, 72], sizes = [48, 8], strides = [1, 1]} : vector<48x96xf32> to vector<48x8xf32>
    %68 = vector.shape_cast %67 : vector<48x8xf32> to vector<2x24x8xf32>
    "tpu.trace_start"() <{level = 10 : i32, message = "bqd,bkd->bqk"}> : () -> ()
    %cst_30 = arith.constant dense<0.000000e+00> : vector<2x24x24xf32>
    %69 = tpu.matmul %64, %66, %cst_30 {dimension_numbers = #tpu.dot_dimension_numbers<[2], [2], [1], [1], [0, 0, 0, 1, 1, 1], [0], [0]>} : vector<2x24x8xf32>, vector<2x24x8xf32>, vector<2x24x24xf32> -> vector<2x24x24xf32>
    "tpu.trace_stop"() : () -> ()
    %cst_31 = arith.constant 0.353553385 : f32
    %70 = vector.broadcast %cst_31 : f32 to vector<2x24x24xf32>
    %71 = arith.mulf %69, %70 : vector<2x24x24xf32>
    %72 = vector.broadcast %6 : vector<1x1x24xf32> to vector<2x24x24xf32>
    %73 = arith.addf %71, %72 : vector<2x24x24xf32>
    %cst_32 = arith.constant dense<0xFF800000> : vector<2x24xf32>
    %74 = vector.multi_reduction <maximumf>, %73, %cst_32 [2] : vector<2x24x24xf32> to vector<2x24xf32>
    %75 = vector.shape_cast %74 : vector<2x24xf32> to vector<2x24x1xf32>
    %76 = vector.broadcast %75 : vector<2x24x1xf32> to vector<2x24x24xf32>
    %77 = arith.subf %73, %76 : vector<2x24x24xf32>
    %78 = math.exp %77 : vector<2x24x24xf32>
    %cst_33 = arith.constant dense<0.000000e+00> : vector<2x24xf32>
    %79 = vector.multi_reduction <add>, %78, %cst_33 [2] : vector<2x24x24xf32> to vector<2x24xf32>
    %80 = vector.shape_cast %79 : vector<2x24xf32> to vector<2x24x1xf32>
    %81 = tpu.reciprocal %80 {approx = true} : vector<2x24x1xf32> -> vector<2x24x1xf32>
    %82 = vector.broadcast %81 : vector<2x24x1xf32> to vector<2x24x24xf32>
    %83 = arith.mulf %78, %82 : vector<2x24x24xf32>
    "tpu.trace_start"() <{level = 10 : i32, message = "bqk,bkd->bqd"}> : () -> ()
    %cst_34 = arith.constant dense<0.000000e+00> : vector<2x24x8xf32>
    %84 = tpu.matmul %83, %68, %cst_34 {dimension_numbers = #tpu.dot_dimension_numbers<[2], [1], [1], [2], [0, 0, 0, 1, 1, 2], [0], [0]>} : vector<2x24x24xf32>, vector<2x24x8xf32>, vector<2x24x8xf32> -> vector<2x24x8xf32>
    "tpu.trace_stop"() : () -> ()
    %85 = vector.shape_cast %84 : vector<2x24x8xf32> to vector<48x8xf32>
    %86 = vector.extract_strided_slice %39 {offsets = [0, 16], sizes = [48, 8], strides = [1, 1]} : vector<48x96xf32> to vector<48x8xf32>
    %87 = vector.shape_cast %86 : vector<48x8xf32> to vector<2x24x8xf32>
    %88 = vector.extract_strided_slice %39 {offsets = [0, 48], sizes = [48, 8], strides = [1, 1]} : vector<48x96xf32> to vector<48x8xf32>
    %89 = vector.shape_cast %88 : vector<48x8xf32> to vector<2x24x8xf32>
    %90 = vector.extract_strided_slice %39 {offsets = [0, 80], sizes = [48, 8], strides = [1, 1]} : vector<48x96xf32> to vector<48x8xf32>
    %91 = vector.shape_cast %90 : vector<48x8xf32> to vector<2x24x8xf32>
    "tpu.trace_start"() <{level = 10 : i32, message = "bqd,bkd->bqk"}> : () -> ()
    %cst_35 = arith.constant dense<0.000000e+00> : vector<2x24x24xf32>
    %92 = tpu.matmul %87, %89, %cst_35 {dimension_numbers = #tpu.dot_dimension_numbers<[2], [2], [1], [1], [0, 0, 0, 1, 1, 1], [0], [0]>} : vector<2x24x8xf32>, vector<2x24x8xf32>, vector<2x24x24xf32> -> vector<2x24x24xf32>
    "tpu.trace_stop"() : () -> ()
    %cst_36 = arith.constant 0.353553385 : f32
    %93 = vector.broadcast %cst_36 : f32 to vector<2x24x24xf32>
    %94 = arith.mulf %92, %93 : vector<2x24x24xf32>
    %95 = vector.broadcast %6 : vector<1x1x24xf32> to vector<2x24x24xf32>
    %96 = arith.addf %94, %95 : vector<2x24x24xf32>
    %cst_37 = arith.constant dense<0xFF800000> : vector<2x24xf32>
    %97 = vector.multi_reduction <maximumf>, %96, %cst_37 [2] : vector<2x24x24xf32> to vector<2x24xf32>
    %98 = vector.shape_cast %97 : vector<2x24xf32> to vector<2x24x1xf32>
    %99 = vector.broadcast %98 : vector<2x24x1xf32> to vector<2x24x24xf32>
    %100 = arith.subf %96, %99 : vector<2x24x24xf32>
    %101 = math.exp %100 : vector<2x24x24xf32>
    %cst_38 = arith.constant dense<0.000000e+00> : vector<2x24xf32>
    %102 = vector.multi_reduction <add>, %101, %cst_38 [2] : vector<2x24x24xf32> to vector<2x24xf32>
    %103 = vector.shape_cast %102 : vector<2x24xf32> to vector<2x24x1xf32>
    %104 = tpu.reciprocal %103 {approx = true} : vector<2x24x1xf32> -> vector<2x24x1xf32>
    %105 = vector.broadcast %104 : vector<2x24x1xf32> to vector<2x24x24xf32>
    %106 = arith.mulf %101, %105 : vector<2x24x24xf32>
    "tpu.trace_start"() <{level = 10 : i32, message = "bqk,bkd->bqd"}> : () -> ()
    %cst_39 = arith.constant dense<0.000000e+00> : vector<2x24x8xf32>
    %107 = tpu.matmul %106, %91, %cst_39 {dimension_numbers = #tpu.dot_dimension_numbers<[2], [1], [1], [2], [0, 0, 0, 1, 1, 2], [0], [0]>} : vector<2x24x24xf32>, vector<2x24x8xf32>, vector<2x24x8xf32> -> vector<2x24x8xf32>
    "tpu.trace_stop"() : () -> ()
    %108 = vector.shape_cast %107 : vector<2x24x8xf32> to vector<48x8xf32>
    %109 = vector.extract_strided_slice %39 {offsets = [0, 24], sizes = [48, 8], strides = [1, 1]} : vector<48x96xf32> to vector<48x8xf32>
    %110 = vector.shape_cast %109 : vector<48x8xf32> to vector<2x24x8xf32>
    %111 = vector.extract_strided_slice %39 {offsets = [0, 56], sizes = [48, 8], strides = [1, 1]} : vector<48x96xf32> to vector<48x8xf32>
    %112 = vector.shape_cast %111 : vector<48x8xf32> to vector<2x24x8xf32>
    %113 = vector.extract_strided_slice %39 {offsets = [0, 88], sizes = [48, 8], strides = [1, 1]} : vector<48x96xf32> to vector<48x8xf32>
    %114 = vector.shape_cast %113 : vector<48x8xf32> to vector<2x24x8xf32>
    "tpu.trace_start"() <{level = 10 : i32, message = "bqd,bkd->bqk"}> : () -> ()
    %cst_40 = arith.constant dense<0.000000e+00> : vector<2x24x24xf32>
    %115 = tpu.matmul %110, %112, %cst_40 {dimension_numbers = #tpu.dot_dimension_numbers<[2], [2], [1], [1], [0, 0, 0, 1, 1, 1], [0], [0]>} : vector<2x24x8xf32>, vector<2x24x8xf32>, vector<2x24x24xf32> -> vector<2x24x24xf32>
    "tpu.trace_stop"() : () -> ()
    %cst_41 = arith.constant 0.353553385 : f32
    %116 = vector.broadcast %cst_41 : f32 to vector<2x24x24xf32>
    %117 = arith.mulf %115, %116 : vector<2x24x24xf32>
    %118 = vector.broadcast %6 : vector<1x1x24xf32> to vector<2x24x24xf32>
    %119 = arith.addf %117, %118 : vector<2x24x24xf32>
    %cst_42 = arith.constant dense<0xFF800000> : vector<2x24xf32>
    %120 = vector.multi_reduction <maximumf>, %119, %cst_42 [2] : vector<2x24x24xf32> to vector<2x24xf32>
    %121 = vector.shape_cast %120 : vector<2x24xf32> to vector<2x24x1xf32>
    %122 = vector.broadcast %121 : vector<2x24x1xf32> to vector<2x24x24xf32>
    %123 = arith.subf %119, %122 : vector<2x24x24xf32>
    %124 = math.exp %123 : vector<2x24x24xf32>
    %cst_43 = arith.constant dense<0.000000e+00> : vector<2x24xf32>
    %125 = vector.multi_reduction <add>, %124, %cst_43 [2] : vector<2x24x24xf32> to vector<2x24xf32>
    %126 = vector.shape_cast %125 : vector<2x24xf32> to vector<2x24x1xf32>
    %127 = tpu.reciprocal %126 {approx = true} : vector<2x24x1xf32> -> vector<2x24x1xf32>
    %128 = vector.broadcast %127 : vector<2x24x1xf32> to vector<2x24x24xf32>
    %129 = arith.mulf %124, %128 : vector<2x24x24xf32>
    "tpu.trace_start"() <{level = 10 : i32, message = "bqk,bkd->bqd"}> : () -> ()
    %cst_44 = arith.constant dense<0.000000e+00> : vector<2x24x8xf32>
    %130 = tpu.matmul %129, %114, %cst_44 {dimension_numbers = #tpu.dot_dimension_numbers<[2], [1], [1], [2], [0, 0, 0, 1, 1, 2], [0], [0]>} : vector<2x24x24xf32>, vector<2x24x8xf32>, vector<2x24x8xf32> -> vector<2x24x8xf32>
    "tpu.trace_stop"() : () -> ()
    %131 = vector.shape_cast %130 : vector<2x24x8xf32> to vector<48x8xf32>
    %132 = tpu.concatenate %62, %85, %108, %131 in 1 : vector<48x8xf32>, vector<48x8xf32>, vector<48x8xf32>, vector<48x8xf32> -> vector<48x32xf32>
    %c0_45 = arith.constant 0 : index
    %c0_46 = arith.constant 0 : index
    %c0_47 = arith.constant 0 : index
    %133 = vector.load %arg8[%c0_45, %c0_46, %c0_47] : memref<2x32x32xf32, #tpu.memory_space<vmem>>, vector<1x32x32xf32>
    %134 = vector.shape_cast %133 : vector<1x32x32xf32> to vector<32x32xf32>
    %cst_48 = arith.constant dense<0.000000e+00> : vector<48x32xf32>
    %135 = tpu.matmul %132, %134, %cst_48 {dimension_numbers = #tpu.dot_dimension_numbers<[1], [0], [0], [1], [0, 0, 1, 1], [], []>} : vector<48x32xf32>, vector<32x32xf32>, vector<48x32xf32> -> vector<48x32xf32>
    %c0_49 = arith.constant 0 : index
    %c0_50 = arith.constant 0 : index
    %c0_51 = arith.constant 0 : index
    %136 = vector.load %arg9[%c0_49, %c0_50, %c0_51] : memref<2x1x32xf32, #tpu.memory_space<vmem>>, vector<1x1x32xf32>
    %137 = vector.shape_cast %136 : vector<1x1x32xf32> to vector<1x32xf32>
    %138 = vector.broadcast %137 : vector<1x32xf32> to vector<48x32xf32>
    %139 = arith.addf %135, %138 : vector<48x32xf32>
    %140 = arith.addf %4, %139 : vector<48x32xf32>
    %c0_52 = arith.constant 0 : index
    %c0_53 = arith.constant 0 : index
    %c0_54 = arith.constant 0 : index
    %141 = vector.load %arg10[%c0_52, %c0_53, %c0_54] : memref<2x1x32xf32, #tpu.memory_space<vmem>>, vector<1x1x32xf32>
    %142 = vector.shape_cast %141 : vector<1x1x32xf32> to vector<1x32xf32>
    %c0_55 = arith.constant 0 : index
    %c0_56 = arith.constant 0 : index
    %c0_57 = arith.constant 0 : index
    %143 = vector.load %arg11[%c0_55, %c0_56, %c0_57] : memref<2x1x32xf32, #tpu.memory_space<vmem>>, vector<1x1x32xf32>
    %144 = vector.shape_cast %143 : vector<1x1x32xf32> to vector<1x32xf32>
    %cst_58 = arith.constant dense<0.000000e+00> : vector<48xf32>
    %145 = vector.multi_reduction <add>, %140, %cst_58 [1] : vector<48x32xf32> to vector<48xf32>
    %146 = vector.shape_cast %145 : vector<48xf32> to vector<48x1xf32>
    %cst_59 = arith.constant 3.200000e+01 : f32
    %147 = vector.broadcast %cst_59 : f32 to vector<48x1xf32>
    %148 = arith.divf %146, %147 : vector<48x1xf32>
    %149 = vector.broadcast %148 : vector<48x1xf32> to vector<48x32xf32>
    %150 = arith.subf %140, %149 : vector<48x32xf32>
    %151 = arith.mulf %150, %150 : vector<48x32xf32>
    %cst_60 = arith.constant dense<0.000000e+00> : vector<48xf32>
    %152 = vector.multi_reduction <add>, %151, %cst_60 [1] : vector<48x32xf32> to vector<48xf32>
    %153 = vector.shape_cast %152 : vector<48xf32> to vector<48x1xf32>
    %cst_61 = arith.constant 3.200000e+01 : f32
    %154 = vector.broadcast %cst_61 : f32 to vector<48x1xf32>
    %155 = arith.divf %153, %154 : vector<48x1xf32>
    %156 = vector.broadcast %148 : vector<48x1xf32> to vector<48x32xf32>
    %157 = arith.subf %140, %156 : vector<48x32xf32>
    %cst_62 = arith.constant 9.99999997E-7 : f32
    %158 = vector.broadcast %cst_62 : f32 to vector<48x1xf32>
    %159 = arith.addf %155, %158 : vector<48x1xf32>
    %160 = math.rsqrt %159 : vector<48x1xf32>
    %161 = vector.broadcast %160 : vector<48x1xf32> to vector<48x32xf32>
    %162 = arith.mulf %157, %161 : vector<48x32xf32>
    %163 = vector.broadcast %142 : vector<1x32xf32> to vector<48x32xf32>
    %164 = arith.mulf %162, %163 : vector<48x32xf32>
    %165 = vector.broadcast %144 : vector<1x32xf32> to vector<48x32xf32>
    %166 = arith.addf %164, %165 : vector<48x32xf32>
    %c0_63 = arith.constant 0 : index
    %c0_64 = arith.constant 0 : index
    %c0_65 = arith.constant 0 : index
    %167 = vector.load %arg12[%c0_63, %c0_64, %c0_65] : memref<2x32x128xf32, #tpu.memory_space<vmem>>, vector<1x32x128xf32>
    %168 = vector.shape_cast %167 : vector<1x32x128xf32> to vector<32x128xf32>
    %cst_66 = arith.constant dense<0.000000e+00> : vector<48x128xf32>
    %169 = tpu.matmul %166, %168, %cst_66 {dimension_numbers = #tpu.dot_dimension_numbers<[1], [0], [0], [1], [0, 0, 1, 1], [], []>} : vector<48x32xf32>, vector<32x128xf32>, vector<48x128xf32> -> vector<48x128xf32>
    %c0_67 = arith.constant 0 : index
    %c0_68 = arith.constant 0 : index
    %c0_69 = arith.constant 0 : index
    %170 = vector.load %arg13[%c0_67, %c0_68, %c0_69] : memref<2x1x128xf32, #tpu.memory_space<vmem>>, vector<1x1x128xf32>
    %171 = vector.shape_cast %170 : vector<1x1x128xf32> to vector<1x128xf32>
    %172 = vector.broadcast %171 : vector<1x128xf32> to vector<48x128xf32>
    %173 = arith.addf %169, %172 : vector<48x128xf32>
    %174 = arith.mulf %173, %173 : vector<48x128xf32>
    %175 = arith.mulf %173, %174 : vector<48x128xf32>
    %cst_70 = arith.constant 4.471500e-02 : f32
    %176 = vector.broadcast %cst_70 : f32 to vector<48x128xf32>
    %177 = arith.mulf %176, %175 : vector<48x128xf32>
    %178 = arith.addf %173, %177 : vector<48x128xf32>
    %cst_71 = arith.constant 0.797884583 : f32
    %179 = vector.broadcast %cst_71 : f32 to vector<48x128xf32>
    %180 = arith.mulf %179, %178 : vector<48x128xf32>
    %181 = math.tanh %180 : vector<48x128xf32>
    %cst_72 = arith.constant 1.000000e+00 : f32
    %182 = vector.broadcast %cst_72 : f32 to vector<48x128xf32>
    %183 = arith.addf %182, %181 : vector<48x128xf32>
    %cst_73 = arith.constant 5.000000e-01 : f32
    %184 = vector.broadcast %cst_73 : f32 to vector<48x128xf32>
    %185 = arith.mulf %184, %183 : vector<48x128xf32>
    %186 = arith.mulf %173, %185 : vector<48x128xf32>
    %c0_74 = arith.constant 0 : index
    %c0_75 = arith.constant 0 : index
    %c0_76 = arith.constant 0 : index
    %187 = vector.load %arg14[%c0_74, %c0_75, %c0_76] : memref<2x128x32xf32, #tpu.memory_space<vmem>>, vector<1x128x32xf32>
    %188 = vector.shape_cast %187 : vector<1x128x32xf32> to vector<128x32xf32>
    %cst_77 = arith.constant dense<0.000000e+00> : vector<48x32xf32>
    %189 = tpu.matmul %186, %188, %cst_77 {dimension_numbers = #tpu.dot_dimension_numbers<[1], [0], [0], [1], [0, 0, 1, 1], [], []>} : vector<48x128xf32>, vector<128x32xf32>, vector<48x32xf32> -> vector<48x32xf32>
    %c0_78 = arith.constant 0 : index
    %c0_79 = arith.constant 0 : index
    %c0_80 = arith.constant 0 : index
    %190 = vector.load %arg15[%c0_78, %c0_79, %c0_80] : memref<2x1x32xf32, #tpu.memory_space<vmem>>, vector<1x1x32xf32>
    %191 = vector.shape_cast %190 : vector<1x1x32xf32> to vector<1x32xf32>
    %192 = vector.broadcast %191 : vector<1x32xf32> to vector<48x32xf32>
    %193 = arith.addf %189, %192 : vector<48x32xf32>
    %194 = arith.addf %140, %193 : vector<48x32xf32>
    %c1 = arith.constant 1 : index
    %c0_81 = arith.constant 0 : index
    %c0_82 = arith.constant 0 : index
    %195 = vector.load %arg4[%c1, %c0_81, %c0_82] : memref<2x1x32xf32, #tpu.memory_space<vmem>>, vector<1x1x32xf32>
    %196 = vector.shape_cast %195 : vector<1x1x32xf32> to vector<1x32xf32>
    %c1_83 = arith.constant 1 : index
    %c0_84 = arith.constant 0 : index
    %c0_85 = arith.constant 0 : index
    %197 = vector.load %arg5[%c1_83, %c0_84, %c0_85] : memref<2x1x32xf32, #tpu.memory_space<vmem>>, vector<1x1x32xf32>
    %198 = vector.shape_cast %197 : vector<1x1x32xf32> to vector<1x32xf32>
    %cst_86 = arith.constant dense<0.000000e+00> : vector<48xf32>
    %199 = vector.multi_reduction <add>, %194, %cst_86 [1] : vector<48x32xf32> to vector<48xf32>
    %200 = vector.shape_cast %199 : vector<48xf32> to vector<48x1xf32>
    %cst_87 = arith.constant 3.200000e+01 : f32
    %201 = vector.broadcast %cst_87 : f32 to vector<48x1xf32>
    %202 = arith.divf %200, %201 : vector<48x1xf32>
    %203 = vector.broadcast %202 : vector<48x1xf32> to vector<48x32xf32>
    %204 = arith.subf %194, %203 : vector<48x32xf32>
    %205 = arith.mulf %204, %204 : vector<48x32xf32>
    %cst_88 = arith.constant dense<0.000000e+00> : vector<48xf32>
    %206 = vector.multi_reduction <add>, %205, %cst_88 [1] : vector<48x32xf32> to vector<48xf32>
    %207 = vector.shape_cast %206 : vector<48xf32> to vector<48x1xf32>
    %cst_89 = arith.constant 3.200000e+01 : f32
    %208 = vector.broadcast %cst_89 : f32 to vector<48x1xf32>
    %209 = arith.divf %207, %208 : vector<48x1xf32>
    %210 = vector.broadcast %202 : vector<48x1xf32> to vector<48x32xf32>
    %211 = arith.subf %194, %210 : vector<48x32xf32>
    %cst_90 = arith.constant 9.99999997E-7 : f32
    %212 = vector.broadcast %cst_90 : f32 to vector<48x1xf32>
    %213 = arith.addf %209, %212 : vector<48x1xf32>
    %214 = math.rsqrt %213 : vector<48x1xf32>
    %215 = vector.broadcast %214 : vector<48x1xf32> to vector<48x32xf32>
    %216 = arith.mulf %211, %215 : vector<48x32xf32>
    %217 = vector.broadcast %196 : vector<1x32xf32> to vector<48x32xf32>
    %218 = arith.mulf %216, %217 : vector<48x32xf32>
    %219 = vector.broadcast %198 : vector<1x32xf32> to vector<48x32xf32>
    %220 = arith.addf %218, %219 : vector<48x32xf32>
    %c1_91 = arith.constant 1 : index
    %c0_92 = arith.constant 0 : index
    %c0_93 = arith.constant 0 : index
    %221 = vector.load %arg6[%c1_91, %c0_92, %c0_93] : memref<2x32x96xf32, #tpu.memory_space<vmem>>, vector<1x32x96xf32>
    %222 = vector.shape_cast %221 : vector<1x32x96xf32> to vector<32x96xf32>
    %cst_94 = arith.constant dense<0.000000e+00> : vector<48x96xf32>
    %223 = tpu.matmul %220, %222, %cst_94 {dimension_numbers = #tpu.dot_dimension_numbers<[1], [0], [0], [1], [0, 0, 1, 1], [], []>} : vector<48x32xf32>, vector<32x96xf32>, vector<48x96xf32> -> vector<48x96xf32>
    %c1_95 = arith.constant 1 : index
    %c0_96 = arith.constant 0 : index
    %c0_97 = arith.constant 0 : index
    %224 = vector.load %arg7[%c1_95, %c0_96, %c0_97] : memref<2x1x96xf32, #tpu.memory_space<vmem>>, vector<1x1x96xf32>
    %225 = vector.shape_cast %224 : vector<1x1x96xf32> to vector<1x96xf32>
    %226 = vector.broadcast %225 : vector<1x96xf32> to vector<48x96xf32>
    %227 = arith.addf %223, %226 : vector<48x96xf32>
    %228 = vector.extract_strided_slice %227 {offsets = [0, 0], sizes = [48, 8], strides = [1, 1]} : vector<48x96xf32> to vector<48x8xf32>
    %229 = vector.shape_cast %228 : vector<48x8xf32> to vector<2x24x8xf32>
    %230 = vector.extract_strided_slice %227 {offsets = [0, 32], sizes = [48, 8], strides = [1, 1]} : vector<48x96xf32> to vector<48x8xf32>
    %231 = vector.shape_cast %230 : vector<48x8xf32> to vector<2x24x8xf32>
    %232 = vector.extract_strided_slice %227 {offsets = [0, 64], sizes = [48, 8], strides = [1, 1]} : vector<48x96xf32> to vector<48x8xf32>
    %233 = vector.shape_cast %232 : vector<48x8xf32> to vector<2x24x8xf32>
    "tpu.trace_start"() <{level = 10 : i32, message = "bqd,bkd->bqk"}> : () -> ()
    %cst_98 = arith.constant dense<0.000000e+00> : vector<2x24x24xf32>
    %234 = tpu.matmul %229, %231, %cst_98 {dimension_numbers = #tpu.dot_dimension_numbers<[2], [2], [1], [1], [0, 0, 0, 1, 1, 1], [0], [0]>} : vector<2x24x8xf32>, vector<2x24x8xf32>, vector<2x24x24xf32> -> vector<2x24x24xf32>
    "tpu.trace_stop"() : () -> ()
    %cst_99 = arith.constant 0.353553385 : f32
    %235 = vector.broadcast %cst_99 : f32 to vector<2x24x24xf32>
    %236 = arith.mulf %234, %235 : vector<2x24x24xf32>
    %237 = vector.broadcast %6 : vector<1x1x24xf32> to vector<2x24x24xf32>
    %238 = arith.addf %236, %237 : vector<2x24x24xf32>
    %cst_100 = arith.constant dense<0xFF800000> : vector<2x24xf32>
    %239 = vector.multi_reduction <maximumf>, %238, %cst_100 [2] : vector<2x24x24xf32> to vector<2x24xf32>
    %240 = vector.shape_cast %239 : vector<2x24xf32> to vector<2x24x1xf32>
    %241 = vector.broadcast %240 : vector<2x24x1xf32> to vector<2x24x24xf32>
    %242 = arith.subf %238, %241 : vector<2x24x24xf32>
    %243 = math.exp %242 : vector<2x24x24xf32>
    %cst_101 = arith.constant dense<0.000000e+00> : vector<2x24xf32>
    %244 = vector.multi_reduction <add>, %243, %cst_101 [2] : vector<2x24x24xf32> to vector<2x24xf32>
    %245 = vector.shape_cast %244 : vector<2x24xf32> to vector<2x24x1xf32>
    %246 = tpu.reciprocal %245 {approx = true} : vector<2x24x1xf32> -> vector<2x24x1xf32>
    %247 = vector.broadcast %246 : vector<2x24x1xf32> to vector<2x24x24xf32>
    %248 = arith.mulf %243, %247 : vector<2x24x24xf32>
    "tpu.trace_start"() <{level = 10 : i32, message = "bqk,bkd->bqd"}> : () -> ()
    %cst_102 = arith.constant dense<0.000000e+00> : vector<2x24x8xf32>
    %249 = tpu.matmul %248, %233, %cst_102 {dimension_numbers = #tpu.dot_dimension_numbers<[2], [1], [1], [2], [0, 0, 0, 1, 1, 2], [0], [0]>} : vector<2x24x24xf32>, vector<2x24x8xf32>, vector<2x24x8xf32> -> vector<2x24x8xf32>
    "tpu.trace_stop"() : () -> ()
    %250 = vector.shape_cast %249 : vector<2x24x8xf32> to vector<48x8xf32>
    %251 = vector.extract_strided_slice %227 {offsets = [0, 8], sizes = [48, 8], strides = [1, 1]} : vector<48x96xf32> to vector<48x8xf32>
    %252 = vector.shape_cast %251 : vector<48x8xf32> to vector<2x24x8xf32>
    %253 = vector.extract_strided_slice %227 {offsets = [0, 40], sizes = [48, 8], strides = [1, 1]} : vector<48x96xf32> to vector<48x8xf32>
    %254 = vector.shape_cast %253 : vector<48x8xf32> to vector<2x24x8xf32>
    %255 = vector.extract_strided_slice %227 {offsets = [0, 72], sizes = [48, 8], strides = [1, 1]} : vector<48x96xf32> to vector<48x8xf32>
    %256 = vector.shape_cast %255 : vector<48x8xf32> to vector<2x24x8xf32>
    "tpu.trace_start"() <{level = 10 : i32, message = "bqd,bkd->bqk"}> : () -> ()
    %cst_103 = arith.constant dense<0.000000e+00> : vector<2x24x24xf32>
    %257 = tpu.matmul %252, %254, %cst_103 {dimension_numbers = #tpu.dot_dimension_numbers<[2], [2], [1], [1], [0, 0, 0, 1, 1, 1], [0], [0]>} : vector<2x24x8xf32>, vector<2x24x8xf32>, vector<2x24x24xf32> -> vector<2x24x24xf32>
    "tpu.trace_stop"() : () -> ()
    %cst_104 = arith.constant 0.353553385 : f32
    %258 = vector.broadcast %cst_104 : f32 to vector<2x24x24xf32>
    %259 = arith.mulf %257, %258 : vector<2x24x24xf32>
    %260 = vector.broadcast %6 : vector<1x1x24xf32> to vector<2x24x24xf32>
    %261 = arith.addf %259, %260 : vector<2x24x24xf32>
    %cst_105 = arith.constant dense<0xFF800000> : vector<2x24xf32>
    %262 = vector.multi_reduction <maximumf>, %261, %cst_105 [2] : vector<2x24x24xf32> to vector<2x24xf32>
    %263 = vector.shape_cast %262 : vector<2x24xf32> to vector<2x24x1xf32>
    %264 = vector.broadcast %263 : vector<2x24x1xf32> to vector<2x24x24xf32>
    %265 = arith.subf %261, %264 : vector<2x24x24xf32>
    %266 = math.exp %265 : vector<2x24x24xf32>
    %cst_106 = arith.constant dense<0.000000e+00> : vector<2x24xf32>
    %267 = vector.multi_reduction <add>, %266, %cst_106 [2] : vector<2x24x24xf32> to vector<2x24xf32>
    %268 = vector.shape_cast %267 : vector<2x24xf32> to vector<2x24x1xf32>
    %269 = tpu.reciprocal %268 {approx = true} : vector<2x24x1xf32> -> vector<2x24x1xf32>
    %270 = vector.broadcast %269 : vector<2x24x1xf32> to vector<2x24x24xf32>
    %271 = arith.mulf %266, %270 : vector<2x24x24xf32>
    "tpu.trace_start"() <{level = 10 : i32, message = "bqk,bkd->bqd"}> : () -> ()
    %cst_107 = arith.constant dense<0.000000e+00> : vector<2x24x8xf32>
    %272 = tpu.matmul %271, %256, %cst_107 {dimension_numbers = #tpu.dot_dimension_numbers<[2], [1], [1], [2], [0, 0, 0, 1, 1, 2], [0], [0]>} : vector<2x24x24xf32>, vector<2x24x8xf32>, vector<2x24x8xf32> -> vector<2x24x8xf32>
    "tpu.trace_stop"() : () -> ()
    %273 = vector.shape_cast %272 : vector<2x24x8xf32> to vector<48x8xf32>
    %274 = vector.extract_strided_slice %227 {offsets = [0, 16], sizes = [48, 8], strides = [1, 1]} : vector<48x96xf32> to vector<48x8xf32>
    %275 = vector.shape_cast %274 : vector<48x8xf32> to vector<2x24x8xf32>
    %276 = vector.extract_strided_slice %227 {offsets = [0, 48], sizes = [48, 8], strides = [1, 1]} : vector<48x96xf32> to vector<48x8xf32>
    %277 = vector.shape_cast %276 : vector<48x8xf32> to vector<2x24x8xf32>
    %278 = vector.extract_strided_slice %227 {offsets = [0, 80], sizes = [48, 8], strides = [1, 1]} : vector<48x96xf32> to vector<48x8xf32>
    %279 = vector.shape_cast %278 : vector<48x8xf32> to vector<2x24x8xf32>
    "tpu.trace_start"() <{level = 10 : i32, message = "bqd,bkd->bqk"}> : () -> ()
    %cst_108 = arith.constant dense<0.000000e+00> : vector<2x24x24xf32>
    %280 = tpu.matmul %275, %277, %cst_108 {dimension_numbers = #tpu.dot_dimension_numbers<[2], [2], [1], [1], [0, 0, 0, 1, 1, 1], [0], [0]>} : vector<2x24x8xf32>, vector<2x24x8xf32>, vector<2x24x24xf32> -> vector<2x24x24xf32>
    "tpu.trace_stop"() : () -> ()
    %cst_109 = arith.constant 0.353553385 : f32
    %281 = vector.broadcast %cst_109 : f32 to vector<2x24x24xf32>
    %282 = arith.mulf %280, %281 : vector<2x24x24xf32>
    %283 = vector.broadcast %6 : vector<1x1x24xf32> to vector<2x24x24xf32>
    %284 = arith.addf %282, %283 : vector<2x24x24xf32>
    %cst_110 = arith.constant dense<0xFF800000> : vector<2x24xf32>
    %285 = vector.multi_reduction <maximumf>, %284, %cst_110 [2] : vector<2x24x24xf32> to vector<2x24xf32>
    %286 = vector.shape_cast %285 : vector<2x24xf32> to vector<2x24x1xf32>
    %287 = vector.broadcast %286 : vector<2x24x1xf32> to vector<2x24x24xf32>
    %288 = arith.subf %284, %287 : vector<2x24x24xf32>
    %289 = math.exp %288 : vector<2x24x24xf32>
    %cst_111 = arith.constant dense<0.000000e+00> : vector<2x24xf32>
    %290 = vector.multi_reduction <add>, %289, %cst_111 [2] : vector<2x24x24xf32> to vector<2x24xf32>
    %291 = vector.shape_cast %290 : vector<2x24xf32> to vector<2x24x1xf32>
    %292 = tpu.reciprocal %291 {approx = true} : vector<2x24x1xf32> -> vector<2x24x1xf32>
    %293 = vector.broadcast %292 : vector<2x24x1xf32> to vector<2x24x24xf32>
    %294 = arith.mulf %289, %293 : vector<2x24x24xf32>
    "tpu.trace_start"() <{level = 10 : i32, message = "bqk,bkd->bqd"}> : () -> ()
    %cst_112 = arith.constant dense<0.000000e+00> : vector<2x24x8xf32>
    %295 = tpu.matmul %294, %279, %cst_112 {dimension_numbers = #tpu.dot_dimension_numbers<[2], [1], [1], [2], [0, 0, 0, 1, 1, 2], [0], [0]>} : vector<2x24x24xf32>, vector<2x24x8xf32>, vector<2x24x8xf32> -> vector<2x24x8xf32>
    "tpu.trace_stop"() : () -> ()
    %296 = vector.shape_cast %295 : vector<2x24x8xf32> to vector<48x8xf32>
    %297 = vector.extract_strided_slice %227 {offsets = [0, 24], sizes = [48, 8], strides = [1, 1]} : vector<48x96xf32> to vector<48x8xf32>
    %298 = vector.shape_cast %297 : vector<48x8xf32> to vector<2x24x8xf32>
    %299 = vector.extract_strided_slice %227 {offsets = [0, 56], sizes = [48, 8], strides = [1, 1]} : vector<48x96xf32> to vector<48x8xf32>
    %300 = vector.shape_cast %299 : vector<48x8xf32> to vector<2x24x8xf32>
    %301 = vector.extract_strided_slice %227 {offsets = [0, 88], sizes = [48, 8], strides = [1, 1]} : vector<48x96xf32> to vector<48x8xf32>
    %302 = vector.shape_cast %301 : vector<48x8xf32> to vector<2x24x8xf32>
    "tpu.trace_start"() <{level = 10 : i32, message = "bqd,bkd->bqk"}> : () -> ()
    %cst_113 = arith.constant dense<0.000000e+00> : vector<2x24x24xf32>
    %303 = tpu.matmul %298, %300, %cst_113 {dimension_numbers = #tpu.dot_dimension_numbers<[2], [2], [1], [1], [0, 0, 0, 1, 1, 1], [0], [0]>} : vector<2x24x8xf32>, vector<2x24x8xf32>, vector<2x24x24xf32> -> vector<2x24x24xf32>
    "tpu.trace_stop"() : () -> ()
    %cst_114 = arith.constant 0.353553385 : f32
    %304 = vector.broadcast %cst_114 : f32 to vector<2x24x24xf32>
    %305 = arith.mulf %303, %304 : vector<2x24x24xf32>
    %306 = vector.broadcast %6 : vector<1x1x24xf32> to vector<2x24x24xf32>
    %307 = arith.addf %305, %306 : vector<2x24x24xf32>
    %cst_115 = arith.constant dense<0xFF800000> : vector<2x24xf32>
    %308 = vector.multi_reduction <maximumf>, %307, %cst_115 [2] : vector<2x24x24xf32> to vector<2x24xf32>
    %309 = vector.shape_cast %308 : vector<2x24xf32> to vector<2x24x1xf32>
    %310 = vector.broadcast %309 : vector<2x24x1xf32> to vector<2x24x24xf32>
    %311 = arith.subf %307, %310 : vector<2x24x24xf32>
    %312 = math.exp %311 : vector<2x24x24xf32>
    %cst_116 = arith.constant dense<0.000000e+00> : vector<2x24xf32>
    %313 = vector.multi_reduction <add>, %312, %cst_116 [2] : vector<2x24x24xf32> to vector<2x24xf32>
    %314 = vector.shape_cast %313 : vector<2x24xf32> to vector<2x24x1xf32>
    %315 = tpu.reciprocal %314 {approx = true} : vector<2x24x1xf32> -> vector<2x24x1xf32>
    %316 = vector.broadcast %315 : vector<2x24x1xf32> to vector<2x24x24xf32>
    %317 = arith.mulf %312, %316 : vector<2x24x24xf32>
    "tpu.trace_start"() <{level = 10 : i32, message = "bqk,bkd->bqd"}> : () -> ()
    %cst_117 = arith.constant dense<0.000000e+00> : vector<2x24x8xf32>
    %318 = tpu.matmul %317, %302, %cst_117 {dimension_numbers = #tpu.dot_dimension_numbers<[2], [1], [1], [2], [0, 0, 0, 1, 1, 2], [0], [0]>} : vector<2x24x24xf32>, vector<2x24x8xf32>, vector<2x24x8xf32> -> vector<2x24x8xf32>
    "tpu.trace_stop"() : () -> ()
    %319 = vector.shape_cast %318 : vector<2x24x8xf32> to vector<48x8xf32>
    %320 = tpu.concatenate %250, %273, %296, %319 in 1 : vector<48x8xf32>, vector<48x8xf32>, vector<48x8xf32>, vector<48x8xf32> -> vector<48x32xf32>
    %c1_118 = arith.constant 1 : index
    %c0_119 = arith.constant 0 : index
    %c0_120 = arith.constant 0 : index
    %321 = vector.load %arg8[%c1_118, %c0_119, %c0_120] : memref<2x32x32xf32, #tpu.memory_space<vmem>>, vector<1x32x32xf32>
    %322 = vector.shape_cast %321 : vector<1x32x32xf32> to vector<32x32xf32>
    %cst_121 = arith.constant dense<0.000000e+00> : vector<48x32xf32>
    %323 = tpu.matmul %320, %322, %cst_121 {dimension_numbers = #tpu.dot_dimension_numbers<[1], [0], [0], [1], [0, 0, 1, 1], [], []>} : vector<48x32xf32>, vector<32x32xf32>, vector<48x32xf32> -> vector<48x32xf32>
    %c1_122 = arith.constant 1 : index
    %c0_123 = arith.constant 0 : index
    %c0_124 = arith.constant 0 : index
    %324 = vector.load %arg9[%c1_122, %c0_123, %c0_124] : memref<2x1x32xf32, #tpu.memory_space<vmem>>, vector<1x1x32xf32>
    %325 = vector.shape_cast %324 : vector<1x1x32xf32> to vector<1x32xf32>
    %326 = vector.broadcast %325 : vector<1x32xf32> to vector<48x32xf32>
    %327 = arith.addf %323, %326 : vector<48x32xf32>
    %328 = arith.addf %194, %327 : vector<48x32xf32>
    %c1_125 = arith.constant 1 : index
    %c0_126 = arith.constant 0 : index
    %c0_127 = arith.constant 0 : index
    %329 = vector.load %arg10[%c1_125, %c0_126, %c0_127] : memref<2x1x32xf32, #tpu.memory_space<vmem>>, vector<1x1x32xf32>
    %330 = vector.shape_cast %329 : vector<1x1x32xf32> to vector<1x32xf32>
    %c1_128 = arith.constant 1 : index
    %c0_129 = arith.constant 0 : index
    %c0_130 = arith.constant 0 : index
    %331 = vector.load %arg11[%c1_128, %c0_129, %c0_130] : memref<2x1x32xf32, #tpu.memory_space<vmem>>, vector<1x1x32xf32>
    %332 = vector.shape_cast %331 : vector<1x1x32xf32> to vector<1x32xf32>
    %cst_131 = arith.constant dense<0.000000e+00> : vector<48xf32>
    %333 = vector.multi_reduction <add>, %328, %cst_131 [1] : vector<48x32xf32> to vector<48xf32>
    %334 = vector.shape_cast %333 : vector<48xf32> to vector<48x1xf32>
    %cst_132 = arith.constant 3.200000e+01 : f32
    %335 = vector.broadcast %cst_132 : f32 to vector<48x1xf32>
    %336 = arith.divf %334, %335 : vector<48x1xf32>
    %337 = vector.broadcast %336 : vector<48x1xf32> to vector<48x32xf32>
    %338 = arith.subf %328, %337 : vector<48x32xf32>
    %339 = arith.mulf %338, %338 : vector<48x32xf32>
    %cst_133 = arith.constant dense<0.000000e+00> : vector<48xf32>
    %340 = vector.multi_reduction <add>, %339, %cst_133 [1] : vector<48x32xf32> to vector<48xf32>
    %341 = vector.shape_cast %340 : vector<48xf32> to vector<48x1xf32>
    %cst_134 = arith.constant 3.200000e+01 : f32
    %342 = vector.broadcast %cst_134 : f32 to vector<48x1xf32>
    %343 = arith.divf %341, %342 : vector<48x1xf32>
    %344 = vector.broadcast %336 : vector<48x1xf32> to vector<48x32xf32>
    %345 = arith.subf %328, %344 : vector<48x32xf32>
    %cst_135 = arith.constant 9.99999997E-7 : f32
    %346 = vector.broadcast %cst_135 : f32 to vector<48x1xf32>
    %347 = arith.addf %343, %346 : vector<48x1xf32>
    %348 = math.rsqrt %347 : vector<48x1xf32>
    %349 = vector.broadcast %348 : vector<48x1xf32> to vector<48x32xf32>
    %350 = arith.mulf %345, %349 : vector<48x32xf32>
    %351 = vector.broadcast %330 : vector<1x32xf32> to vector<48x32xf32>
    %352 = arith.mulf %350, %351 : vector<48x32xf32>
    %353 = vector.broadcast %332 : vector<1x32xf32> to vector<48x32xf32>
    %354 = arith.addf %352, %353 : vector<48x32xf32>
    %c1_136 = arith.constant 1 : index
    %c0_137 = arith.constant 0 : index
    %c0_138 = arith.constant 0 : index
    %355 = vector.load %arg12[%c1_136, %c0_137, %c0_138] : memref<2x32x128xf32, #tpu.memory_space<vmem>>, vector<1x32x128xf32>
    %356 = vector.shape_cast %355 : vector<1x32x128xf32> to vector<32x128xf32>
    %cst_139 = arith.constant dense<0.000000e+00> : vector<48x128xf32>
    %357 = tpu.matmul %354, %356, %cst_139 {dimension_numbers = #tpu.dot_dimension_numbers<[1], [0], [0], [1], [0, 0, 1, 1], [], []>} : vector<48x32xf32>, vector<32x128xf32>, vector<48x128xf32> -> vector<48x128xf32>
    %c1_140 = arith.constant 1 : index
    %c0_141 = arith.constant 0 : index
    %c0_142 = arith.constant 0 : index
    %358 = vector.load %arg13[%c1_140, %c0_141, %c0_142] : memref<2x1x128xf32, #tpu.memory_space<vmem>>, vector<1x1x128xf32>
    %359 = vector.shape_cast %358 : vector<1x1x128xf32> to vector<1x128xf32>
    %360 = vector.broadcast %359 : vector<1x128xf32> to vector<48x128xf32>
    %361 = arith.addf %357, %360 : vector<48x128xf32>
    %362 = arith.mulf %361, %361 : vector<48x128xf32>
    %363 = arith.mulf %361, %362 : vector<48x128xf32>
    %cst_143 = arith.constant 4.471500e-02 : f32
    %364 = vector.broadcast %cst_143 : f32 to vector<48x128xf32>
    %365 = arith.mulf %364, %363 : vector<48x128xf32>
    %366 = arith.addf %361, %365 : vector<48x128xf32>
    %cst_144 = arith.constant 0.797884583 : f32
    %367 = vector.broadcast %cst_144 : f32 to vector<48x128xf32>
    %368 = arith.mulf %367, %366 : vector<48x128xf32>
    %369 = math.tanh %368 : vector<48x128xf32>
    %cst_145 = arith.constant 1.000000e+00 : f32
    %370 = vector.broadcast %cst_145 : f32 to vector<48x128xf32>
    %371 = arith.addf %370, %369 : vector<48x128xf32>
    %cst_146 = arith.constant 5.000000e-01 : f32
    %372 = vector.broadcast %cst_146 : f32 to vector<48x128xf32>
    %373 = arith.mulf %372, %371 : vector<48x128xf32>
    %374 = arith.mulf %361, %373 : vector<48x128xf32>
    %c1_147 = arith.constant 1 : index
    %c0_148 = arith.constant 0 : index
    %c0_149 = arith.constant 0 : index
    %375 = vector.load %arg14[%c1_147, %c0_148, %c0_149] : memref<2x128x32xf32, #tpu.memory_space<vmem>>, vector<1x128x32xf32>
    %376 = vector.shape_cast %375 : vector<1x128x32xf32> to vector<128x32xf32>
    %cst_150 = arith.constant dense<0.000000e+00> : vector<48x32xf32>
    %377 = tpu.matmul %374, %376, %cst_150 {dimension_numbers = #tpu.dot_dimension_numbers<[1], [0], [0], [1], [0, 0, 1, 1], [], []>} : vector<48x128xf32>, vector<128x32xf32>, vector<48x32xf32> -> vector<48x32xf32>
    %c1_151 = arith.constant 1 : index
    %c0_152 = arith.constant 0 : index
    %c0_153 = arith.constant 0 : index
    %378 = vector.load %arg15[%c1_151, %c0_152, %c0_153] : memref<2x1x32xf32, #tpu.memory_space<vmem>>, vector<1x1x32xf32>
    %379 = vector.shape_cast %378 : vector<1x1x32xf32> to vector<1x32xf32>
    %380 = vector.broadcast %379 : vector<1x32xf32> to vector<48x32xf32>
    %381 = arith.addf %377, %380 : vector<48x32xf32>
    %382 = arith.addf %328, %381 : vector<48x32xf32>
    %383 = vector.extract_strided_slice %382 {offsets = [0, 0], sizes = [1, 32], strides = [1, 1]} : vector<48x32xf32> to vector<1x32xf32>
    %384 = vector.extract_strided_slice %382 {offsets = [24, 0], sizes = [1, 32], strides = [1, 1]} : vector<48x32xf32> to vector<1x32xf32>
    %385 = tpu.concatenate %383, %384 in 0 : vector<1x32xf32>, vector<1x32xf32> -> vector<2x32xf32>
    %c0_154 = arith.constant 0 : index
    %c0_155 = arith.constant 0 : index
    %386 = vector.load %arg16[%c0_154, %c0_155] : memref<1x32xf32, #tpu.memory_space<vmem>>, vector<1x32xf32>
    %c0_156 = arith.constant 0 : index
    %c0_157 = arith.constant 0 : index
    %387 = vector.load %arg17[%c0_156, %c0_157] : memref<1x32xf32, #tpu.memory_space<vmem>>, vector<1x32xf32>
    %cst_158 = arith.constant dense<0.000000e+00> : vector<2xf32>
    %388 = vector.multi_reduction <add>, %385, %cst_158 [1] : vector<2x32xf32> to vector<2xf32>
    %389 = vector.shape_cast %388 : vector<2xf32> to vector<2x1xf32>
    %cst_159 = arith.constant 3.200000e+01 : f32
    %390 = vector.broadcast %cst_159 : f32 to vector<2x1xf32>
    %391 = arith.divf %389, %390 : vector<2x1xf32>
    %392 = vector.broadcast %391 : vector<2x1xf32> to vector<2x32xf32>
    %393 = arith.subf %385, %392 : vector<2x32xf32>
    %394 = arith.mulf %393, %393 : vector<2x32xf32>
    %cst_160 = arith.constant dense<0.000000e+00> : vector<2xf32>
    %395 = vector.multi_reduction <add>, %394, %cst_160 [1] : vector<2x32xf32> to vector<2xf32>
    %396 = vector.shape_cast %395 : vector<2xf32> to vector<2x1xf32>
    %cst_161 = arith.constant 3.200000e+01 : f32
    %397 = vector.broadcast %cst_161 : f32 to vector<2x1xf32>
    %398 = arith.divf %396, %397 : vector<2x1xf32>
    %399 = vector.broadcast %391 : vector<2x1xf32> to vector<2x32xf32>
    %400 = arith.subf %385, %399 : vector<2x32xf32>
    %cst_162 = arith.constant 9.99999997E-7 : f32
    %401 = vector.broadcast %cst_162 : f32 to vector<2x1xf32>
    %402 = arith.addf %398, %401 : vector<2x1xf32>
    %403 = math.rsqrt %402 : vector<2x1xf32>
    %404 = vector.broadcast %403 : vector<2x1xf32> to vector<2x32xf32>
    %405 = arith.mulf %400, %404 : vector<2x32xf32>
    %406 = vector.broadcast %386 : vector<1x32xf32> to vector<2x32xf32>
    %407 = arith.mulf %405, %406 : vector<2x32xf32>
    %408 = vector.broadcast %387 : vector<1x32xf32> to vector<2x32xf32>
    %409 = arith.addf %407, %408 : vector<2x32xf32>
    %c0_163 = arith.constant 0 : index
    %c0_164 = arith.constant 0 : index
    %410 = vector.load %arg20[%c0_163, %c0_164] : memref<2x32xf32, #tpu.memory_space<vmem>>, vector<2x32xf32>
    tpu.vector_store %arg20[%c0_163, %c0_164], %409 {strides = array<i32>} : memref<2x32xf32, #tpu.memory_space<vmem>>, vector<2x32xf32>,
    %c0_165 = arith.constant 0 : index
    %c0_166 = arith.constant 0 : index
    %411 = vector.load %arg18[%c0_165, %c0_166] : memref<32x10xf32, #tpu.memory_space<vmem>>, vector<32x10xf32>
    %cst_167 = arith.constant dense<0.000000e+00> : vector<2x10xf32>
    %412 = tpu.matmul %409, %411, %cst_167 {dimension_numbers = #tpu.dot_dimension_numbers<[1], [0], [0], [1], [0, 0, 1, 1], [], []>} : vector<2x32xf32>, vector<32x10xf32>, vector<2x10xf32> -> vector<2x10xf32>
    %c0_168 = arith.constant 0 : index
    %c0_169 = arith.constant 0 : index
    %413 = vector.load %arg19[%c0_168, %c0_169] : memref<1x10xf32, #tpu.memory_space<vmem>>, vector<1x10xf32>
    %414 = vector.broadcast %413 : vector<1x10xf32> to vector<2x10xf32>
    %415 = arith.addf %412, %414 : vector<2x10xf32>
    %c0_170 = arith.constant 0 : index
    %c0_171 = arith.constant 0 : index
    %416 = vector.load %arg21[%c0_170, %c0_171] : memref<2x10xf32, #tpu.memory_space<vmem>>, vector<2x10xf32>
    tpu.vector_store %arg21[%c0_170, %c0_171], %415 {strides = array<i32>} : memref<2x10xf32, #tpu.memory_space<vmem>>, vector<2x10xf32>,
    return
  }
}

</mosaic_0001>

<bundles_post_ra>
// kernel: _lambda_.1
= control target key start
LH: loop header
LB: loop body
LE: loop exit
PB: predicated region body
PF: predicated region fallthrough
CT: control target
= control target key end

     0   :  { %s9423_s0 = inlined_call_operand.vmem [shape: f32[48,48], index: 0, kind: input, shape index: {}]   ;;  %s9424_s1 = inlined_call_operand.vmem [shape: f32[48,32], index: 1, kind: input, shape index: {}]   ;;  %s9425_s2 = inlined_call_operand.vmem [shape: f32[1,24], index: 2, kind: input, shape index: {}]   ;;  %s9426_s3 = inlined_call_operand.vmem [shape: f32[48,32], index: 3, kind: input, shape index: {}]   ;;  %s9427_s4 = inlined_call_operand.vmem [shape: f32[2,1,32], index: 4, kind: input, shape index: {}, may-alias: {4,10}]   ;;  %s9428_s5 = inlined_call_operand.vmem [shape: f32[2,1,32], index: 5, kind: input, shape index: {}, may-alias: {5,9,11,15}]   ;;  %s9429_s6 = inlined_call_operand.vmem [shape: f32[2,32,96], index: 6, kind: input, shape index: {}]   ;;  %s9430_s7 = inlined_call_operand.vmem [shape: f32[2,1,96], index: 7, kind: input, shape index: {}]   ;;  %s9431_s8 = inlined_call_operand.vmem [shape: f32[2,32,32], index: 8, kind: input, shape index: {}]   ;;  %s9432_s9 = inlined_call_operand.vmem [shape: f32[2,1,32], index: 9, kind: input, shape index: {}, may-alias: {5,9,11,15}]   ;;  %s9433_s10 = inlined_call_operand.vmem [shape: f32[2,1,32], index: 10, kind: input, shape index: {}, may-alias: {4,10}]   ;;  %s9434_s11 = inlined_call_operand.vmem [shape: f32[2,1,32], index: 11, kind: input, shape index: {}, may-alias: {5,9,11,15}]   ;;  %s9435_s12 = inlined_call_operand.vmem [shape: f32[2,32,128], index: 12, kind: input, shape index: {}]   ;;  %s9436_s13 = inlined_call_operand.vmem [shape: f32[2,1,128], index: 13, kind: input, shape index: {}]   ;;  %s9437_s14 = inlined_call_operand.vmem [shape: f32[2,128,32], index: 14, kind: input, shape index: {}]   ;;  %s9438_s15 = inlined_call_operand.vmem [shape: f32[2,1,32], index: 15, kind: input, shape index: {}, may-alias: {5,9,11,15}]   ;;  %s9439_s16 = inlined_call_operand.vmem [shape: f32[1,32], index: 16, kind: input, shape index: {}]   ;;  %s9440_s17 = inlined_call_operand.vmem [shape: f32[1,32], index: 17, kind: input, shape index: {}]   ;;  %s9441_s18 = inlined_call_operand.vmem [shape: f32[32,10], index: 18, kind: input, shape index: {}]   ;;  %s9442_s19 = inlined_call_operand.vmem [shape: f32[1,10], index: 19, kind: input, shape index: {}]   ;;  %s9443_s20 = inlined_call_operand.hbm [shape: f32[2,32], index: 20, kind: output, shape index: {0}]   ;;  %s9444_s21 = inlined_call_operand.hbm [shape: f32[2,10], index: 21, kind: output, shape index: {1}]  }
   0x1   :  { %9471 = sst [smem:[#allocation8_spill]] %s9423_s0 }
   0x2   :  { %9472 = sst [smem:[#allocation9_spill]] %s9424_s1 }
   0x3   :  { %9473 = sst [smem:[#allocation10_spill]] %s9425_s2 }
   0x4   :  { %9474 = sst [smem:[#allocation11_spill]] %s9426_s3 }
   0x5   :  { %9475 = sst [smem:[#allocation12_spill]] %s9427_s4 }
   0x6   :  { %9476 = sst [smem:[#allocation13_spill]] %s9428_s5 }
   0x7   :  { %27 = vsyncpa [#allocation3], 0  ;;  %s9477_s26 = sld [smem:[#allocation11_spill]]  ;;  %vm87_vm0 = vcmask 392192  }
   0x8   :  { %s9478_s30 = sld [smem:[#allocation8_spill]] }
   0xd   :  { %v80_v0 = vld [vmem:[%s9477_s26 + $0x28] sm:$0xff]  ;;  %v79_v1 = vld [vmem:[%s9477_s26 + $0x20] sm:$0xff]  ;;  %v78_v2 = vld [vmem:[%s9477_s26 + $0x18] sm:$0xff] }
   0xe   :  { %6475 = vmatprep.subr.mxu0 %v80_v0  ;;  %v69_v3 = vld [vmem:[%s9478_s30] sm:$0xff]  ;;  %v77_v4 = vld [vmem:[%s9477_s26 + $0x10] sm:$0xff] }
   0xf   :  { %6476 = vmatpush3.msra.mxu0 %v80_v0  ;;  %6487 = vmatprep.mubr.msk.f32.mxu0 %vm87_vm0, %v69_v3 }
  0x10   :  { %6477 = vmatprep.subr.mxu0 %v79_v1 }
  0x11   :  { %6478 = vmatpush3.msra.mxu0 %v79_v1 }
  0x12   :  { %28 = vsyncpa [#allocation5], 0  ;;  %6479 = vmatprep.subr.mxu0 %v78_v2  ;;  %v76_v5 = vld [vmem:[%s9477_s26 + $0x8] sm:$0xff]  ;;  %v75_v6 = vld [vmem:[%s9477_s26] sm:$0xff]  ;;  %s9479_s24 = sld [smem:[#allocation9_spill]]  ;;  %vm204_vm1 = vcmask 261120  }
  0x13   :  { %6480 = vmatpush3.msra.mxu0 %v78_v2  ;;  %v70_v7 = vld [vmem:[%s9478_s30 + $0x8] sm:$0xff]  ;;  %v71_v8 = vld [vmem:[%s9478_s30 + $0x10] sm:$0xff]  ;;  %v72_v9 = vld [vmem:[%s9478_s30 + $0x18] sm:$0xff]  ;;  %s9480_s28 = sld [smem:[#allocation12_spill]]  ;;  %s7503_s22 = smov 96   ;;  %vm7504_vm2 = vmmov 0  }
  0x14   :  { %6481 = vmatprep.subr.mxu0 %v77_v4  ;;  %v73_v10 = vld [vmem:[%s9478_s30 + $0x20] sm:$0xff]  ;;  %v74_v11 = vld [vmem:[%s9478_s30 + $0x28] sm:$0xff]  ;;  %v311_v2 = vld [vmem:[%s9429_s6 + $0x18] sm:$0xff]  ;;  %s9481_s26 = sld [smem:[#allocation13_spill]]  ;;  %vm441_vm3 = vcmask 64512   ;;  %vm653_vm4 = vcmask 195584  }
  0x15   :  { %6482 = vmatpush3.msra.mxu0 %v77_v4  ;;  %v310_v3 = vld [vmem:[%s9429_s6 + $0x10] sm:$0xff]  ;;  %v309_v4 = vld [vmem:[%s9429_s6 + $0x8] sm:$0xff]  ;;  %s7505_s2 = smov 64   ;;  %s9467_s25 = smov 88   ;;  %vm2440_vm5 = vcmask 130048   ;;  %vm5772_vm6 = vcmask 1040384  }
  0x16   :  { %6483 = vmatprep.subr.mxu0 %v76_v5  ;;  %s9465_s27 = smov 120   ;;  %s9463_s3 = smov 56   ;;  %vm5776_vm7 = vcmask 254976  }
  0x17   :  { %6484 = vmatpush3.msra.mxu0 %v76_v5  ;;  %v308_v5 = vld [vmem:[%s9429_s6] sm:$0xff]  ;;  %s9461_s30 = smov 80   ;;  %s9459_s29 = smov 112  }
  0x18   :  { %6485 = vmatprep.subr.mxu0 %v75_v6  ;;  %v81_v13 = vld [vmem:[%s9479_s24] sm:$0xff]  ;;  %v82_v14 = vld [vmem:[%s9479_s24 + $0x8] sm:$0xff]  ;;  %v83_v18 = vld [vmem:[%s9479_s24 + $0x10] sm:$0xff]  ;;  %s9457_s0 = smov 48   ;;  %s9455_s4 = smov 72  }
  0x19   :  { %6486 = vmatpush3.msra.mxu0 %v75_v6  ;;  %v84_v21 = vld [vmem:[%s9479_s24 + $0x18] sm:$0xff]  ;;  %v86_v24 = vld [vmem:[%s9479_s24 + $0x28] sm:$0xff]  ;;  %v85_v26 = vld [vmem:[%s9479_s24 + $0x20] sm:$0xff]  ;;  %s9482_s24 = sld [smem:[#allocation10_spill]]  ;;  %s9451_s5 = smov 104  }
  0x1a   :  { %6488 = vmatmul.mubr.msk.f32.vlgmr.msra.gmra.mxu0 %vm87_vm0, %v70_v7  ;;  %6496 = vmatprep.subr.mxu0 %v311_v2  ;;  %s9453_s23 = smov 40   ;;  %s7515_s1 = smov 8  }
  0x1b   :  { %6490 = vmatprep.mubr.msk.f32.mxu0 %vm87_vm0, %v71_v8  ;;  %6497 = vmatpush3.msra.mxu0 %v311_v2 }
  0x1c   :  { %6498 = vmatprep.subr.mxu0 %v310_v3 }
  0x1d   :  { %6499 = vmatpush3.msra.mxu0 %v310_v3 }
  0x1e   :  { %6491 = vmatmul.mubr.msk.f32.gmra.mxu0 %vm87_vm0, %v72_v9  ;;  %6500 = vmatprep.subr.mxu0 %v309_v4 }
  0x1f   :  { %6493 = vmatprep.mubr.msk.f32.mxu0 %vm87_vm0, %v73_v10  ;;  %6501 = vmatpush3.msra.mxu0 %v309_v4 }
  0x20   :  { %6502 = vmatprep.subr.mxu0 %v308_v5 }
  0x21   :  { %6503 = vmatpush3.msra.mxu0 %v308_v5 }
  0x22   :  { %6494 = vmatmul.mubr.msk.f32.gmra.mxu0 %vm87_vm0, %v74_v11 }
  0xda   :  { %v6489_v12 = vpop.f32.mrf.mxu0 }
  0xdb   :  { %v7683_v19 = vadd.f32 %v6489_v12, %v82_v14 }
  0xdc   :  { %v172_v15 = vpop.f32.mrf.mxu0 }
  0xdd   :  { %v7678_v16 = vadd.f32 %v172_v15, %v81_v13  ;;  %v208_v29 = vsel %vm204_vm1, %v7683_v19, 0.0 }
  0xde   :  { %v6492_v17 = vpop.f32.mrf.mxu0 }
  0xdf   :  { %v205_v20 = vsel %vm204_vm1, %v7678_v16, 0.0  ;;  %v7698_v27 = vadd.f32 %v6492_v17, %v84_v21 }
  0xe0   :  { %v182_v22 = vpop.f32.mrf.mxu0  ;;  %206 = vadd.xlane.f32.xlu0 %v205_v20 }
  0xe1   :  { %v7690_v23 = vadd.f32 %v182_v22, %v83_v18  ;;  %v214_v33 = vsel %vm204_vm1, %v7698_v27, 0.0 }
  0xe2   :  { %v6495_v25 = vpop.f32.mrf.mxu0 }
  0xe3   :  { %v211_v28 = vsel %vm204_vm1, %v7690_v23, 0.0  ;;  %v7704_v31 = vadd.f32 %v6495_v25, %v86_v24 }
  0xe4   :  { %v192_v30 = vpop.f32.mrf.mxu0  ;;  %212 = vadd.xlane.f32.xlu1 %v211_v28  ;;  %209 = vadd.xlane.f32.xlu0 %v208_v29  ;;  %v5925_v29 = vld [vmem:[%s9480_s28] ss:$0 sm:$0xff] }
  0xe5   :  { %v7706_v32 = vadd.f32 %v192_v30, %v85_v26  ;;  %v220_v35 = vsel %vm204_vm1, %v7704_v31, 0.0 }
  0xe7   :  { %v217_v34 = vsel %vm204_vm1, %v7706_v32, 0.0 }
  0xe8   :  { %215 = vadd.xlane.f32.xlu1 %v214_v33  ;;  %218 = vadd.xlane.f32.xlu0 %v217_v34  ;;  %v5926_v33 = vld [vmem:[%s9481_s26] ss:$0 sm:$0xff] }
  0xec   :  { %221 = vadd.xlane.f32.xlu1 %v220_v35 }
 0x169   :  { %v207_v36 = vpop.xlane.xlu0 %206 }
 0x16a   :  { %v224_v37 = vmul.f32 0.03125, %v207_v36 }
 0x16c   :  { %v7715_v38 = vsub.f32 %v7678_v16, %v224_v37 }
 0x16d   :  { %v213_v39 = vpop.xlane.xlu1 %212  ;;  %v210_v40 = vpop.xlane.xlu0 %209 }
 0x16e   :  { %v226_v41 = vmul.f32 0.03125, %v213_v39  ;;  %v225_v42 = vmul.f32 0.03125, %v210_v40  ;;  %v236_v43 = vmul.f32 %v7715_v38, %v7715_v38 }
 0x170   :  { %v7720_v44 = vsub.f32 %v7690_v23, %v226_v41  ;;  %v7723_v45 = vsub.f32 %v7683_v19, %v225_v42  ;;  %v242_v46 = vsel %vm204_vm1, %v236_v43, 0.0 }
 0x171   :  { %v216_v47 = vpop.xlane.xlu1 %215  ;;  %243 = vadd.xlane.f32.xlu0 %v242_v46  ;;  %v219_v48 = vpop.xlane.xlu0 %218 }
 0x172   :  { %v227_v49 = vmul.f32 0.03125, %v216_v47  ;;  %v228_v50 = vmul.f32 0.03125, %v219_v48  ;;  %v238_v51 = vmul.f32 %v7720_v44, %v7720_v44  ;;  %v237_v52 = vmul.f32 %v7723_v45, %v7723_v45 }
 0x174   :  { %v7731_v53 = vsub.f32 %v7698_v27, %v227_v49  ;;  %v7734_v54 = vsub.f32 %v7706_v32, %v228_v50  ;;  %v248_v55 = vsel %vm204_vm1, %v238_v51, 0.0  ;;  %v245_v56 = vsel %vm204_vm1, %v237_v52, 0.0 }
 0x175   :  { %v222_v57 = vpop.xlane.xlu1 %221  ;;  %249 = vadd.xlane.f32.xlu0 %v248_v55  ;;  %246 = vadd.xlane.f32.xlu1 %v245_v56 }
 0x176   :  { %v229_v58 = vmul.f32 0.03125, %v222_v57  ;;  %v239_v59 = vmul.f32 %v7731_v53, %v7731_v53  ;;  %v240_v60 = vmul.f32 %v7734_v54, %v7734_v54  ;;  %v5927_v57 = vld [vmem:[%s9430_s7] ss:$0 sm:$0xff] }
 0x178   :  { %v7743_v61 = vsub.f32 %v7704_v31, %v229_v58  ;;  %v251_v62 = vsel %vm204_vm1, %v239_v59, 0.0  ;;  %v254_v63 = vsel %vm204_vm1, %v240_v60, 0.0 }
 0x179   :  { %252 = vadd.xlane.f32.xlu1 %v251_v62  ;;  %255 = vadd.xlane.f32.xlu0 %v254_v63 }
 0x17a   :  { %v241_v0 = vmul.f32 %v7743_v61, %v7743_v61 }
 0x17c   :  { %v257_v1 = vsel %vm204_vm1, %v241_v0, 0.0 }
 0x17d   :  { %258 = vadd.xlane.f32.xlu1 %v257_v1 }
 0x1fa   :  { %v244_v6 = vpop.xlane.xlu0 %243 }
 0x1fb   :  { %v260_v7 = vmul.f32 0.03125, %v244_v6 }
 0x1fd   :  { %v266_v8 = vadd.f32 1e-06, %v260_v7 }
 0x1fe   :  { %v247_v9 = vpop.xlane.xlu1 %246  ;;  %v250_v10 = vpop.xlane.xlu0 %249 }
 0x1ff   :  { %7189 = vrsqrt.f32 %v266_v8  ;;  %v261_v11 = vmul.f32 0.03125, %v247_v9  ;;  %v262_v12 = vmul.f32 0.03125, %v250_v10 }
 0x201   :  { %v267_v13 = vadd.f32 1e-06, %v261_v11  ;;  %v268_v14 = vadd.f32 1e-06, %v262_v12 }
 0x202   :  { %v253_v15 = vpop.xlane.xlu1 %252  ;;  %v256_v17 = vpop.xlane.xlu0 %255 }
 0x203   :  { %7191 = vrsqrt.f32 %v267_v13  ;;  %v263_v18 = vmul.f32 0.03125, %v253_v15  ;;  %v264_v20 = vmul.f32 0.03125, %v256_v17  ;;  %v7852_v13 = vld [vmem:[%s9482_s24] ss:$0 sm:$0xff] }
 0x204   :  { %7193 = vrsqrt.f32 %v268_v14 }
 0x205   :  { %v269_v21 = vadd.f32 1e-06, %v263_v18  ;;  %v270_v22 = vadd.f32 1e-06, %v264_v20 }
 0x206   :  { %v259_v24 = vpop.xlane.xlu1 %258 }
 0x207   :  { %7195 = vrsqrt.f32 %v269_v21  ;;  %v265_v25 = vmul.f32 0.03125, %v259_v24 }
 0x208   :  { %7197 = vrsqrt.f32 %v270_v22 }
 0x209   :  { %v271_v26 = vadd.f32 1e-06, %v265_v25 }
 0x20b   :  { %7199 = vrsqrt.f32 %v271_v26 }
 0x20c   :  { %v7190_v28 = vpop.eup %7189 }
 0x20d   :  { %v278_v30 = vmul.f32 %v7190_v28, %v7715_v38 }
 0x20f   :  { %v290_v34 = vmul.f32 %v5925_v29, %v278_v30 }
 0x210   :  { %v7192_v35 = vpop.eup %7191 }
 0x211   :  { %v7194_v36 = vpop.eup %7193  ;;  %v279_v37 = vmul.f32 %v7192_v35, %v7723_v45  ;;  %v302_v39 = vadd.f32 %v5926_v33, %v290_v34 }
 0x212   :  { %v280_v40 = vmul.f32 %v7194_v36, %v7720_v44 }
 0x213   :  { %6504 = vmatprep.mubr.msk.f32.mxu0 %vm204_vm1, %v302_v39  ;;  %v291_v41 = vmul.f32 %v5925_v29, %v279_v37 }
 0x214   :  { %v7196_v42 = vpop.eup %7195  ;;  %v292_v43 = vmul.f32 %v5925_v29, %v280_v40 }
 0x215   :  { %v7198_v46 = vpop.eup %7197  ;;  %v303_v47 = vadd.f32 %v5926_v33, %v291_v41  ;;  %v281_v38 = vmul.f32 %v7196_v42, %v7731_v53 }
 0x216   :  { %v304_v48 = vadd.f32 %v5926_v33, %v292_v43  ;;  %v282_v49 = vmul.f32 %v7198_v46, %v7734_v54  ;;  %v7502_v54 = vmov 0.0  }
 0x217   :  { %6505 = vmatmul.mubr.msk.f32.vlgmr.msra.gmra.mxu0 %vm204_vm1, %v303_v47  ;;  %v293_v50 = vmul.f32 %v5925_v29, %v281_v38  ;;  %6513 = vmatprep.subr.mxu1 %v7502_v54 }
 0x218   :  { %v7200_v51 = vpop.eup %7199  ;;  %6507 = vmatprep.mubr.msk.f32.mxu0 %vm204_vm1, %v304_v48  ;;  %v294_v45 = vmul.f32 %v5925_v29, %v282_v49  ;;  %6528 = vmatprep.subr.mxu0 %v7502_v54 }
 0x219   :  { %v305_v44 = vadd.f32 %v5926_v33, %v293_v50  ;;  %v283_v52 = vmul.f32 %v7200_v51, %v7743_v61  ;;  %6519 = vmatprep.mubr.msk.f32.mxu1 %vm7504_vm2, %v7502_v54 }
 0x21a   :  { %v306_v55 = vadd.f32 %v5926_v33, %v294_v45 }
 0x21b   :  { %6508 = vmatmul.mubr.msk.f32.gmra.mxu0 %vm204_vm1, %v305_v44  ;;  %v295_v56 = vmul.f32 %v5925_v29, %v283_v52 }
 0x21c   :  { %6510 = vmatprep.mubr.msk.f32.mxu0 %vm204_vm1, %v306_v55 }
 0x21d   :  { %v307_v53 = vadd.f32 %v5926_v33, %v295_v56 }
 0x21f   :  { %6511 = vmatmul.mubr.msk.f32.gmra.mxu0 %vm204_vm1, %v307_v53 }
 0x220   :  { %6534 = vmatprep.mubr.msk.f32.mxu0 %vm7504_vm2, %v7502_v54 }
 0x2d7   :  { %v6506_v58 = vpop.f32.mrf.mxu0 }
 0x2d8   :  { %v7785_v59 = vadd.f32 %v6506_v58, %v5927_v57 }
 0x2d9   :  { %v403_v60 = vpop.f32.mrf.mxu0 }
 0x2da   :  { %437 = vrot.lane.b32.xlu1 %v7785_v59, %s7503_s22  ;;  %v7789_v62 = vadd.f32 %v5927_v57, %v403_v60 }
 0x2db   :  { %v6509_v61 = vpop.f32.mrf.mxu0 }
 0x2dc   :  { %v7807_v5 = vadd.f32 %v6509_v61, %v5927_v57 }
 0x2dd   :  { %v413_v63 = vpop.f32.mrf.mxu0 }
 0x2de   :  { %v7795_v0 = vadd.f32 %v5927_v57, %v413_v63  ;;  %435 = vrot.lane.b32.xlu1 %v7789_v62, %s7503_s22 }
 0x2df   :  { %v6512_v1 = vpop.f32.mrf.mxu0 }
 0x2e0   :  { %v7799_v2 = vadd.f32 %v6512_v1, %v5927_v57  ;;  %439 = vrot.lane.b32.xlu0 %v7795_v0, %s7503_s22 }
 0x2e1   :  { %v423_v3 = vpop.f32.mrf.mxu0 }
 0x2e2   :  { %v7803_v4 = vadd.f32 %v5927_v57, %v423_v3  ;;  %541 = vrot.lane.b32.xlu1 %v7799_v2, %s7503_s22 }
 0x2e4   :  { %539 = vrot.lane.b32.xlu0 %v7803_v4, %s7503_s22 }
 0x2e6   :  { %537 = vrot.lane.b32.xlu1 %v7807_v5, %s7503_s22 }
 0x34c   :  { %v438_v6 = vpop.permute.xlu1 %437 }
 0x350   :  { %v436_v7 = vpop.permute.xlu1 %435 }
 0x352   :  { %v440_v8 = vpop.permute.xlu0 %439 }
 0x353   :  { %6514 = vmatpush3.xpose.msk.msra.mxu1 %vm441_vm3, %v440_v8 }
 0x354   :  { %v542_v9 = vpop.permute.xlu1 %541  ;;  %6515 = vmatprep.subr.mxu1 %v7502_v54 }
 0x355   :  { %6529 = vmatpush3.xpose.msk.msra.mxu0 %vm441_vm3, %v542_v9 }
 0x356   :  { %6530 = vmatprep.subr.mxu0 %v7502_v54  ;;  %v540_v10 = vpop.permute.xlu0 %539 }
 0x357   :  { %6516 = vmatpush3.xpose.msk.msra.mxu1 %vm441_vm3, %v438_v6 }
 0x358   :  { %6517 = vmatprep.subr.mxu1 %v7502_v54  ;;  %v538_v11 = vpop.permute.xlu1 %537 }
 0x359   :  { %6531 = vmatpush3.xpose.msk.msra.mxu0 %vm441_vm3, %v540_v10 }
 0x35a   :  { %6532 = vmatprep.subr.mxu0 %v7502_v54 }
 0x35b   :  { %6518 = vmatpush3.xpose.msk.msra.mxu1 %vm441_vm3, %v436_v7 }
 0x35c   :  { %6543 = vmatprep.subr.mxu1 %v7502_v54 }
 0x35d   :  { %6533 = vmatpush3.xpose.msk.msra.mxu0 %vm441_vm3, %v538_v11 }
 0x35e   :  { %6520 = vmatmul.mubr.msk.f32.vlgmr.msra.gmra.mxu1 %vm441_vm3, %v7789_v62  ;;  %6558 = vmatprep.subr.mxu0 %v7502_v54 }
 0x35f   :  { %6522 = vmatprep.mubr.msk.f32.mxu1 %vm7504_vm2, %v7502_v54 }
 0x360   :  { %6535 = vmatmul.mubr.msk.f32.vlgmr.msra.gmra.mxu0 %vm441_vm3, %v7807_v5 }
 0x361   :  { %6537 = vmatprep.mubr.msk.f32.mxu0 %vm7504_vm2, %v7502_v54 }
 0x362   :  { %6523 = vmatmul.mubr.msk.f32.gmra.mxu1 %vm441_vm3, %v7785_v59 }
 0x363   :  { %6525 = vmatprep.mubr.msk.f32.mxu1 %vm7504_vm2, %v7502_v54 }
 0x364   :  { %6538 = vmatmul.mubr.msk.f32.gmra.mxu0 %vm441_vm3, %v7803_v4 }
 0x365   :  { %6540 = vmatprep.mubr.msk.f32.mxu0 %vm7504_vm2, %v7502_v54 }
 0x366   :  { %6526 = vmatmul.mubr.msk.f32.gmra.mxu1 %vm441_vm3, %v7795_v0 }
 0x367   :  { %6549 = vmatprep.mubr.msk.f32.mxu1 %vm7504_vm2, %v7502_v54 }
 0x368   :  { %6541 = vmatmul.mubr.msk.f32.gmra.mxu0 %vm441_vm3, %v7799_v2 }
 0x369   :  { %6564 = vmatprep.mubr.msk.f32.mxu0 %vm7504_vm2, %v7502_v54 }
 0x41e   :  { %v520_v12 = vpop.f32.mrf.mxu1 }
 0x41f   :  { %v635_v14 = vmul.f32 0.35355338, %v520_v12 }
 0x420   :  { %v6521_v15 = vpop.f32.mrf.mxu1  ;;  %v621_v17 = vpop.f32.mrf.mxu0 }
 0x421   :  { %v647_v18 = vadd.f32 %v7852_v13, %v635_v14  ;;  %v638_v33 = vmul.f32 0.35355338, %v621_v17 }
 0x422   :  { %v525_v20 = vpop.f32.mrf.mxu1  ;;  %v6536_v21 = vpop.f32.mrf.mxu0 }
 0x423   :  { %v636_v22 = vmul.f32 0.35355338, %v525_v20  ;;  %v654_v24 = vsel %vm653_vm4, %v647_v18, -inf  ;;  %v650_v43 = vadd.f32 %v7852_v13, %v638_v33 }
 0x424   :  { %655 = vmax.xlane.f32.xlu0 %v654_v24  ;;  %v6524_v25 = vpop.f32.mrf.mxu1  ;;  %v626_v26 = vpop.f32.mrf.mxu0 }
 0x425   :  { %v648_v28 = vadd.f32 %v7852_v13, %v636_v22  ;;  %v639_v41 = vmul.f32 0.35355338, %v626_v26  ;;  %v663_v46 = vsel %vm653_vm4, %v650_v43, -inf }
 0x426   :  { %v530_v29 = vpop.f32.mrf.mxu1  ;;  %v6539_v30 = vpop.f32.mrf.mxu0 }
 0x427   :  { %v637_v34 = vmul.f32 0.35355338, %v530_v29  ;;  %v657_v35 = vsel %vm653_vm4, %v648_v28, -inf  ;;  %v651_v47 = vadd.f32 %v7852_v13, %v639_v41 }
 0x428   :  { %658 = vmax.xlane.f32.xlu1 %v657_v35  ;;  %v6527_v36 = vpop.f32.mrf.mxu1  ;;  %v631_v37 = vpop.f32.mrf.mxu0 }
 0x429   :  { %v649_v39 = vadd.f32 %v7852_v13, %v637_v34  ;;  %v666_v38 = vsel %vm653_vm4, %v651_v47, -inf  ;;  %v640_v48 = vmul.f32 0.35355338, %v631_v37 }
 0x42a   :  { %v6542_v40 = vpop.f32.mrf.mxu0 }
 0x42b   :  { %v660_v42 = vsel %vm653_vm4, %v649_v39, -inf  ;;  %v7879_v49 = vadd.f32 %v7852_v13, %v640_v48 }
 0x42c   :  { %661 = vmax.xlane.f32.xlu0 %v660_v42 }
 0x42d   :  { %v669_v50 = vsel %vm653_vm4, %v7879_v49, -inf }
 0x430   :  { %664 = vmax.xlane.f32.xlu0 %v663_v46 }
 0x434   :  { %667 = vmax.xlane.f32.xlu0 %v666_v38 }
 0x439   :  { %722 = vrot.lane.b32.xlu1 %v7785_v59, %s7505_s2 }
 0x43d   :  { %720 = vrot.lane.b32.xlu1 %v7789_v62, %s7505_s2 }
 0x441   :  { %926 = vrot.lane.b32.xlu1 %v7795_v0, %s9467_s25 }
 0x445   :  { %924 = vrot.lane.b32.xlu1 %v7785_v59, %s9467_s25 }
 0x44a   :  { %724 = vrot.lane.b32.xlu0 %v7795_v0, %s7505_s2 }
 0x44e   :  { %822 = vrot.lane.b32.xlu0 %v7799_v2, %s7505_s2 }
 0x452   :  { %820 = vrot.lane.b32.xlu0 %v7803_v4, %s7505_s2 }
 0x469   :  { %670 = vmax.xlane.f32.xlu1 %v669_v50 }
 0x47a   :  { %818 = vrot.lane.b32.xlu1 %v7807_v5, %s7505_s2 }
 0x4ad   :  { %v656_v51 = vpop.xlane.xlu0 %655 }
 0x4ae   :  { %v672_v45 = vsub.f32 %v647_v18, %v656_v51 }
 0x4b0   :  { %v678_v44 = vmul.f32 1.442695, %v672_v45 }
 0x4b1   :  { %v659_v52 = vpop.xlane.xlu1 %658 }
 0x4b2   :  { %7201 = vpow2.f32 %v678_v44  ;;  %v673_v56 = vsub.f32 %v648_v28, %v659_v52 }
 0x4b4   :  { %v680_v58 = vmul.f32 1.442695, %v673_v56 }
 0x4b5   :  { %v662_v55 = vpop.xlane.xlu0 %661  ;;  %v723_v6 = vpop.permute.xlu1 %722 }
 0x4b6   :  { %v674_v60 = vsub.f32 %v649_v39, %v662_v55 }
 0x4b8   :  { %v682_v7 = vmul.f32 1.442695, %v674_v60 }
 0x4b9   :  { %v665_v53 = vpop.xlane.xlu0 %664  ;;  %v721_v11 = vpop.permute.xlu1 %720 }
 0x4ba   :  { %v675_v57 = vsub.f32 %v650_v43, %v665_v53 }
 0x4bc   :  { %v684_v61 = vmul.f32 1.442695, %v675_v57 }
 0x4bd   :  { %v668_v63 = vpop.xlane.xlu0 %667  ;;  %v927_v26 = vpop.permute.xlu1 %926 }
 0x4be   :  { %7203 = vpow2.f32 %v684_v61  ;;  %v676_v1 = vsub.f32 %v651_v47, %v668_v63 }
 0x4bf   :  { %v7885_v3 = vpop.eup %7201  ;;  %7205 = vpow2.f32 %v680_v58 }
 0x4c0   :  { %v686_v8 = vmul.f32 1.442695, %v676_v1  ;;  %v690_v9 = vsel %vm653_vm4, %v7885_v3, 0.0 }
 0x4c1   :  { %691 = vadd.xlane.f32.xlu0 %v690_v9  ;;  %v725_v10 = vpop.permute.xlu0 %724  ;;  %v925_v28 = vpop.permute.xlu1 %924 }
 0x4c2   :  { %7207 = vpow2.f32 %v686_v8  ;;  %6544 = vmatpush3.msra.mxu1 %v725_v10 }
 0x4c3   :  { %6545 = vmatprep.subr.mxu1 %v7502_v54  ;;  %7209 = vpow2.f32 %v682_v7 }
 0x4c4   :  { %6546 = vmatpush3.msra.mxu1 %v723_v6 }
 0x4c5   :  { %6547 = vmatprep.subr.mxu1 %v7502_v54  ;;  %v823_v12 = vpop.permute.xlu0 %822 }
 0x4c6   :  { %6548 = vmatpush3.msra.mxu1 %v721_v11  ;;  %6559 = vmatpush3.msra.mxu0 %v823_v12 }
 0x4c7   :  { %6560 = vmatprep.subr.mxu0 %v7502_v54  ;;  %6573 = vmatprep.subr.mxu1 %v7502_v54 }
 0x4c9   :  { %v821_v14 = vpop.permute.xlu0 %820 }
 0x4ca   :  { %6561 = vmatpush3.msra.mxu0 %v821_v14 }
 0x4cb   :  { %v7204_v15 = vpop.eup %7203  ;;  %6562 = vmatprep.subr.mxu0 %v7502_v54 }
 0x4cc   :  { %v699_v17 = vsel %vm653_vm4, %v7204_v15, 0.0  ;;  %v7895_v18 = vpop.eup %7205 }
 0x4cd   :  { %700 = vadd.xlane.f32.xlu1 %v699_v17  ;;  %v693_v21 = vsel %vm653_vm4, %v7895_v18, 0.0 }
 0x4cf   :  { %v7897_v20 = vpop.eup %7207 }
 0x4d0   :  { %v702_v22 = vsel %vm653_vm4, %v7897_v20, 0.0  ;;  %v7903_v24 = vpop.eup %7209 }
 0x4d1   :  { %694 = vadd.xlane.f32.xlu1 %v693_v21  ;;  %703 = vadd.xlane.f32.xlu0 %v702_v22  ;;  %v696_v25 = vsel %vm653_vm4, %v7903_v24, 0.0 }
 0x4d5   :  { %697 = vadd.xlane.f32.xlu0 %v696_v25 }
 0x4e2   :  { %1030 = vrot.lane.b32.xlu1 %v7799_v2, %s9467_s25 }
 0x4e6   :  { %1028 = vrot.lane.b32.xlu1 %v7803_v4, %s9467_s25 }
 0x4ea   :  { %1026 = vrot.lane.b32.xlu1 %v7807_v5, %s9467_s25 }
 0x4eb   :  { %922 = vrot.lane.b32.xlu0 %v7789_v62, %s9467_s25  ;;  %s9487_s25 = smov 112  }
 0x4ef   :  { %916 = vrot.lane.b32.xlu0 %v7789_v62, %s9465_s27 }
 0x4f2   :  { %v671_v29 = vpop.xlane.xlu1 %670 }
 0x4f3   :  { %918 = vrot.lane.b32.xlu0 %v7785_v59, %s9465_s27  ;;  %v677_v30 = vsub.f32 %v7879_v49, %v671_v29 }
 0x4f5   :  { %v688_v34 = vmul.f32 1.442695, %v677_v30 }
 0x4f6   :  { %v819_v33 = vpop.permute.xlu1 %818 }
 0x4f7   :  { %920 = vrot.lane.b32.xlu0 %v7795_v0, %s9465_s27  ;;  %6563 = vmatpush3.msra.mxu0 %v819_v33  ;;  %7211 = vpow2.f32 %v688_v34 }
 0x4f8   :  { %6588 = vmatprep.subr.mxu0 %v7502_v54 }
 0x4fb   :  { %1022 = vrot.lane.b32.xlu0 %v7803_v4, %s9465_s27 }
 0x504   :  { %v7925_v35 = vpop.eup %7211 }
 0x505   :  { %v705_v36 = vsel %vm653_vm4, %v7925_v35, 0.0 }
 0x50e   :  { %706 = vadd.xlane.f32.xlu1 %v705_v36 }
 0x51f   :  { %1020 = vrot.lane.b32.xlu1 %v7807_v5, %s9465_s27 }
 0x523   :  { %1024 = vrot.lane.b32.xlu1 %v7799_v2, %s9465_s27  ;;  %s9488_s27 = smov 48  }
 0x54a   :  { %v692_v37 = vpop.xlane.xlu0 %691 }
 0x54b   :  { %7213 = vrcp.f32 %v692_v37 }
 0x556   :  { %v701_v39 = vpop.xlane.xlu1 %700 }
 0x557   :  { %7215 = vrcp.f32 %v701_v39 }
 0x558   :  { %v7214_v40 = vpop.eup %7213 }
 0x559   :  { %v714_v41 = vmul.f32 %v7214_v40, %v7885_v3 }
 0x55a   :  { %v695_v42 = vpop.xlane.xlu1 %694  ;;  %v704_v43 = vpop.xlane.xlu0 %703 }
 0x55b   :  { %7217 = vrcp.f32 %v695_v42  ;;  %6550 = vmatmul.mubr.msk.f32.vlgmr.msra.gmra.mxu1 %vm653_vm4, %v714_v41 }
 0x55c   :  { %7219 = vrcp.f32 %v704_v43  ;;  %6574 = vmatpush3.xpose.msk.msra.mxu1 %vm441_vm3, %v927_v26  ;;  %6552 = vmatprep.mubr.msk.f32.mxu1 %vm7504_vm2, %v7502_v54 }
 0x55d   :  { %6575 = vmatprep.subr.mxu1 %v7502_v54 }
 0x55e   :  { %v698_v46 = vpop.xlane.xlu0 %697  ;;  %v1031_v48 = vpop.permute.xlu1 %1030 }
 0x55f   :  { %7221 = vrcp.f32 %v698_v46 }
 0x560   :  { %6576 = vmatpush3.xpose.msk.msra.mxu1 %vm441_vm3, %v925_v28 }
 0x561   :  { %6577 = vmatprep.subr.mxu1 %v7502_v54 }
 0x562   :  { %v923_v47 = vpop.permute.xlu0 %922  ;;  %v1029_v44 = vpop.permute.xlu1 %1028 }
 0x564   :  { %v7216_v38 = vpop.eup %7215  ;;  %6578 = vmatpush3.xpose.msk.msra.mxu1 %vm441_vm3, %v923_v47 }
 0x565   :  { %v717_v49 = vmul.f32 %v7216_v38, %v7204_v15  ;;  %6603 = vmatprep.subr.mxu1 %v7502_v54 }
 0x566   :  { %v917_v53 = vpop.permute.xlu0 %916  ;;  %v1027_v57 = vpop.permute.xlu1 %1026 }
 0x567   :  { %6565 = vmatmul.mubr.msk.f32.vlgmr.msra.gmra.mxu0 %vm653_vm4, %v717_v49 }
 0x568   :  { %v7218_v50 = vpop.eup %7217  ;;  %6589 = vmatpush3.xpose.msk.msra.mxu0 %vm441_vm3, %v1031_v48  ;;  %6567 = vmatprep.mubr.msk.f32.mxu0 %vm7504_vm2, %v7502_v54 }
 0x569   :  { %v7220_v51 = vpop.eup %7219  ;;  %6590 = vmatprep.subr.mxu0 %v7502_v54  ;;  %v715_v45 = vmul.f32 %v7218_v50, %v7895_v18 }
 0x56a   :  { %v718_v52 = vmul.f32 %v7220_v51, %v7897_v20  ;;  %v919_v58 = vpop.permute.xlu0 %918 }
 0x56b   :  { %6553 = vmatmul.mubr.msk.f32.gmra.mxu1 %vm653_vm4, %v715_v45 }
 0x56c   :  { %v7222_v55 = vpop.eup %7221  ;;  %6568 = vmatmul.mubr.msk.f32.gmra.mxu0 %vm653_vm4, %v718_v52  ;;  %6555 = vmatprep.mubr.msk.f32.mxu1 %vm7504_vm2, %v7502_v54 }
 0x56d   :  { %6591 = vmatpush3.xpose.msk.msra.mxu0 %vm441_vm3, %v1029_v44  ;;  %v716_v56 = vmul.f32 %v7222_v55, %v7903_v24  ;;  %6570 = vmatprep.mubr.msk.f32.mxu0 %vm7504_vm2, %v7502_v54 }
 0x56e   :  { %6592 = vmatprep.subr.mxu0 %v7502_v54  ;;  %v921_v60 = vpop.permute.xlu0 %920 }
 0x56f   :  { %6556 = vmatmul.mubr.msk.f32.gmra.mxu1 %vm653_vm4, %v716_v56 }
 0x570   :  { %6579 = vmatprep.mubr.msk.f32.mxu1 %vm7504_vm2, %v7502_v54 }
 0x571   :  { %6593 = vmatpush3.xpose.msk.msra.mxu0 %vm441_vm3, %v1027_v57 }
 0x572   :  { %6618 = vmatprep.subr.mxu0 %v7502_v54  ;;  %v1023_v6 = vpop.permute.xlu0 %1022 }
 0x573   :  { %6580 = vmatmul.mubr.msk.f32.vlgmr.msra.gmra.mxu1 %vm441_vm3, %v917_v53 }
 0x574   :  { %6582 = vmatprep.mubr.msk.f32.mxu1 %vm7504_vm2, %v7502_v54 }
 0x577   :  { %6583 = vmatmul.mubr.msk.f32.gmra.mxu1 %vm441_vm3, %v919_v58 }
 0x578   :  { %6585 = vmatprep.mubr.msk.f32.mxu1 %vm7504_vm2, %v7502_v54 }
 0x57b   :  { %6586 = vmatmul.mubr.msk.f32.gmra.mxu1 %vm441_vm3, %v921_v60 }
 0x57c   :  { %6609 = vmatprep.mubr.msk.f32.mxu1 %vm7504_vm2, %v7502_v54 }
 0x597   :  { %v707_v61 = vpop.xlane.xlu1 %706 }
 0x598   :  { %7223 = vrcp.f32 %v707_v61 }
 0x59b   :  { %v1021_v3 = vpop.permute.xlu1 %1020 }
 0x59f   :  { %v1025_v7 = vpop.permute.xlu1 %1024 }
 0x5a5   :  { %v7224_v63 = vpop.eup %7223 }
 0x5a6   :  { %v719_v1 = vmul.f32 %v7224_v63, %v7925_v35 }
 0x5a8   :  { %6571 = vmatmul.mubr.msk.f32.gmra.mxu0 %vm653_vm4, %v719_v1 }
 0x5a9   :  { %6594 = vmatprep.mubr.msk.f32.mxu0 %vm7504_vm2, %v7502_v54 }
 0x5ac   :  { %6595 = vmatmul.mubr.msk.f32.vlgmr.msra.gmra.mxu0 %vm441_vm3, %v1021_v3 }
 0x5ad   :  { %6597 = vmatprep.mubr.msk.f32.mxu0 %vm7504_vm2, %v7502_v54 }
 0x5b0   :  { %6598 = vmatmul.mubr.msk.f32.gmra.mxu0 %vm441_vm3, %v1023_v6 }
 0x5b1   :  { %6600 = vmatprep.mubr.msk.f32.mxu0 %vm7504_vm2, %v7502_v54 }
 0x5b4   :  { %6601 = vmatmul.mubr.msk.f32.gmra.mxu0 %vm441_vm3, %v1025_v7 }
 0x5b5   :  { %6624 = vmatprep.mubr.msk.f32.mxu0 %vm7504_vm2, %v7502_v54 }
 0x61b   :  { %v7986_v8 = vpop.f32.mrf.mxu1 }
 0x61d   :  { %v6551_v9 = vpop.f32.mrf.mxu1 }
 0x627   :  { %v7988_v10 = vpop.f32.mrf.mxu0 }
 0x629   :  { %v6566_v11 = vpop.f32.mrf.mxu0 }
 0x62b   :  { %v7990_v12 = vpop.f32.mrf.mxu1 }
 0x62c   :  { %v7992_v14 = vpop.f32.mrf.mxu0 }
 0x62d   :  { %v6554_v15 = vpop.f32.mrf.mxu1 }
 0x62e   :  { %v6569_v17 = vpop.f32.mrf.mxu0 }
 0x62f   :  { %v7994_v18 = vpop.f32.mrf.mxu1 }
 0x631   :  { %v6557_v20 = vpop.f32.mrf.mxu1 }
 0x633   :  { %v1006_v21 = vpop.f32.mrf.mxu1 }
 0x634   :  { %v1124_v22 = vmul.f32 0.35355338, %v1006_v21 }
 0x635   :  { %v6581_v24 = vpop.f32.mrf.mxu1 }
 0x636   :  { %v1130_v25 = vadd.f32 %v7852_v13, %v1124_v22 }
 0x637   :  { %v1011_v26 = vpop.f32.mrf.mxu1 }
 0x638   :  { %v1125_v28 = vmul.f32 0.35355338, %v1011_v26  ;;  %v1136_v29 = vsel %vm653_vm4, %v1130_v25, -inf }
 0x639   :  { %1137 = vmax.xlane.f32.xlu0 %v1136_v29  ;;  %v6584_v30 = vpop.f32.mrf.mxu1 }
 0x63a   :  { %v1131_v33 = vadd.f32 %v7852_v13, %v1125_v28 }
 0x63b   :  { %v1016_v34 = vpop.f32.mrf.mxu1 }
 0x63c   :  { %v1126_v35 = vmul.f32 0.35355338, %v1016_v34  ;;  %v1139_v36 = vsel %vm653_vm4, %v1131_v33, -inf }
 0x63d   :  { %1140 = vmax.xlane.f32.xlu1 %v1139_v36  ;;  %v6587_v37 = vpop.f32.mrf.mxu1 }
 0x63e   :  { %v1132_v39 = vadd.f32 %v7852_v13, %v1126_v35 }
 0x640   :  { %v1142_v40 = vsel %vm653_vm4, %v1132_v39, -inf }
 0x641   :  { %1143 = vmax.xlane.f32.xlu0 %v1142_v40 }
 0x64e   :  { %1204 = vrot.lane.b32.xlu1 %v7785_v59, %s9463_s3 }
 0x652   :  { %1202 = vrot.lane.b32.xlu1 %v7789_v62, %s9463_s3 }
 0x656   :  { %1408 = vrot.lane.b32.xlu1 %v7795_v0, %s9461_s30 }
 0x65a   :  { %1406 = vrot.lane.b32.xlu1 %v7785_v59, %s9461_s30 }
 0x668   :  { %v8010_v41 = vpop.f32.mrf.mxu0 }
 0x66a   :  { %v6572_v42 = vpop.f32.mrf.mxu0 }
 0x66c   :  { %v1110_v43 = vpop.f32.mrf.mxu0 }
 0x66d   :  { %v1127_v46 = vmul.f32 0.35355338, %v1110_v43 }
 0x66e   :  { %v6596_v47 = vpop.f32.mrf.mxu0 }
 0x66f   :  { %v1133_v38 = vadd.f32 %v7852_v13, %v1127_v46 }
 0x670   :  { %v1115_v48 = vpop.f32.mrf.mxu0 }
 0x671   :  { %v1128_v49 = vmul.f32 0.35355338, %v1115_v48  ;;  %v1145_v50 = vsel %vm653_vm4, %v1133_v38, -inf }
 0x672   :  { %1146 = vmax.xlane.f32.xlu0 %v1145_v50  ;;  %v6599_v51 = vpop.f32.mrf.mxu0 }
 0x673   :  { %v1134_v45 = vadd.f32 %v7852_v13, %v1128_v49 }
 0x674   :  { %v1120_v44 = vpop.f32.mrf.mxu0 }
 0x675   :  { %v1129_v52 = vmul.f32 0.35355338, %v1120_v44  ;;  %v1148_v55 = vsel %vm653_vm4, %v1134_v45, -inf }
 0x676   :  { %1149 = vmax.xlane.f32.xlu0 %v1148_v55  ;;  %v6602_v56 = vpop.f32.mrf.mxu0 }
 0x677   :  { %v8017_v53 = vadd.f32 %v7852_v13, %v1129_v52 }
 0x679   :  { %v1151_v57 = vsel %vm653_vm4, %v8017_v53, -inf }
 0x67e   :  { %1152 = vmax.xlane.f32.xlu1 %v1151_v57 }
 0x68c   :  { %1206 = vrot.lane.b32.xlu0 %v7795_v0, %s9463_s3 }
 0x68f   :  { %1300 = vrot.lane.b32.xlu1 %v7807_v5, %s9463_s3 }
 0x690   :  { %1304 = vrot.lane.b32.xlu0 %v7799_v2, %s9463_s3 }
 0x694   :  { %1302 = vrot.lane.b32.xlu0 %v7803_v4, %s9463_s3 }
 0x6c2   :  { %v1138_v58 = vpop.xlane.xlu0 %1137 }
 0x6c3   :  { %v1154_v60 = vsub.f32 %v1130_v25, %v1138_v58 }
 0x6c5   :  { %v1160_v61 = vmul.f32 1.442695, %v1154_v60 }
 0x6c6   :  { %v1141_v3 = vpop.xlane.xlu1 %1140 }
 0x6c7   :  { %7225 = vpow2.f32 %v1160_v61  ;;  %v1155_v11 = vsub.f32 %v1131_v33, %v1141_v3 }
 0x6c9   :  { %v1162_v21 = vmul.f32 1.442695, %v1155_v11 }
 0x6ca   :  { %v1205_v6 = vpop.permute.xlu1 %1204  ;;  %v1144_v7 = vpop.xlane.xlu0 %1143 }
 0x6cb   :  { %v1156_v22 = vsub.f32 %v1132_v39, %v1144_v7 }
 0x6cd   :  { %v1164_v28 = vmul.f32 1.442695, %v1156_v22 }
 0x6ce   :  { %v1203_v9 = vpop.permute.xlu1 %1202 }
 0x6d2   :  { %v8033_v20 = vpop.permute.xlu1 %1408 }
 0x6d4   :  { %v8029_v63 = vpop.eup %7225 }
 0x6d5   :  { %v1172_v1 = vsel %vm653_vm4, %v8029_v63, 0.0 }
 0x6d6   :  { %1173 = vadd.xlane.f32.xlu0 %v1172_v1  ;;  %v1407_v30 = vpop.permute.xlu1 %1406 }
 0x6fb   :  { %v1147_v15 = vpop.xlane.xlu0 %1146 }
 0x6fc   :  { %v1157_v17 = vsub.f32 %v1133_v38, %v1147_v15 }
 0x6fe   :  { %v1166_v24 = vmul.f32 1.442695, %v1157_v17 }
 0x6ff   :  { %v1150_v25 = vpop.xlane.xlu0 %1149 }
 0x700   :  { %7227 = vpow2.f32 %v1166_v24  ;;  %v1158_v26 = vsub.f32 %v1134_v45, %v1150_v25 }
 0x701   :  { %7229 = vpow2.f32 %v1162_v21 }
 0x702   :  { %v1168_v29 = vmul.f32 1.442695, %v1158_v26 }
 0x703   :  { %v1207_v34 = vpop.permute.xlu0 %1206 }
 0x704   :  { %7231 = vpow2.f32 %v1168_v29  ;;  %6604 = vmatpush3.msra.mxu1 %v1207_v34 }
 0x705   :  { %6605 = vmatprep.subr.mxu1 %v7502_v54  ;;  %7233 = vpow2.f32 %v1164_v28 }
 0x706   :  { %6606 = vmatpush3.msra.mxu1 %v1205_v6 }
 0x707   :  { %v1153_v33 = vpop.xlane.xlu1 %1152  ;;  %6607 = vmatprep.subr.mxu1 %v7502_v54  ;;  %v1305_v35 = vpop.permute.xlu0 %1304 }
 0x708   :  { %6608 = vmatpush3.msra.mxu1 %v1203_v9  ;;  %6619 = vmatpush3.msra.mxu0 %v1305_v35  ;;  %v1159_v49 = vsub.f32 %v8017_v53, %v1153_v33 }
 0x709   :  { %6620 = vmatprep.subr.mxu0 %v7502_v54  ;;  %6633 = vmatprep.subr.mxu1 %v7502_v54 }
 0x70a   :  { %v1170_v50 = vmul.f32 1.442695, %v1159_v49 }
 0x70b   :  { %v1303_v36 = vpop.permute.xlu0 %1302  ;;  %v1301_v39 = vpop.permute.xlu1 %1300 }
 0x70c   :  { %6621 = vmatpush3.msra.mxu0 %v1303_v36  ;;  %7235 = vpow2.f32 %v1170_v50 }
 0x70d   :  { %v7228_v37 = vpop.eup %7227  ;;  %6622 = vmatprep.subr.mxu0 %v7502_v54 }
 0x70e   :  { %6623 = vmatpush3.msra.mxu0 %v1301_v39  ;;  %v1181_v40 = vsel %vm653_vm4, %v7228_v37, 0.0  ;;  %v7230_v42 = vpop.eup %7229 }
 0x70f   :  { %1182 = vadd.xlane.f32.xlu1 %v1181_v40  ;;  %6648 = vmatprep.subr.mxu0 %v7502_v54  ;;  %v1175_v46 = vsel %vm653_vm4, %v7230_v42, 0.0 }
 0x711   :  { %v7232_v43 = vpop.eup %7231 }
 0x712   :  { %v1184_v47 = vsel %vm653_vm4, %v7232_v43, 0.0  ;;  %v7234_v38 = vpop.eup %7233 }
 0x713   :  { %1176 = vadd.xlane.f32.xlu1 %v1175_v46  ;;  %1185 = vadd.xlane.f32.xlu0 %v1184_v47  ;;  %v1178_v48 = vsel %vm653_vm4, %v7234_v38, 0.0 }
 0x717   :  { %1179 = vadd.xlane.f32.xlu0 %v1178_v48 }
 0x719   :  { %v8062_v51 = vpop.eup %7235 }
 0x71a   :  { %v1187_v45 = vsel %vm653_vm4, %v8062_v51, 0.0 }
 0x724   :  { %1512 = vrot.lane.b32.xlu1 %v7799_v2, %s9461_s30 }
 0x728   :  { %1510 = vrot.lane.b32.xlu1 %v7803_v4, %s9461_s30 }
 0x72c   :  { %1508 = vrot.lane.b32.xlu1 %v7807_v5, %s9461_s30 }
 0x72d   :  { %1404 = vrot.lane.b32.xlu0 %v7789_v62, %s9461_s30 }
 0x731   :  { %1398 = vrot.lane.b32.xlu0 %v7789_v62, %s9459_s29 }
 0x735   :  { %1400 = vrot.lane.b32.xlu0 %v7785_v59, %s9459_s29 }
 0x739   :  { %1402 = vrot.lane.b32.xlu0 %v7795_v0, %s9459_s29 }
 0x73d   :  { %1504 = vrot.lane.b32.xlu0 %v7803_v4, %s9459_s29 }
 0x750   :  { %1188 = vadd.xlane.f32.xlu1 %v1187_v45 }
 0x75f   :  { %v1174_v44 = vpop.xlane.xlu0 %1173 }
 0x760   :  { %7237 = vrcp.f32 %v1174_v44 }
 0x761   :  { %1502 = vrot.lane.b32.xlu1 %v7807_v5, %s9459_s29 }
 0x765   :  { %1506 = vrot.lane.b32.xlu1 %v7799_v2, %s9459_s29  ;;  %s9484_s29 = smov 120  }
 0x76d   :  { %v7238_v52 = vpop.eup %7237 }
 0x76e   :  { %v1196_v55 = vmul.f32 %v7238_v52, %v8029_v63 }
 0x770   :  { %6610 = vmatmul.mubr.msk.f32.vlgmr.msra.gmra.mxu1 %vm653_vm4, %v1196_v55 }
 0x771   :  { %6634 = vmatpush3.xpose.msk.msra.mxu1 %vm441_vm3, %v8033_v20  ;;  %6612 = vmatprep.mubr.msk.f32.mxu1 %vm7504_vm2, %v7502_v54 }
 0x772   :  { %6635 = vmatprep.subr.mxu1 %v7502_v54 }
 0x775   :  { %6636 = vmatpush3.xpose.msk.msra.mxu1 %vm441_vm3, %v1407_v30 }
 0x776   :  { %6637 = vmatprep.subr.mxu1 %v7502_v54 }
 0x798   :  { %v1183_v56 = vpop.xlane.xlu1 %1182 }
 0x799   :  { %7239 = vrcp.f32 %v1183_v56 }
 0x79c   :  { %v1177_v53 = vpop.xlane.xlu1 %1176  ;;  %v1186_v57 = vpop.xlane.xlu0 %1185 }
 0x79d   :  { %7241 = vrcp.f32 %v1177_v53 }
 0x79e   :  { %7243 = vrcp.f32 %v1186_v57 }
 0x7a0   :  { %v1180_v58 = vpop.xlane.xlu0 %1179  ;;  %v1513_v63 = vpop.permute.xlu1 %1512 }
 0x7a1   :  { %7245 = vrcp.f32 %v1180_v58 }
 0x7a4   :  { %v1405_v60 = vpop.permute.xlu0 %1404  ;;  %v1511_v9 = vpop.permute.xlu1 %1510 }
 0x7a5   :  { %6638 = vmatpush3.xpose.msk.msra.mxu1 %vm441_vm3, %v1405_v60 }
 0x7a6   :  { %v7240_v61 = vpop.eup %7239  ;;  %6663 = vmatprep.subr.mxu1 %v7502_v54 }
 0x7a7   :  { %v1199_v1 = vmul.f32 %v7240_v61, %v7228_v37 }
 0x7a8   :  { %v1399_v20 = vpop.permute.xlu0 %1398  ;;  %v1509_v21 = vpop.permute.xlu1 %1508 }
 0x7a9   :  { %6625 = vmatmul.mubr.msk.f32.vlgmr.msra.gmra.mxu0 %vm653_vm4, %v1199_v1 }
 0x7aa   :  { %v7242_v3 = vpop.eup %7241  ;;  %6649 = vmatpush3.xpose.msk.msra.mxu0 %vm441_vm3, %v1513_v63  ;;  %6627 = vmatprep.mubr.msk.f32.mxu0 %vm7504_vm2, %v7502_v54 }
 0x7ab   :  { %v7244_v6 = vpop.eup %7243  ;;  %6650 = vmatprep.subr.mxu0 %v7502_v54  ;;  %v1197_v7 = vmul.f32 %v7242_v3, %v7230_v42 }
 0x7ac   :  { %v1200_v11 = vmul.f32 %v7244_v6, %v7232_v43  ;;  %v1401_v22 = vpop.permute.xlu0 %1400 }
 0x7ad   :  { %6613 = vmatmul.mubr.msk.f32.gmra.mxu1 %vm653_vm4, %v1197_v7 }
 0x7ae   :  { %v7246_v15 = vpop.eup %7245  ;;  %6628 = vmatmul.mubr.msk.f32.gmra.mxu0 %vm653_vm4, %v1200_v11  ;;  %6615 = vmatprep.mubr.msk.f32.mxu1 %vm7504_vm2, %v7502_v54 }
 0x7af   :  { %6651 = vmatpush3.xpose.msk.msra.mxu0 %vm441_vm3, %v1511_v9  ;;  %v1198_v17 = vmul.f32 %v7246_v15, %v7234_v38  ;;  %6630 = vmatprep.mubr.msk.f32.mxu0 %vm7504_vm2, %v7502_v54 }
 0x7b0   :  { %6652 = vmatprep.subr.mxu0 %v7502_v54  ;;  %v1403_v24 = vpop.permute.xlu0 %1402 }
 0x7b1   :  { %6616 = vmatmul.mubr.msk.f32.gmra.mxu1 %vm653_vm4, %v1198_v17 }
 0x7b2   :  { %6639 = vmatprep.mubr.msk.f32.mxu1 %vm7504_vm2, %v7502_v54 }
 0x7b3   :  { %6653 = vmatpush3.xpose.msk.msra.mxu0 %vm441_vm3, %v1509_v21 }
 0x7b4   :  { %6678 = vmatprep.subr.mxu0 %v7502_v54  ;;  %v1505_v30 = vpop.permute.xlu0 %1504 }
 0x7b5   :  { %6640 = vmatmul.mubr.msk.f32.vlgmr.msra.gmra.mxu1 %vm441_vm3, %v1399_v20 }
 0x7b6   :  { %6642 = vmatprep.mubr.msk.f32.mxu1 %vm7504_vm2, %v7502_v54 }
 0x7b9   :  { %6643 = vmatmul.mubr.msk.f32.gmra.mxu1 %vm441_vm3, %v1401_v22 }
 0x7ba   :  { %6645 = vmatprep.mubr.msk.f32.mxu1 %vm7504_vm2, %v7502_v54 }
 0x7bd   :  { %6646 = vmatmul.mubr.msk.f32.gmra.mxu1 %vm441_vm3, %v1403_v24 }
 0x7be   :  { %6669 = vmatprep.mubr.msk.f32.mxu1 %vm7504_vm2, %v7502_v54 }
 0x7d9   :  { %v1189_v25 = vpop.xlane.xlu1 %1188 }
 0x7da   :  { %7247 = vrcp.f32 %v1189_v25 }
 0x7dd   :  { %v1503_v29 = vpop.permute.xlu1 %1502 }
 0x7e1   :  { %v1507_v34 = vpop.permute.xlu1 %1506 }
 0x7e7   :  { %v7248_v26 = vpop.eup %7247 }
 0x7e8   :  { %v1201_v28 = vmul.f32 %v7248_v26, %v8062_v51 }
 0x7ea   :  { %6631 = vmatmul.mubr.msk.f32.gmra.mxu0 %vm653_vm4, %v1201_v28 }
 0x7eb   :  { %6654 = vmatprep.mubr.msk.f32.mxu0 %vm7504_vm2, %v7502_v54 }
 0x7ee   :  { %6655 = vmatmul.mubr.msk.f32.vlgmr.msra.gmra.mxu0 %vm441_vm3, %v1503_v29 }
 0x7ef   :  { %6657 = vmatprep.mubr.msk.f32.mxu0 %vm7504_vm2, %v7502_v54 }
 0x7f2   :  { %6658 = vmatmul.mubr.msk.f32.gmra.mxu0 %vm441_vm3, %v1505_v30 }
 0x7f3   :  { %6660 = vmatprep.mubr.msk.f32.mxu0 %vm7504_vm2, %v7502_v54 }
 0x7f6   :  { %6661 = vmatmul.mubr.msk.f32.gmra.mxu0 %vm441_vm3, %v1507_v34 }
 0x7f7   :  { %6684 = vmatprep.mubr.msk.f32.mxu0 %vm7504_vm2, %v7502_v54 }
 0x830   :  { %v8121_v33 = vpop.f32.mrf.mxu1 }
 0x832   :  { %v6611_v35 = vpop.f32.mrf.mxu1 }
 0x869   :  { %v8123_v36 = vpop.f32.mrf.mxu0 }
 0x86b   :  { %v6626_v37 = vpop.f32.mrf.mxu0 }
 0x86d   :  { %v8125_v39 = vpop.f32.mrf.mxu1 }
 0x86e   :  { %v8127_v40 = vpop.f32.mrf.mxu0 }
 0x86f   :  { %v6614_v42 = vpop.f32.mrf.mxu1 }
 0x870   :  { %v6629_v43 = vpop.f32.mrf.mxu0 }
 0x871   :  { %v8129_v46 = vpop.f32.mrf.mxu1 }
 0x873   :  { %v6617_v47 = vpop.f32.mrf.mxu1 }
 0x875   :  { %v1488_v38 = vpop.f32.mrf.mxu1 }
 0x876   :  { %v1606_v48 = vmul.f32 0.35355338, %v1488_v38 }
 0x877   :  { %v6641_v49 = vpop.f32.mrf.mxu1 }
 0x878   :  { %v1612_v50 = vadd.f32 %v7852_v13, %v1606_v48 }
 0x879   :  { %v1493_v51 = vpop.f32.mrf.mxu1 }
 0x87a   :  { %v1607_v45 = vmul.f32 0.35355338, %v1493_v51  ;;  %v1618_v44 = vsel %vm653_vm4, %v1612_v50, -inf }
 0x87b   :  { %1619 = vmax.xlane.f32.xlu0 %v1618_v44  ;;  %v6644_v52 = vpop.f32.mrf.mxu1 }
 0x87c   :  { %v1613_v55 = vadd.f32 %v7852_v13, %v1607_v45 }
 0x87d   :  { %v1498_v56 = vpop.f32.mrf.mxu1 }
 0x87e   :  { %v1608_v53 = vmul.f32 0.35355338, %v1498_v56  ;;  %v1621_v57 = vsel %vm653_vm4, %v1613_v55, -inf }
 0x87f   :  { %1622 = vmax.xlane.f32.xlu1 %v1621_v57  ;;  %v6647_v58 = vpop.f32.mrf.mxu1 }
 0x880   :  { %v1614_v60 = vadd.f32 %v7852_v13, %v1608_v53 }
 0x882   :  { %v1624_v61 = vsel %vm653_vm4, %v1614_v60, -inf }
 0x883   :  { %1625 = vmax.xlane.f32.xlu0 %v1624_v61 }
 0x890   :  { %1686 = vrot.lane.b32.xlu1 %v7785_v59, %s9457_s0 }
 0x894   :  { %1684 = vrot.lane.b32.xlu1 %v7789_v62, %s9457_s0 }
 0x898   :  { %1890 = vrot.lane.b32.xlu1 %v7795_v0, %s9455_s4 }
 0x89c   :  { %1888 = vrot.lane.b32.xlu1 %v7785_v59, %s9455_s4 }
 0x8aa   :  { %v8145_v63 = vpop.f32.mrf.mxu0 }
 0x8ac   :  { %v6632_v1 = vpop.f32.mrf.mxu0 }
 0x8ae   :  { %v1592_v3 = vpop.f32.mrf.mxu0 }
 0x8af   :  { %v1609_v6 = vmul.f32 0.35355338, %v1592_v3 }
 0x8b0   :  { %v6656_v7 = vpop.f32.mrf.mxu0 }
 0x8b1   :  { %v1615_v9 = vadd.f32 %v7852_v13, %v1609_v6 }
 0x8b2   :  { %v1597_v11 = vpop.f32.mrf.mxu0 }
 0x8b3   :  { %v1610_v15 = vmul.f32 0.35355338, %v1597_v11  ;;  %v1627_v17 = vsel %vm653_vm4, %v1615_v9, -inf }
 0x8b4   :  { %1628 = vmax.xlane.f32.xlu0 %v1627_v17  ;;  %v6659_v20 = vpop.f32.mrf.mxu0 }
 0x8b5   :  { %v1616_v21 = vadd.f32 %v7852_v13, %v1610_v15 }
 0x8b6   :  { %v1602_v22 = vpop.f32.mrf.mxu0 }
 0x8b7   :  { %v1611_v24 = vmul.f32 0.35355338, %v1602_v22  ;;  %v1630_v25 = vsel %vm653_vm4, %v1616_v21, -inf }
 0x8b8   :  { %1631 = vmax.xlane.f32.xlu0 %v1630_v25  ;;  %v6662_v26 = vpop.f32.mrf.mxu0 }
 0x8b9   :  { %v8152_v28 = vadd.f32 %v7852_v13, %v1611_v24 }
 0x8bb   :  { %v1633_v29 = vsel %vm653_vm4, %v8152_v28, -inf }
 0x8c0   :  { %1634 = vmax.xlane.f32.xlu1 %v1633_v29 }
 0x8ce   :  { %1688 = vrot.lane.b32.xlu0 %v7795_v0, %s9457_s0 }
 0x8d1   :  { %1782 = vrot.lane.b32.xlu1 %v7807_v5, %s9457_s0 }
 0x8d2   :  { %1786 = vrot.lane.b32.xlu0 %v7799_v2, %s9457_s0 }
 0x8d6   :  { %1784 = vrot.lane.b32.xlu0 %v7803_v4, %s9457_s0  ;;  %s9485_s0 = smov 56  }
 0x904   :  { %v1620_v30 = vpop.xlane.xlu0 %1619 }
 0x905   :  { %v1636_v34 = vsub.f32 %v1612_v50, %v1620_v30 }
 0x907   :  { %v1642_v13 = vmul.f32 1.442695, %v1636_v34 }
 0x908   :  { %v1623_v42 = vpop.xlane.xlu1 %1622 }
 0x909   :  { %7249 = vpow2.f32 %v1642_v13  ;;  %v1637_v48 = vsub.f32 %v1613_v55, %v1623_v42 }
 0x90b   :  { %v1644_v44 = vmul.f32 1.442695, %v1637_v48 }
 0x90c   :  { %v1687_v43 = vpop.permute.xlu1 %1686  ;;  %v1626_v47 = vpop.xlane.xlu0 %1625 }
 0x90d   :  { %v1638_v52 = vsub.f32 %v1614_v60, %v1626_v47 }
 0x90f   :  { %v1646_v57 = vmul.f32 1.442695, %v1638_v52 }
 0x910   :  { %v1685_v38 = vpop.permute.xlu1 %1684 }
 0x914   :  { %v8168_v45 = vpop.permute.xlu1 %1890 }
 0x916   :  { %v8164_v35 = vpop.eup %7249 }
 0x917   :  { %v1654_v37 = vsel %vm653_vm4, %v8164_v35, 0.0 }
 0x918   :  { %1655 = vadd.xlane.f32.xlu0 %v1654_v37  ;;  %v1889_v61 = vpop.permute.xlu1 %1888 }
 0x93d   :  { %v1629_v49 = vpop.xlane.xlu0 %1628 }
 0x93e   :  { %v1639_v51 = vsub.f32 %v1615_v9, %v1629_v49 }
 0x940   :  { %v1648_v50 = vmul.f32 1.442695, %v1639_v51 }
 0x941   :  { %v1632_v56 = vpop.xlane.xlu0 %1631 }
 0x942   :  { %7251 = vpow2.f32 %v1648_v50  ;;  %v1640_v53 = vsub.f32 %v1616_v21, %v1632_v56 }
 0x943   :  { %7253 = vpow2.f32 %v1644_v44 }
 0x944   :  { %v1650_v58 = vmul.f32 1.442695, %v1640_v53 }
 0x945   :  { %v1689_v1 = vpop.permute.xlu0 %1688 }
 0x946   :  { %7255 = vpow2.f32 %v1650_v58  ;;  %6664 = vmatpush3.msra.mxu1 %v1689_v1 }
 0x947   :  { %6665 = vmatprep.subr.mxu1 %v7502_v54  ;;  %7257 = vpow2.f32 %v1646_v57 }
 0x948   :  { %6666 = vmatpush3.msra.mxu1 %v1687_v43 }
 0x949   :  { %v1635_v55 = vpop.xlane.xlu1 %1634  ;;  %6667 = vmatprep.subr.mxu1 %v7502_v54  ;;  %v1787_v3 = vpop.permute.xlu0 %1786 }
 0x94a   :  { %6668 = vmatpush3.msra.mxu1 %v1685_v38  ;;  %6679 = vmatpush3.msra.mxu0 %v1787_v3  ;;  %v1641_v24 = vsub.f32 %v8152_v28, %v1635_v55 }
 0x94b   :  { %6680 = vmatprep.subr.mxu0 %v7502_v54  ;;  %6693 = vmatprep.subr.mxu1 %v7502_v54 }
 0x94c   :  { %v1652_v25 = vmul.f32 1.442695, %v1641_v24 }
 0x94d   :  { %v1785_v60 = vpop.permute.xlu0 %1784  ;;  %v1783_v7 = vpop.permute.xlu1 %1782 }
 0x94e   :  { %6681 = vmatpush3.msra.mxu0 %v1785_v60  ;;  %7259 = vpow2.f32 %v1652_v25 }
 0x94f   :  { %v7252_v6 = vpop.eup %7251  ;;  %6682 = vmatprep.subr.mxu0 %v7502_v54 }
 0x950   :  { %6683 = vmatpush3.msra.mxu0 %v1783_v7  ;;  %v1663_v9 = vsel %vm653_vm4, %v7252_v6, 0.0  ;;  %v7254_v11 = vpop.eup %7253 }
 0x951   :  { %1664 = vadd.xlane.f32.xlu1 %v1663_v9  ;;  %6708 = vmatprep.subr.mxu0 %v7502_v54  ;;  %v1657_v17 = vsel %vm653_vm4, %v7254_v11, 0.0 }
 0x953   :  { %v7256_v15 = vpop.eup %7255 }
 0x954   :  { %v1666_v20 = vsel %vm653_vm4, %v7256_v15, 0.0  ;;  %v7258_v21 = vpop.eup %7257 }
 0x955   :  { %1658 = vadd.xlane.f32.xlu1 %v1657_v17  ;;  %1667 = vadd.xlane.f32.xlu0 %v1666_v20  ;;  %v1660_v22 = vsel %vm653_vm4, %v7258_v21, 0.0 }
 0x959   :  { %1661 = vadd.xlane.f32.xlu0 %v1660_v22 }
 0x95b   :  { %v8197_v26 = vpop.eup %7259 }
 0x95c   :  { %v1669_v29 = vsel %vm653_vm4, %v8197_v26, 0.0 }
 0x966   :  { %1994 = vrot.lane.b32.xlu1 %v7799_v2, %s9455_s4 }
 0x96a   :  { %1992 = vrot.lane.b32.xlu1 %v7803_v4, %s9455_s4 }
 0x96e   :  { %1990 = vrot.lane.b32.xlu1 %v7807_v5, %s9455_s4 }
 0x96f   :  { %1886 = vrot.lane.b32.xlu0 %v7789_v62, %s9455_s4  ;;  %s9469_s4 = smov 24  }
 0x973   :  { %1880 = vrot.lane.b32.xlu0 %v7789_v62, %s9451_s5 }
 0x977   :  { %1882 = vrot.lane.b32.xlu0 %v7785_v59, %s9451_s5 }
 0x97b   :  { %1884 = vrot.lane.b32.xlu0 %v7795_v0, %s9451_s5 }
 0x97f   :  { %1986 = vrot.lane.b32.xlu0 %v7803_v4, %s9451_s5 }
 0x992   :  { %1670 = vadd.xlane.f32.xlu1 %v1669_v29 }
 0x9a1   :  { %v1656_v30 = vpop.xlane.xlu0 %1655 }
 0x9a2   :  { %7261 = vrcp.f32 %v1656_v30 }
 0x9a3   :  { %1984 = vrot.lane.b32.xlu1 %v7807_v5, %s9451_s5 }
 0x9a7   :  { %1988 = vrot.lane.b32.xlu1 %v7799_v2, %s9451_s5  ;;  %s7516_s5 = smov 16  }
 0x9af   :  { %v7262_v28 = vpop.eup %7261 }
 0x9b0   :  { %v1678_v34 = vmul.f32 %v7262_v28, %v8164_v35 }
 0x9b2   :  { %6670 = vmatmul.mubr.msk.f32.vlgmr.msra.gmra.mxu1 %vm653_vm4, %v1678_v34  ;;  %v7455_v34 = vld [vmem:[%s9482_s24] ss:$0 sm:$0xff] }
 0x9b3   :  { %6694 = vmatpush3.xpose.msk.msra.mxu1 %vm441_vm3, %v8168_v45  ;;  %6672 = vmatprep.mubr.msk.f32.mxu1 %vm7504_vm2, %v7502_v54 }
 0x9b4   :  { %6695 = vmatprep.subr.mxu1 %v7502_v54 }
 0x9b7   :  { %6696 = vmatpush3.xpose.msk.msra.mxu1 %vm441_vm3, %v1889_v61 }
 0x9b8   :  { %6697 = vmatprep.subr.mxu1 %v7502_v54 }
 0x9da   :  { %v1665_v13 = vpop.xlane.xlu1 %1664 }
 0x9db   :  { %7263 = vrcp.f32 %v1665_v13 }
 0x9de   :  { %v1659_v37 = vpop.xlane.xlu1 %1658  ;;  %v1668_v42 = vpop.xlane.xlu0 %1667 }
 0x9df   :  { %7265 = vrcp.f32 %v1659_v37 }
 0x9e0   :  { %7267 = vrcp.f32 %v1668_v42 }
 0x9e2   :  { %v1662_v35 = vpop.xlane.xlu0 %1661  ;;  %v1995_v38 = vpop.permute.xlu1 %1994 }
 0x9e3   :  { %7269 = vrcp.f32 %v1662_v35 }
 0x9e6   :  { %v1887_v43 = vpop.permute.xlu0 %1886  ;;  %v1993_v44 = vpop.permute.xlu1 %1992 }
 0x9e7   :  { %6698 = vmatpush3.xpose.msk.msra.mxu1 %vm441_vm3, %v1887_v43 }
 0x9e8   :  { %v7264_v47 = vpop.eup %7263  ;;  %6723 = vmatprep.subr.mxu1 %v7502_v54 }
 0x9e9   :  { %v1681_v48 = vmul.f32 %v7264_v47, %v7252_v6 }
 0x9ea   :  { %v1881_v53 = vpop.permute.xlu0 %1880  ;;  %v1991_v57 = vpop.permute.xlu1 %1990 }
 0x9eb   :  { %6685 = vmatmul.mubr.msk.f32.vlgmr.msra.gmra.mxu0 %vm653_vm4, %v1681_v48 }
 0x9ec   :  { %v7266_v49 = vpop.eup %7265  ;;  %6709 = vmatpush3.xpose.msk.msra.mxu0 %vm441_vm3, %v1995_v38  ;;  %6687 = vmatprep.mubr.msk.f32.mxu0 %vm7504_vm2, %v7502_v54 }
 0x9ed   :  { %v7268_v51 = vpop.eup %7267  ;;  %6710 = vmatprep.subr.mxu0 %v7502_v54  ;;  %v1679_v45 = vmul.f32 %v7266_v49, %v7254_v11 }
 0x9ee   :  { %v1682_v52 = vmul.f32 %v7268_v51, %v7256_v15  ;;  %v1883_v58 = vpop.permute.xlu0 %1882 }
 0x9ef   :  { %6673 = vmatmul.mubr.msk.f32.gmra.mxu1 %vm653_vm4, %v1679_v45 }
 0x9f0   :  { %v7270_v50 = vpop.eup %7269  ;;  %6688 = vmatmul.mubr.msk.f32.gmra.mxu0 %vm653_vm4, %v1682_v52  ;;  %6675 = vmatprep.mubr.msk.f32.mxu1 %vm7504_vm2, %v7502_v54 }
 0x9f1   :  { %6711 = vmatpush3.xpose.msk.msra.mxu0 %vm441_vm3, %v1993_v44  ;;  %v1680_v56 = vmul.f32 %v7270_v50, %v7258_v21  ;;  %6690 = vmatprep.mubr.msk.f32.mxu0 %vm7504_vm2, %v7502_v54 }
 0x9f2   :  { %6712 = vmatprep.subr.mxu0 %v7502_v54  ;;  %v1885_v61 = vpop.permute.xlu0 %1884 }
 0x9f3   :  { %6676 = vmatmul.mubr.msk.f32.gmra.mxu1 %vm653_vm4, %v1680_v56 }
 0x9f4   :  { %6699 = vmatprep.mubr.msk.f32.mxu1 %vm7504_vm2, %v7502_v54 }
 0x9f5   :  { %6713 = vmatpush3.xpose.msk.msra.mxu0 %vm441_vm3, %v1991_v57 }
 0x9f6   :  { %6738 = vmatprep.subr.mxu0 %v7502_v54  ;;  %v1987_v6 = vpop.permute.xlu0 %1986 }
 0x9f7   :  { %6700 = vmatmul.mubr.msk.f32.vlgmr.msra.gmra.mxu1 %vm441_vm3, %v1881_v53 }
 0x9f8   :  { %6702 = vmatprep.mubr.msk.f32.mxu1 %vm7504_vm2, %v7502_v54 }
 0x9fb   :  { %6703 = vmatmul.mubr.msk.f32.gmra.mxu1 %vm441_vm3, %v1883_v58 }
 0x9fc   :  { %6705 = vmatprep.mubr.msk.f32.mxu1 %vm7504_vm2, %v7502_v54 }
 0x9ff   :  { %6706 = vmatmul.mubr.msk.f32.gmra.mxu1 %vm441_vm3, %v1885_v61 }
 0xa00   :  { %6729 = vmatprep.mubr.msk.f32.mxu1 %vm7504_vm2, %v7502_v54 }
 0xa1b   :  { %v1671_v1 = vpop.xlane.xlu1 %1670 }
 0xa1c   :  { %7271 = vrcp.f32 %v1671_v1 }
 0xa1f   :  { %v1985_v60 = vpop.permute.xlu1 %1984 }
 0xa23   :  { %v1989_v7 = vpop.permute.xlu1 %1988 }
 0xa29   :  { %v7272_v55 = vpop.eup %7271 }
 0xa2a   :  { %v1683_v3 = vmul.f32 %v7272_v55, %v8197_v26 }
 0xa2c   :  { %6691 = vmatmul.mubr.msk.f32.gmra.mxu0 %vm653_vm4, %v1683_v3 }
 0xa2d   :  { %6714 = vmatprep.mubr.msk.f32.mxu0 %vm7504_vm2, %v7502_v54 }
 0xa30   :  { %6715 = vmatmul.mubr.msk.f32.vlgmr.msra.gmra.mxu0 %vm441_vm3, %v1985_v60 }
 0xa31   :  { %6717 = vmatprep.mubr.msk.f32.mxu0 %vm7504_vm2, %v7502_v54 }
 0xa34   :  { %6718 = vmatmul.mubr.msk.f32.gmra.mxu0 %vm441_vm3, %v1987_v6 }
 0xa35   :  { %6720 = vmatprep.mubr.msk.f32.mxu0 %vm7504_vm2, %v7502_v54 }
 0xa38   :  { %6721 = vmatmul.mubr.msk.f32.gmra.mxu0 %vm441_vm3, %v1989_v7 }
 0xa39   :  { %6744 = vmatprep.mubr.msk.f32.mxu0 %vm7504_vm2, %v7502_v54 }
 0xa72   :  { %v8256_v9 = vpop.f32.mrf.mxu1 }
 0xa74   :  { %v6671_v11 = vpop.f32.mrf.mxu1 }
 0xaab   :  { %v8258_v15 = vpop.f32.mrf.mxu0 }
 0xaad   :  { %v6686_v17 = vpop.f32.mrf.mxu0 }
 0xaaf   :  { %v8260_v20 = vpop.f32.mrf.mxu1 }
 0xab0   :  { %v8262_v21 = vpop.f32.mrf.mxu0 }
 0xab1   :  { %v6674_v22 = vpop.f32.mrf.mxu1 }
 0xab2   :  { %v6689_v24 = vpop.f32.mrf.mxu0 }
 0xab3   :  { %v8264_v25 = vpop.f32.mrf.mxu1 }
 0xab5   :  { %v6677_v26 = vpop.f32.mrf.mxu1 }
 0xab7   :  { %v1970_v29 = vpop.f32.mrf.mxu1 }
 0xab8   :  { %v2088_v30 = vmul.f32 0.35355338, %v1970_v29 }
 0xab9   :  { %v6701_v28 = vpop.f32.mrf.mxu1 }
 0xaba   :  { %v2094_v13 = vadd.f32 %v7455_v34, %v2088_v30 }
 0xabb   :  { %v1975_v37 = vpop.f32.mrf.mxu1 }
 0xabc   :  { %v2089_v42 = vmul.f32 0.35355338, %v1975_v37  ;;  %v2100_v35 = vsel %vm653_vm4, %v2094_v13, -inf }
 0xabd   :  { %2101 = vmax.xlane.f32.xlu0 %v2100_v35  ;;  %v6704_v43 = vpop.f32.mrf.mxu1 }
 0xabe   :  { %v2095_v47 = vadd.f32 %v7455_v34, %v2089_v42 }
 0xabf   :  { %v1980_v38 = vpop.f32.mrf.mxu1 }
 0xac0   :  { %v2090_v48 = vmul.f32 0.35355338, %v1980_v38  ;;  %v2103_v49 = vsel %vm653_vm4, %v2095_v47, -inf }
 0xac1   :  { %2104 = vmax.xlane.f32.xlu1 %v2103_v49  ;;  %v6707_v51 = vpop.f32.mrf.mxu1 }
 0xac2   :  { %v2096_v45 = vadd.f32 %v7455_v34, %v2090_v48 }
 0xac4   :  { %v2106_v44 = vsel %vm653_vm4, %v2096_v45, -inf }
 0xac5   :  { %2107 = vmax.xlane.f32.xlu0 %v2106_v44 }
 0xaec   :  { %v8272_v52 = vpop.f32.mrf.mxu0 }
 0xaee   :  { %v6692_v50 = vpop.f32.mrf.mxu0 }
 0xaf0   :  { %v2074_v56 = vpop.f32.mrf.mxu0 }
 0xaf1   :  { %v2091_v53 = vmul.f32 0.35355338, %v2074_v56 }
 0xaf2   :  { %v6716_v57 = vpop.f32.mrf.mxu0 }
 0xaf3   :  { %v2097_v58 = vadd.f32 %v7455_v34, %v2091_v53 }
 0xaf4   :  { %v2079_v61 = vpop.f32.mrf.mxu0 }
 0xaf5   :  { %v2092_v1 = vmul.f32 0.35355338, %v2079_v61  ;;  %v2109_v55 = vsel %vm653_vm4, %v2097_v58, -inf }
 0xaf6   :  { %2110 = vmax.xlane.f32.xlu0 %v2109_v55  ;;  %v6719_v3 = vpop.f32.mrf.mxu0 }
 0xaf7   :  { %v2098_v60 = vadd.f32 %v7455_v34, %v2092_v1 }
 0xaf8   :  { %v2084_v6 = vpop.f32.mrf.mxu0 }
 0xaf9   :  { %v2093_v7 = vmul.f32 0.35355338, %v2084_v6  ;;  %v2112_v11 = vsel %vm653_vm4, %v2098_v60, -inf }
 0xafa   :  { %2113 = vmax.xlane.f32.xlu0 %v2112_v11  ;;  %v6722_v17 = vpop.f32.mrf.mxu0 }
 0xafb   :  { %v2099_v22 = vadd.f32 %v7455_v34, %v2093_v7 }
 0xafd   :  { %v2115_v24 = vsel %vm653_vm4, %v2099_v22, -inf }
 0xafe   :  { %2116 = vmax.xlane.f32.xlu1 %v2115_v24 }
 0xb0f   :  { %2168 = vrot.lane.b32.xlu1 %v7785_v59, %s9453_s23 }
 0xb10   :  { %2170 = vrot.lane.b32.xlu0 %v7795_v0, %s9453_s23 }
 0xb13   :  { %2166 = vrot.lane.b32.xlu1 %v7789_v62, %s9453_s23 }
 0xb17   :  { %2268 = vrot.lane.b32.xlu1 %v7799_v2, %s9453_s23 }
 0xb46   :  { %v2102_v26 = vpop.xlane.xlu0 %2101 }
 0xb47   :  { %v2118_v29 = vsub.f32 %v2094_v13, %v2102_v26 }
 0xb49   :  { %v2124_v30 = vmul.f32 1.442695, %v2118_v29 }
 0xb4a   :  { %v2105_v59 = vpop.xlane.xlu1 %2104 }
 0xb4b   :  { %7273 = vpow2.f32 %v2124_v30  ;;  %v2119_v42 = vsub.f32 %v2095_v47, %v2105_v59 }
 0xb4d   :  { %v2126_v43 = vmul.f32 1.442695, %v2119_v42  ;;  %v2456_v42 = vld [vmem:[%s9431_s8 + $0x18] sm:$0xff] }
 0xb4e   :  { %v2108_v37 = vpop.xlane.xlu0 %2107 }
 0xb4f   :  { %v2120_v62 = vsub.f32 %v2096_v45, %v2108_v37 }
 0xb51   :  { %v2128_v13 = vmul.f32 1.442695, %v2120_v62 }
 0xb58   :  { %v8285_v28 = vpop.eup %7273 }
 0xb59   :  { %v2136_v34 = vsel %vm653_vm4, %v8285_v28, 0.0 }
 0xb5a   :  { %2137 = vadd.xlane.f32.xlu0 %v2136_v34 }
 0xb7f   :  { %v2111_v0 = vpop.xlane.xlu0 %2110 }
 0xb80   :  { %v2121_v35 = vsub.f32 %v2097_v58, %v2111_v0  ;;  %v2455_v0 = vld [vmem:[%s9431_s8 + $0x10] sm:$0xff] }
 0xb82   :  { %v2130_v38 = vmul.f32 1.442695, %v2121_v35  ;;  %v2454_v35 = vld [vmem:[%s9431_s8 + $0x8] sm:$0xff] }
 0xb83   :  { %v2114_v48 = vpop.xlane.xlu0 %2113 }
 0xb84   :  { %7275 = vpow2.f32 %v2130_v38  ;;  %v2122_v2 = vsub.f32 %v2098_v60, %v2114_v48 }
 0xb85   :  { %7277 = vpow2.f32 %v2126_v43  ;;  %v2453_v43 = vld [vmem:[%s9431_s8] sm:$0xff] }
 0xb86   :  { %v2132_v49 = vmul.f32 1.442695, %v2122_v2 }
 0xb87   :  { %v2117_v51 = vpop.xlane.xlu1 %2116  ;;  %v2171_v44 = vpop.permute.xlu0 %2170 }
 0xb88   :  { %7279 = vpow2.f32 %v2132_v49  ;;  %v2123_v50 = vsub.f32 %v2099_v22, %v2117_v51  ;;  %6724 = vmatpush3.msra.mxu1 %v2171_v44 }
 0xb89   :  { %6725 = vmatprep.subr.mxu1 %v7502_v54  ;;  %7281 = vpow2.f32 %v2128_v13 }
 0xb8a   :  { %v2134_v47 = vmul.f32 1.442695, %v2123_v50 }
 0xb8b   :  { %v2169_v56 = vpop.permute.xlu1 %2168 }
 0xb8c   :  { %7283 = vpow2.f32 %v2134_v47  ;;  %6726 = vmatpush3.msra.mxu1 %v2169_v56 }
 0xb8d   :  { %6727 = vmatprep.subr.mxu1 %v7502_v54 }
 0xb8f   :  { %v2167_v45 = vpop.permute.xlu1 %2166 }
 0xb90   :  { %6728 = vmatpush3.msra.mxu1 %v2167_v45 }
 0xb91   :  { %v7276_v53 = vpop.eup %7275  ;;  %6753 = vmatprep.subr.mxu1 %v2456_v42 }
 0xb92   :  { %v2145_v57 = vsel %vm653_vm4, %v7276_v53, 0.0  ;;  %v7278_v58 = vpop.eup %7277 }
 0xb93   :  { %v2269_v61 = vpop.permute.xlu1 %2268  ;;  %2146 = vadd.xlane.f32.xlu1 %v2145_v57  ;;  %v2139_v55 = vsel %vm653_vm4, %v7278_v58, 0.0 }
 0xb94   :  { %6739 = vmatpush3.msra.mxu0 %v2269_v61 }
 0xb95   :  { %v7280_v1 = vpop.eup %7279  ;;  %6740 = vmatprep.subr.mxu0 %v7502_v54 }
 0xb96   :  { %v2148_v3 = vsel %vm653_vm4, %v7280_v1, 0.0  ;;  %v7282_v60 = vpop.eup %7281 }
 0xb97   :  { %2140 = vadd.xlane.f32.xlu1 %v2139_v55  ;;  %2149 = vadd.xlane.f32.xlu0 %v2148_v3  ;;  %v2142_v11 = vsel %vm653_vm4, %v7282_v60, 0.0 }
 0xb99   :  { %v7284_v6 = vpop.eup %7283 }
 0xb9a   :  { %v2151_v7 = vsel %vm653_vm4, %v7284_v6, 0.0 }
 0xb9b   :  { %2152 = vadd.xlane.f32.xlu1 %v2151_v7  ;;  %2143 = vadd.xlane.f32.xlu0 %v2142_v11 }
 0xbac   :  { %2264 = vrot.lane.b32.xlu1 %v7807_v5, %s9453_s23 }
 0xbb0   :  { %2370 = vrot.lane.b32.xlu1 %v8125_v39, %s7515_s1 }
 0xbb1   :  { %2266 = vrot.lane.b32.xlu0 %v7803_v4, %s9453_s23  ;;  %s9486_s23 = smov 80  }
 0xbb4   :  { %2394 = vrot.lane.b32.xlu1 %v8260_v20, %s7516_s5 }
 0xbb5   :  { %2368 = vrot.lane.b32.xlu0 %v8121_v33, %s7515_s1 }
 0xbb8   :  { %2374 = vrot.lane.b32.xlu1 %v8123_v36, %s7515_s1 }
 0xbb9   :  { %2392 = vrot.lane.b32.xlu0 %v8256_v9, %s7516_s5 }
 0xbbc   :  { %2398 = vrot.lane.b32.xlu1 %v8258_v15, %s7516_s5 }
 0xbbd   :  { %2372 = vrot.lane.b32.xlu0 %v8129_v46, %s7515_s1 }
 0xbc1   :  { %2396 = vrot.lane.b32.xlu0 %v8264_v25, %s7516_s5 }
 0xbe3   :  { %v2138_v4 = vpop.xlane.xlu0 %2137 }
 0xbe4   :  { %7285 = vrcp.f32 %v2138_v4 }
 0xbf1   :  { %v7286_v5 = vpop.eup %7285 }
 0xbf2   :  { %v2160_v33 = vmul.f32 %v7286_v5, %v8285_v28 }
 0xbf4   :  { %6730 = vmatmul.mubr.msk.f32.vlgmr.msra.gmra.mxu1 %vm653_vm4, %v2160_v33 }
 0xbf5   :  { %6732 = vmatprep.mubr.msk.f32.mxu1 %vm7504_vm2, %v7502_v54  ;;  %6754 = vmatpush3.msra.mxu1 %v2456_v42 }
 0xbf6   :  { %6755 = vmatprep.subr.mxu1 %v2455_v0 }
 0xbf7   :  { %6756 = vmatpush3.msra.mxu1 %v2455_v0 }
 0xbf8   :  { %6757 = vmatprep.subr.mxu1 %v2454_v35 }
 0xbf9   :  { %6758 = vmatpush3.msra.mxu1 %v2454_v35 }
 0xbfa   :  { %6759 = vmatprep.subr.mxu1 %v2453_v43 }
 0xbfb   :  { %6760 = vmatpush3.msra.mxu1 %v2453_v43 }
 0xc1c   :  { %v2147_v36 = vpop.xlane.xlu1 %2146 }
 0xc1d   :  { %7287 = vrcp.f32 %v2147_v36 }
 0xc20   :  { %v2141_v39 = vpop.xlane.xlu1 %2140  ;;  %v2150_v9 = vpop.xlane.xlu0 %2149 }
 0xc21   :  { %7289 = vrcp.f32 %v2141_v39 }
 0xc22   :  { %7291 = vrcp.f32 %v2150_v9 }
 0xc24   :  { %v2153_v46 = vpop.xlane.xlu1 %2152  ;;  %v2144_v15 = vpop.xlane.xlu0 %2143 }
 0xc25   :  { %7293 = vrcp.f32 %v2153_v46 }
 0xc26   :  { %7295 = vrcp.f32 %v2144_v15 }
 0xc28   :  { %v2267_v20 = vpop.permute.xlu0 %2266  ;;  %v2265_v17 = vpop.permute.xlu1 %2264 }
 0xc29   :  { %6741 = vmatpush3.msra.mxu0 %v2267_v20 }
 0xc2a   :  { %v7288_v25 = vpop.eup %7287  ;;  %6742 = vmatprep.subr.mxu0 %v7502_v54 }
 0xc2b   :  { %v2163_v22 = vmul.f32 %v7288_v25, %v7276_v53  ;;  %6743 = vmatpush3.msra.mxu0 %v2265_v17 }
 0xc2c   :  { %v2369_v53 = vpop.permute.xlu0 %2368 }
 0xc2d   :  { %6745 = vmatmul.mubr.msk.f32.vlgmr.msra.gmra.mxu0 %vm653_vm4, %v2163_v22 }
 0xc2e   :  { %v7290_v24 = vpop.eup %7289  ;;  %6747 = vmatprep.mubr.msk.f32.mxu0 %vm7504_vm2, %v7502_v54 }
 0xc2f   :  { %v7292_v26 = vpop.eup %7291  ;;  %v2161_v29 = vmul.f32 %v7290_v24, %v7278_v58 }
 0xc30   :  { %v2164_v30 = vmul.f32 %v7292_v26, %v7280_v1  ;;  %v2393_v57 = vpop.permute.xlu0 %2392 }
 0xc31   :  { %6733 = vmatmul.mubr.msk.f32.gmra.mxu1 %vm653_vm4, %v2161_v29 }
 0xc32   :  { %v7294_v28 = vpop.eup %7293  ;;  %6748 = vmatmul.mubr.msk.f32.gmra.mxu0 %vm653_vm4, %v2164_v30  ;;  %6735 = vmatprep.mubr.msk.f32.mxu1 %vm7504_vm2, %v7502_v54 }
 0xc33   :  { %v7296_v34 = vpop.eup %7295  ;;  %6750 = vmatprep.mubr.msk.f32.mxu0 %vm7504_vm2, %v7502_v54  ;;  %v2165_v59 = vmul.f32 %v7294_v28, %v7284_v6 }
 0xc34   :  { %v2162_v37 = vmul.f32 %v7296_v34, %v7282_v60  ;;  %v2373_v58 = vpop.permute.xlu0 %2372 }
 0xc35   :  { %v2436_v5 = vsel %vm441_vm3, %v7994_v18, %v2373_v58 }
 0xc36   :  { %6736 = vmatmul.mubr.msk.f32.gmra.mxu1 %vm653_vm4, %v2162_v37  ;;  %6751 = vmatmul.mubr.msk.f32.gmra.mxu0 %vm653_vm4, %v2165_v59 }
 0xc38   :  { %v2397_v61 = vpop.permute.xlu0 %2396 }
 0xc39   :  { %v2443_v39 = vsel %vm2440_vm5, %v2436_v5, %v2397_v61 }
 0xcb4   :  { %v2250_v62 = vpop.f32.mrf.mxu1 }
 0xcb5   :  { %2416 = vrot.lane.b32.xlu0 %v2250_v62, %s9469_s4 }
 0xcb6   :  { %v6731_v38 = vpop.f32.mrf.mxu1 }
 0xced   :  { %v2348_v48 = vpop.f32.mrf.mxu0 }
 0xcef   :  { %v6746_v2 = vpop.f32.mrf.mxu0 }
 0xcf1   :  { %v2255_v13 = vpop.f32.mrf.mxu1 }
 0xcf2   :  { %v2353_v49 = vpop.f32.mrf.mxu0  ;;  %2418 = vrot.lane.b32.xlu1 %v2255_v13, %s9469_s4 }
 0xcf3   :  { %v6734_v51 = vpop.f32.mrf.mxu1 }
 0xcf4   :  { %v6749_v44 = vpop.f32.mrf.mxu0 }
 0xcf6   :  { %v2260_v50 = vpop.f32.mrf.mxu1  ;;  %v2358_v47 = vpop.f32.mrf.mxu0  ;;  %2422 = vrot.lane.b32.xlu1 %v2348_v48, %s9469_s4 }
 0xcf7   :  { %2420 = vrot.lane.b32.xlu0 %v2260_v50, %s9469_s4 }
 0xcf8   :  { %v6737_v56 = vpop.f32.mrf.mxu1  ;;  %v6752_v45 = vpop.f32.mrf.mxu0 }
 0xcfa   :  { %2378 = vrot.lane.b32.xlu1 %v8145_v63, %s7515_s1  ;;  %v2434_v63 = vsel %vm441_vm3, %v7986_v8, %v2369_v53 }
 0xcfb   :  { %2376 = vrot.lane.b32.xlu0 %v8127_v40, %s7515_s1  ;;  %v2441_v40 = vsel %vm2440_vm5, %v2434_v63, %v2393_v57 }
 0xcfe   :  { %2402 = vrot.lane.b32.xlu1 %v8272_v52, %s7516_s5 }
 0xcff   :  { %2400 = vrot.lane.b32.xlu0 %v8262_v21, %s7516_s5  ;;  %v2371_v21 = vpop.permute.xlu1 %2370 }
 0xd00   :  { %v2435_v6 = vsel %vm441_vm3, %v7990_v12, %v2371_v21 }
 0xd02   :  { %2426 = vrot.lane.b32.xlu1 %v2358_v47, %s9469_s4 }
 0xd03   :  { %2424 = vrot.lane.b32.xlu0 %v2353_v49, %s9469_s4  ;;  %v2395_v55 = vpop.permute.xlu1 %2394  ;;  %s9490_s4 = smov 104  }
 0xd04   :  { %v2442_v7 = vsel %vm2440_vm5, %v2435_v6, %v2395_v55 }
 0xd07   :  { %v2375_v3 = vpop.permute.xlu1 %2374 }
 0xd08   :  { %v2437_v8 = vsel %vm441_vm3, %v7988_v10, %v2375_v3 }
 0xd0b   :  { %v2399_v60 = vpop.permute.xlu1 %2398 }
 0xd0c   :  { %v2444_v33 = vsel %vm2440_vm5, %v2437_v8, %v2399_v60 }
 0xd27   :  { %v2417_v1 = vpop.permute.xlu0 %2416 }
 0xd28   :  { %v2447_v52 = vsel %vm653_vm4, %v2441_v40, %v2417_v1 }
 0xd29   :  { %6761 = vmatprep.mubr.msk.f32.mxu1 %vm204_vm1, %v2447_v52 }
 0xd64   :  { %v2419_v11 = vpop.permute.xlu1 %2418 }
 0xd65   :  { %v2448_v4 = vsel %vm653_vm4, %v2442_v7, %v2419_v11 }
 0xd66   :  { %6762 = vmatmul.mubr.msk.f32.vlgmr.msra.gmra.mxu1 %vm204_vm1, %v2448_v4 }
 0xd68   :  { %v2423_v36 = vpop.permute.xlu1 %2422 }
 0xd69   :  { %v2450_v12 = vsel %vm653_vm4, %v2444_v33, %v2423_v36  ;;  %v2421_v9 = vpop.permute.xlu0 %2420 }
 0xd6a   :  { %v2449_v46 = vsel %vm653_vm4, %v2443_v39, %v2421_v9 }
 0xd6b   :  { %6764 = vmatprep.mubr.msk.f32.mxu1 %vm204_vm1, %v2449_v46 }
 0xd6c   :  { %6765 = vmatmul.mubr.msk.f32.gmra.mxu1 %vm204_vm1, %v2450_v12  ;;  %v2379_v15 = vpop.permute.xlu1 %2378 }
 0xd6d   :  { %v2377_v20 = vpop.permute.xlu0 %2376  ;;  %v2439_v18 = vsel %vm441_vm3, %v8010_v41, %v2379_v15  ;;  %v6007_v41 = vld [vmem:[%s9432_s9] ss:$0 sm:$0xff] }
 0xd6e   :  { %v2438_v17 = vsel %vm441_vm3, %v7992_v14, %v2377_v20 }
 0xd70   :  { %v2403_v10 = vpop.permute.xlu1 %2402 }
 0xd71   :  { %v2401_v25 = vpop.permute.xlu0 %2400  ;;  %v2446_v22 = vsel %vm2440_vm5, %v2439_v18, %v2403_v10  ;;  %v2690_v18 = vld [vmem:[%s9435_s12 + $0x18] sm:$0xff] }
 0xd72   :  { %v2445_v26 = vsel %vm2440_vm5, %v2438_v17, %v2401_v25  ;;  %6770 = vmatprep.subr.mxu0 %v2690_v18  ;;  %v2689_v17 = vld [vmem:[%s9435_s12 + $0x10] sm:$0xff] }
 0xd73   :  { %6771 = vmatpush3.msra.mxu0 %v2690_v18  ;;  %v2871_v18 = vld [vmem:[%s9437_s14 + $0x30] sm:$0xff] }
 0xd74   :  { %v2427_v24 = vpop.permute.xlu1 %2426  ;;  %6772 = vmatprep.subr.mxu0 %v2689_v17 }
 0xd75   :  { %v2452_v29 = vsel %vm653_vm4, %v2446_v22, %v2427_v24  ;;  %v2425_v30 = vpop.permute.xlu0 %2424  ;;  %6773 = vmatpush3.msra.mxu0 %v2689_v17  ;;  %v2688_v22 = vld [vmem:[%s9435_s12 + $0x8] sm:$0xff]  ;;  %v2687_v24 = vld [vmem:[%s9435_s12] sm:$0xff] }
 0xd76   :  { %v2451_v28 = vsel %vm653_vm4, %v2445_v26, %v2425_v30  ;;  %6774 = vmatprep.subr.mxu0 %v2688_v22  ;;  %v2870_v17 = vld [vmem:[%s9437_s14 + $0x28] sm:$0xff] }
 0xd77   :  { %6767 = vmatprep.mubr.msk.f32.mxu1 %vm204_vm1, %v2451_v28  ;;  %6775 = vmatpush3.msra.mxu0 %v2688_v22  ;;  %v2869_v22 = vld [vmem:[%s9437_s14 + $0x20] sm:$0xff] }
 0xd78   :  { %6768 = vmatmul.mubr.msk.f32.gmra.mxu1 %vm204_vm1, %v2452_v29  ;;  %6776 = vmatprep.subr.mxu0 %v2687_v24 }
 0xd79   :  { %6777 = vmatpush3.msra.mxu0 %v2687_v24  ;;  %v2868_v24 = vld [vmem:[%s9437_s14 + $0x18] sm:$0xff] }
 0xe26   :  { %v6763_v34 = vpop.f32.mrf.mxu1 }
 0xe27   :  { %v2554_v14 = vadd.f32 %v6763_v34, %v6007_v41 }
 0xe28   :  { %v2548_v59 = vpop.f32.mrf.mxu1 }
 0xe29   :  { %v8393_v37 = vadd.f32 %v2554_v14, %v7683_v19  ;;  %v2549_v42 = vadd.f32 %v6007_v41, %v2548_v59 }
 0xe2b   :  { %v8396_v0 = vadd.f32 %v2549_v42, %v7678_v16  ;;  %v2588_v35 = vsel %vm204_vm1, %v8393_v37, 0.0 }
 0xe2c   :  { %v6766_v43 = vpop.f32.mrf.mxu1  ;;  %2589 = vadd.xlane.f32.xlu1 %v2588_v35 }
 0xe2d   :  { %v2585_v62 = vsel %vm204_vm1, %v8396_v0, 0.0  ;;  %v2564_v48 = vadd.f32 %v6766_v43, %v6007_v41 }
 0xe2e   :  { %v2558_v38 = vpop.f32.mrf.mxu1  ;;  %2586 = vadd.xlane.f32.xlu0 %v2585_v62 }
 0xe2f   :  { %v2559_v2 = vadd.f32 %v6007_v41, %v2558_v38  ;;  %v8406_v19 = vadd.f32 %v2564_v48, %v7698_v27 }
 0xe31   :  { %v8403_v13 = vadd.f32 %v2559_v2, %v7690_v23  ;;  %v2594_v49 = vsel %vm204_vm1, %v8406_v19, 0.0 }
 0xe33   :  { %v2591_v16 = vsel %vm204_vm1, %v8403_v13, 0.0 }
 0xe34   :  { %2592 = vadd.xlane.f32.xlu0 %v2591_v16 }
 0xe38   :  { %2595 = vadd.xlane.f32.xlu0 %v2594_v49  ;;  %v6769_v51 = vpop.f32.mrf.mxu1  ;;  %v6014_v49 = vld [vmem:[%s9433_s10] ss:$0 sm:$0xff] }
 0xe39   :  { %v2574_v44 = vadd.f32 %v6769_v51, %v6007_v41 }
 0xe3a   :  { %v2568_v50 = vpop.f32.mrf.mxu1 }
 0xe3b   :  { %v8413_v47 = vadd.f32 %v2574_v44, %v7704_v31  ;;  %v2569_v56 = vadd.f32 %v6007_v41, %v2568_v50 }
 0xe3d   :  { %v8416_v23 = vadd.f32 %v2569_v56, %v7706_v32  ;;  %v2600_v27 = vsel %vm204_vm1, %v8413_v47, 0.0 }
 0xe3e   :  { %2601 = vadd.xlane.f32.xlu1 %v2600_v27 }
 0xe3f   :  { %v2597_v45 = vsel %vm204_vm1, %v8416_v23, 0.0 }
 0xe40   :  { %2598 = vadd.xlane.f32.xlu0 %v2597_v45 }
 0xeb5   :  { %v2590_v53 = vpop.xlane.xlu1 %2589 }
 0xeb6   :  { %v2604_v57 = vmul.f32 0.03125, %v2590_v53 }
 0xeb7   :  { %v2587_v58 = vpop.xlane.xlu0 %2586 }
 0xeb8   :  { %v8423_v61 = vsub.f32 %v8393_v37, %v2604_v57  ;;  %v2603_v31 = vmul.f32 0.03125, %v2587_v58  ;;  %v6015_v57 = vld [vmem:[%s9434_s11] ss:$0 sm:$0xff] }
 0xeba   :  { %v8426_v63 = vsub.f32 %v8396_v0, %v2603_v31  ;;  %v2616_v32 = vmul.f32 %v8423_v61, %v8423_v61 }
 0xebc   :  { %v2624_v40 = vsel %vm204_vm1, %v2616_v32, 0.0  ;;  %v2615_v1 = vmul.f32 %v8426_v63, %v8426_v63 }
 0xebd   :  { %v2593_v52 = vpop.xlane.xlu0 %2592  ;;  %2625 = vadd.xlane.f32.xlu1 %v2624_v40 }
 0xebe   :  { %v2605_v21 = vmul.f32 0.03125, %v2593_v52  ;;  %v2621_v55 = vsel %vm204_vm1, %v2615_v1, 0.0 }
 0xebf   :  { %2622 = vadd.xlane.f32.xlu0 %v2621_v55 }
 0xec0   :  { %v8435_v3 = vsub.f32 %v8403_v13, %v2605_v21 }
 0xec1   :  { %v2596_v60 = vpop.xlane.xlu0 %2595 }
 0xec2   :  { %v2606_v6 = vmul.f32 0.03125, %v2596_v60  ;;  %v2617_v7 = vmul.f32 %v8435_v3, %v8435_v3 }
 0xec4   :  { %v8440_v11 = vsub.f32 %v8406_v19, %v2606_v6  ;;  %v2627_v4 = vsel %vm204_vm1, %v2617_v7, 0.0 }
 0xec5   :  { %2628 = vadd.xlane.f32.xlu0 %v2627_v4 }
 0xec6   :  { %v2618_v8 = vmul.f32 %v8440_v11, %v8440_v11 }
 0xec7   :  { %v2602_v5 = vpop.xlane.xlu1 %2601 }
 0xec8   :  { %v2608_v33 = vmul.f32 0.03125, %v2602_v5  ;;  %v2630_v36 = vsel %vm204_vm1, %v2618_v8, 0.0 }
 0xec9   :  { %2631 = vadd.xlane.f32.xlu1 %v2630_v36  ;;  %v2599_v39 = vpop.xlane.xlu0 %2598 }
 0xeca   :  { %v8447_v12 = vsub.f32 %v8413_v47, %v2608_v33  ;;  %v2607_v9 = vmul.f32 0.03125, %v2599_v39  ;;  %v2879_v39 = vld [vmem:[%s9437_s14 + $0x70] sm:$0xff] }
 0xecc   :  { %v8450_v46 = vsub.f32 %v8416_v23, %v2607_v9  ;;  %v2620_v15 = vmul.f32 %v8447_v12, %v8447_v12  ;;  %v2877_v9 = vld [vmem:[%s9437_s14 + $0x60] sm:$0xff] }
 0xece   :  { %v2636_v20 = vsel %vm204_vm1, %v2620_v15, 0.0  ;;  %v2619_v10 = vmul.f32 %v8450_v46, %v8450_v46  ;;  %v2875_v15 = vld [vmem:[%s9437_s14 + $0x50] sm:$0xff] }
 0xecf   :  { %2637 = vadd.xlane.f32.xlu1 %v2636_v20  ;;  %v2874_v20 = vld [vmem:[%s9437_s14 + $0x48] sm:$0xff] }
 0xed0   :  { %v2633_v25 = vsel %vm204_vm1, %v2619_v10, 0.0  ;;  %v2873_v10 = vld [vmem:[%s9437_s14 + $0x40] sm:$0xff] }
 0xed1   :  { %2634 = vadd.xlane.f32.xlu0 %v2633_v25  ;;  %v2872_v25 = vld [vmem:[%s9437_s14 + $0x38] sm:$0xff] }
 0xf46   :  { %v2626_v26 = vpop.xlane.xlu1 %2625 }
 0xf47   :  { %v2640_v29 = vmul.f32 0.03125, %v2626_v26  ;;  %v2867_v26 = vld [vmem:[%s9437_s14 + $0x10] sm:$0xff] }
 0xf48   :  { %v2623_v30 = vpop.xlane.xlu0 %2622 }
 0xf49   :  { %v2646_v28 = vadd.f32 1e-06, %v2640_v29  ;;  %v2639_v41 = vmul.f32 0.03125, %v2623_v30  ;;  %v2866_v29 = vld [vmem:[%s9437_s14 + $0x8] sm:$0xff]  ;;  %v2865_v30 = vld [vmem:[%s9437_s14] sm:$0xff] }
 0xf4b   :  { %7297 = vrsqrt.f32 %v2646_v28  ;;  %v2645_v34 = vadd.f32 1e-06, %v2639_v41  ;;  %v6016_v28 = vld [vmem:[%s9436_s13] ss:$0 sm:$0xff] }
 0xf4d   :  { %7299 = vrsqrt.f32 %v2645_v34 }
 0xf4e   :  { %v2629_v14 = vpop.xlane.xlu0 %2628 }
 0xf4f   :  { %v2641_v59 = vmul.f32 0.03125, %v2629_v14 }
 0xf51   :  { %v2647_v42 = vadd.f32 1e-06, %v2641_v59 }
 0xf52   :  { %v2632_v35 = vpop.xlane.xlu1 %2631 }
 0xf53   :  { %7301 = vrsqrt.f32 %v2647_v42  ;;  %v2642_v43 = vmul.f32 0.03125, %v2632_v35 }
 0xf55   :  { %v2648_v62 = vadd.f32 1e-06, %v2642_v43 }
 0xf57   :  { %7303 = vrsqrt.f32 %v2648_v62 }
 0xf58   :  { %v7298_v38 = vpop.eup %7297  ;;  %v2638_v48 = vpop.xlane.xlu1 %2637 }
 0xf59   :  { %v2658_v2 = vmul.f32 %v7298_v38, %v8423_v61  ;;  %v2644_v16 = vmul.f32 0.03125, %v2638_v48 }
 0xf5a   :  { %v7300_v51 = vpop.eup %7299  ;;  %v2635_v44 = vpop.xlane.xlu0 %2634 }
 0xf5b   :  { %v2650_v50 = vadd.f32 1e-06, %v2644_v16  ;;  %v2643_v56 = vmul.f32 0.03125, %v2635_v44  ;;  %v2657_v27 = vmul.f32 %v7300_v51, %v8426_v63  ;;  %v2670_v45 = vmul.f32 %v6014_v49, %v2658_v2 }
 0xf5d   :  { %7305 = vrsqrt.f32 %v2650_v50  ;;  %v2649_v53 = vadd.f32 1e-06, %v2643_v56  ;;  %v2669_v58 = vmul.f32 %v6014_v49, %v2657_v27  ;;  %v2682_v32 = vadd.f32 %v6015_v57, %v2670_v45 }
 0xf5f   :  { %7307 = vrsqrt.f32 %v2649_v53  ;;  %v2681_v61 = vadd.f32 %v6015_v57, %v2669_v58 }
 0xf60   :  { %v7302_v31 = vpop.eup %7301 }
 0xf61   :  { %6778 = vmatprep.mubr.msk.f32.mxu0 %vm204_vm1, %v2681_v61  ;;  %v2659_v40 = vmul.f32 %v7302_v31, %v8435_v3 }
 0xf62   :  { %6779 = vmatmul.mubr.msk.f32.vlgmr.msra.gmra.mxu0 %vm204_vm1, %v2682_v32 }
 0xf63   :  { %v2671_v1 = vmul.f32 %v6014_v49, %v2659_v40 }
 0xf64   :  { %v7304_v63 = vpop.eup %7303 }
 0xf65   :  { %v2683_v52 = vadd.f32 %v6015_v57, %v2671_v1  ;;  %v2660_v21 = vmul.f32 %v7304_v63, %v8440_v11  ;;  %v2880_v11 = vld [vmem:[%s9437_s14 + $0x78] sm:$0xff] }
 0xf66   :  { %6787 = vmatprep.subr.mxu1 %v2880_v11 }
 0xf67   :  { %6781 = vmatprep.mubr.msk.f32.mxu0 %vm204_vm1, %v2683_v52  ;;  %v2672_v55 = vmul.f32 %v6014_v49, %v2660_v21  ;;  %6788 = vmatpush3.msra.mxu1 %v2880_v11 }
 0xf68   :  { %6789 = vmatprep.subr.mxu1 %v2879_v39 }
 0xf69   :  { %v2684_v60 = vadd.f32 %v6015_v57, %v2672_v55  ;;  %6790 = vmatpush3.msra.mxu1 %v2879_v39 }
 0xf6a   :  { %v7306_v6 = vpop.eup %7305 }
 0xf6b   :  { %6782 = vmatmul.mubr.msk.f32.gmra.mxu0 %vm204_vm1, %v2684_v60  ;;  %v2662_v7 = vmul.f32 %v7306_v6, %v8447_v12  ;;  %v2878_v12 = vld [vmem:[%s9437_s14 + $0x68] sm:$0xff] }
 0xf6c   :  { %v7308_v4 = vpop.eup %7307  ;;  %6791 = vmatprep.subr.mxu1 %v2878_v12 }
 0xf6d   :  { %v2661_v8 = vmul.f32 %v7308_v4, %v8450_v46  ;;  %v2674_v3 = vmul.f32 %v6014_v49, %v2662_v7  ;;  %6792 = vmatpush3.msra.mxu1 %v2878_v12  ;;  %v2876_v46 = vld [vmem:[%s9437_s14 + $0x58] sm:$0xff] }
 0xf6e   :  { %6793 = vmatprep.subr.mxu1 %v2877_v9 }
 0xf6f   :  { %v2673_v5 = vmul.f32 %v6014_v49, %v2661_v8  ;;  %v2686_v36 = vadd.f32 %v6015_v57, %v2674_v3  ;;  %6794 = vmatpush3.msra.mxu1 %v2877_v9 }
 0xf70   :  { %6795 = vmatprep.subr.mxu1 %v2876_v46 }
 0xf71   :  { %v2685_v33 = vadd.f32 %v6015_v57, %v2673_v5  ;;  %6796 = vmatpush3.msra.mxu1 %v2876_v46 }
 0xf72   :  { %6797 = vmatprep.subr.mxu1 %v2875_v15 }
 0xf73   :  { %6784 = vmatprep.mubr.msk.f32.mxu0 %vm204_vm1, %v2685_v33  ;;  %6798 = vmatpush3.msra.mxu1 %v2875_v15 }
 0xf74   :  { %6785 = vmatmul.mubr.msk.f32.gmra.mxu0 %vm204_vm1, %v2686_v36  ;;  %6799 = vmatprep.subr.mxu1 %v2874_v20 }
 0xf75   :  { %6800 = vmatpush3.msra.mxu1 %v2874_v20 }
 0xf76   :  { %6801 = vmatprep.subr.mxu1 %v2873_v10 }
 0xf77   :  { %6802 = vmatpush3.msra.mxu1 %v2873_v10 }
 0xf78   :  { %6803 = vmatprep.subr.mxu1 %v2872_v25 }
 0xf79   :  { %6804 = vmatpush3.msra.mxu1 %v2872_v25 }
 0xf7a   :  { %6805 = vmatprep.subr.mxu1 %v2871_v18 }
 0xf7b   :  { %6806 = vmatpush3.msra.mxu1 %v2871_v18 }
 0xf7c   :  { %6807 = vmatprep.subr.mxu1 %v2870_v17 }
 0xf7d   :  { %6808 = vmatpush3.msra.mxu1 %v2870_v17 }
 0xf7e   :  { %6809 = vmatprep.subr.mxu1 %v2869_v22 }
 0xf7f   :  { %6810 = vmatpush3.msra.mxu1 %v2869_v22 }
 0xf80   :  { %6811 = vmatprep.subr.mxu1 %v2868_v24 }
 0xf81   :  { %6812 = vmatpush3.msra.mxu1 %v2868_v24 }
 0xf82   :  { %6813 = vmatprep.subr.mxu1 %v2867_v26 }
 0xf83   :  { %6814 = vmatpush3.msra.mxu1 %v2867_v26 }
 0xf84   :  { %6815 = vmatprep.subr.mxu1 %v2866_v29 }
 0xf85   :  { %6816 = vmatpush3.msra.mxu1 %v2866_v29 }
 0xf86   :  { %6817 = vmatprep.subr.mxu1 %v2865_v30 }
 0xf87   :  { %6818 = vmatpush3.msra.mxu1 %v2865_v30 }
 0xf88   :  { %6875 = vmatprep.subr.mxu1 %v7502_v54 }
0x1022   :  { %v6780_v41 = vpop.f32.mrf.mxu0 }
0x1023   :  { %v2788_v34 = vadd.f32 %v6780_v41, %v6016_v28 }
0x1024   :  { %v2782_v14 = vpop.f32.mrf.mxu0 }
0x1025   :  { %v2812_v59 = vmul.f32 %v2788_v34, %v2788_v34  ;;  %v2783_v42 = vadd.f32 %v6016_v28, %v2782_v14 }
0x1027   :  { %v2818_v35 = vmul.f32 %v2812_v59, %v2788_v34  ;;  %v2811_v43 = vmul.f32 %v2783_v42, %v2783_v42 }
0x1029   :  { %v2824_v62 = vmul.f32 0.044715, %v2818_v35  ;;  %v2817_v38 = vmul.f32 %v2811_v43, %v2783_v42 }
0x102b   :  { %v2830_v48 = vadd.f32 %v2824_v62, %v2788_v34  ;;  %v2823_v2 = vmul.f32 0.044715, %v2817_v38  ;;  %v6783_v16 = vpop.f32.mrf.mxu0 }
0x102c   :  { %v2798_v49 = vadd.f32 %v6783_v16, %v6016_v28 }
0x102d   :  { %v2836_v51 = vmul.f32 0.7978846, %v2830_v48  ;;  %v2829_v44 = vadd.f32 %v2823_v2, %v2783_v42  ;;  %v2792_v50 = vpop.f32.mrf.mxu0  ;;  %v6023_v48 = vld [vmem:[%s9438_s15] ss:$0 sm:$0xff] }
0x102e   :  { %v2814_v56 = vmul.f32 %v2798_v49, %v2798_v49  ;;  %v2793_v27 = vadd.f32 %v6016_v28, %v2792_v50 }
0x102f   :  { %7309 = vtanh.f32 %v2836_v51  ;;  %v2835_v45 = vmul.f32 0.7978846, %v2829_v44 }
0x1030   :  { %v2820_v53 = vmul.f32 %v2814_v56, %v2798_v49  ;;  %v2813_v57 = vmul.f32 %v2793_v27, %v2793_v27 }
0x1031   :  { %7311 = vtanh.f32 %v2835_v45 }
0x1032   :  { %v2826_v58 = vmul.f32 0.044715, %v2820_v53  ;;  %v2819_v61 = vmul.f32 %v2813_v57, %v2793_v27 }
0x1034   :  { %v2832_v31 = vadd.f32 %v2826_v58, %v2798_v49  ;;  %v2825_v32 = vmul.f32 0.044715, %v2819_v61  ;;  %v6786_v40 = vpop.f32.mrf.mxu0 }
0x1035   :  { %v2808_v1 = vadd.f32 %v6786_v40, %v6016_v28 }
0x1036   :  { %v2838_v63 = vmul.f32 0.7978846, %v2832_v31  ;;  %v2831_v52 = vadd.f32 %v2825_v32, %v2793_v27  ;;  %v2802_v21 = vpop.f32.mrf.mxu0 }
0x1037   :  { %v2816_v55 = vmul.f32 %v2808_v1, %v2808_v1  ;;  %v2803_v60 = vadd.f32 %v6016_v28, %v2802_v21 }
0x1038   :  { %7313 = vtanh.f32 %v2838_v63  ;;  %v2837_v6 = vmul.f32 0.7978846, %v2831_v52 }
0x1039   :  { %v2822_v7 = vmul.f32 %v2816_v55, %v2808_v1  ;;  %v2815_v4 = vmul.f32 %v2803_v60, %v2803_v60 }
0x103a   :  { %7315 = vtanh.f32 %v2837_v6 }
0x103b   :  { %v2828_v8 = vmul.f32 0.044715, %v2822_v7  ;;  %v2821_v3 = vmul.f32 %v2815_v4, %v2803_v60 }
0x103c   :  { %v7310_v5 = vpop.eup %7309 }
0x103d   :  { %v2848_v33 = vadd.f32 1.0, %v7310_v5  ;;  %v2834_v36 = vadd.f32 %v2828_v8, %v2808_v1  ;;  %v2827_v11 = vmul.f32 0.044715, %v2821_v3 }
0x103e   :  { %v7312_v39 = vpop.eup %7311 }
0x103f   :  { %v2840_v12 = vmul.f32 0.7978846, %v2834_v36  ;;  %v2833_v9 = vadd.f32 %v2827_v11, %v2803_v60  ;;  %v2847_v46 = vadd.f32 1.0, %v7312_v39  ;;  %v2854_v15 = vmul.f32 0.5, %v2848_v33 }
0x1041   :  { %7317 = vtanh.f32 %v2840_v12  ;;  %v2839_v20 = vmul.f32 0.7978846, %v2833_v9  ;;  %v2853_v10 = vmul.f32 0.5, %v2847_v46  ;;  %v2860_v18 = vmul.f32 %v2854_v15, %v2788_v34 }
0x1043   :  { %7319 = vtanh.f32 %v2839_v20  ;;  %v2859_v25 = vmul.f32 %v2853_v10, %v2783_v42 }
0x1045   :  { %v7314_v17 = vpop.eup %7313  ;;  %6819 = vmatprep.mubr.f32.mxu1 %v2859_v25 }
0x1046   :  { %6820 = vmatmul.mubr.f32.vlgmr.msra.gmra.mxu1 %v2860_v18  ;;  %v2850_v22 = vadd.f32 1.0, %v7314_v17 }
0x1047   :  { %v7316_v24 = vpop.eup %7315 }
0x1048   :  { %v2849_v26 = vadd.f32 1.0, %v7316_v24  ;;  %v2856_v29 = vmul.f32 0.5, %v2850_v22 }
0x104a   :  { %v2855_v30 = vmul.f32 0.5, %v2849_v26  ;;  %v2862_v41 = vmul.f32 %v2856_v29, %v2798_v49 }
0x104c   :  { %v2861_v28 = vmul.f32 %v2855_v30, %v2793_v27 }
0x104e   :  { %v7318_v14 = vpop.eup %7317  ;;  %6822 = vmatprep.mubr.f32.mxu1 %v2861_v28 }
0x104f   :  { %6823 = vmatmul.mubr.f32.gmra.mxu1 %v2862_v41  ;;  %v2852_v59 = vadd.f32 1.0, %v7318_v14  ;;  %v6031_v14 = vld [vmem:[%s9429_s6 + $0x38] sm:$0xff] }
0x1050   :  { %v7320_v35 = vpop.eup %7319  ;;  %6828 = vmatprep.subr.mxu0 %v6031_v14 }
0x1051   :  { %v2851_v43 = vadd.f32 1.0, %v7320_v35  ;;  %v2858_v62 = vmul.f32 0.5, %v2852_v59  ;;  %6829 = vmatpush3.msra.mxu0 %v6031_v14  ;;  %v6030_v59 = vld [vmem:[%s9429_s6 + $0x30] sm:$0xff]  ;;  %v6029_v35 = vld [vmem:[%s9429_s6 + $0x28] sm:$0xff] }
0x1052   :  { %6830 = vmatprep.subr.mxu0 %v6030_v59 }
0x1053   :  { %v2857_v38 = vmul.f32 0.5, %v2851_v43  ;;  %v2864_v34 = vmul.f32 %v2858_v62, %v2808_v1  ;;  %6831 = vmatpush3.msra.mxu0 %v6030_v59  ;;  %v6028_v43 = vld [vmem:[%s9429_s6 + $0x20] sm:$0xff]  ;;  %s9489_s6 = smov 72  }
0x1054   :  { %6832 = vmatprep.subr.mxu0 %v6029_v35 }
0x1055   :  { %v2863_v42 = vmul.f32 %v2857_v38, %v2803_v60  ;;  %6833 = vmatpush3.msra.mxu0 %v6029_v35 }
0x1056   :  { %6834 = vmatprep.subr.mxu0 %v6028_v43 }
0x1057   :  { %6825 = vmatprep.mubr.f32.mxu1 %v2863_v42  ;;  %6835 = vmatpush3.msra.mxu0 %v6028_v43 }
0x1058   :  { %6826 = vmatmul.mubr.f32.gmra.mxu1 %v2864_v34  ;;  %6845 = vmatprep.subr.mxu0 %v7502_v54 }
0x1059   :  { %6881 = vmatprep.mubr.msk.f32.mxu1 %vm7504_vm2, %v7502_v54 }
0x1106   :  { %v6821_v2 = vpop.f32.mrf.mxu1 }
0x1107   :  { %v2960_v16 = vadd.f32 %v6821_v2, %v6023_v48 }
0x1108   :  { %v2954_v49 = vpop.f32.mrf.mxu1 }
0x1109   :  { %v8546_v51 = vadd.f32 %v2960_v16, %v8393_v37  ;;  %v2955_v44 = vadd.f32 %v6023_v48, %v2954_v49 }
0x110b   :  { %v8549_v50 = vadd.f32 %v2955_v44, %v8396_v0  ;;  %v2996_v56 = vsel %vm204_vm1, %v8546_v51, 0.0 }
0x110c   :  { %2997 = vadd.xlane.f32.xlu1 %v2996_v56 }
0x110d   :  { %v2993_v27 = vsel %vm204_vm1, %v8549_v50, 0.0 }
0x110e   :  { %2994 = vadd.xlane.f32.xlu0 %v2993_v27 }
0x110f   :  { %v6824_v45 = vpop.f32.mrf.mxu1 }
0x1110   :  { %v2970_v53 = vadd.f32 %v6824_v45, %v6023_v48 }
0x1111   :  { %v2964_v57 = vpop.f32.mrf.mxu1 }
0x1112   :  { %v8556_v58 = vadd.f32 %v2970_v53, %v8406_v19  ;;  %v2965_v37 = vadd.f32 %v6023_v48, %v2964_v57 }
0x1114   :  { %v8559_v61 = vadd.f32 %v2965_v37, %v8403_v13  ;;  %v3002_v0 = vsel %vm204_vm1, %v8556_v58, 0.0 }
0x1115   :  { %3003 = vadd.xlane.f32.xlu1 %v3002_v0 }
0x1116   :  { %v2999_v31 = vsel %vm204_vm1, %v8559_v61, 0.0 }
0x1117   :  { %3000 = vadd.xlane.f32.xlu0 %v2999_v31  ;;  %v6026_v31 = vld [vmem:[%s9480_s28 + $0x1] ss:$0 sm:$0xff]  ;;  %s9492_s28 = smov 24  }
0x1118   :  { %v6827_v32 = vpop.f32.mrf.mxu1 }
0x1119   :  { %v2980_v40 = vadd.f32 %v6827_v32, %v6023_v48 }
0x111a   :  { %v2974_v1 = vpop.f32.mrf.mxu1 }
0x111b   :  { %v8566_v63 = vadd.f32 %v2980_v40, %v8413_v47  ;;  %v2975_v19 = vadd.f32 %v6023_v48, %v2974_v1 }
0x111d   :  { %v8569_v52 = vadd.f32 %v2975_v19, %v8416_v23  ;;  %v3008_v13 = vsel %vm204_vm1, %v8566_v63, 0.0 }
0x111e   :  { %3009 = vadd.xlane.f32.xlu1 %v3008_v13 }
0x111f   :  { %v3005_v21 = vsel %vm204_vm1, %v8569_v52, 0.0 }
0x1120   :  { %3006 = vadd.xlane.f32.xlu0 %v3005_v21 }
0x1195   :  { %v2998_v55 = vpop.xlane.xlu1 %2997 }
0x1196   :  { %v3012_v60 = vmul.f32 0.03125, %v2998_v55 }
0x1197   :  { %v2995_v6 = vpop.xlane.xlu0 %2994 }
0x1198   :  { %v8576_v7 = vsub.f32 %v8546_v51, %v3012_v60  ;;  %v3011_v47 = vmul.f32 0.03125, %v2995_v6  ;;  %v6027_v60 = vld [vmem:[%s9481_s26 + $0x1] ss:$0 sm:$0xff] }
0x119a   :  { %v8579_v4 = vsub.f32 %v8549_v50, %v3011_v47  ;;  %v3024_v23 = vmul.f32 %v8576_v7, %v8576_v7 }
0x119c   :  { %v3032_v8 = vsel %vm204_vm1, %v3024_v23, 0.0  ;;  %v3023_v3 = vmul.f32 %v8579_v4, %v8579_v4 }
0x119d   :  { %3033 = vadd.xlane.f32.xlu1 %v3032_v8 }
0x119e   :  { %v3004_v5 = vpop.xlane.xlu1 %3003  ;;  %v3029_v33 = vsel %vm204_vm1, %v3023_v3, 0.0 }
0x119f   :  { %v3014_v36 = vmul.f32 0.03125, %v3004_v5  ;;  %3030 = vadd.xlane.f32.xlu0 %v3029_v33 }
0x11a0   :  { %v3001_v11 = vpop.xlane.xlu0 %3000 }
0x11a1   :  { %v8588_v39 = vsub.f32 %v8556_v58, %v3014_v36  ;;  %v3013_v12 = vmul.f32 0.03125, %v3001_v11 }
0x11a3   :  { %v8591_v9 = vsub.f32 %v8559_v61, %v3013_v12  ;;  %v3026_v46 = vmul.f32 %v8588_v39, %v8588_v39 }
0x11a5   :  { %v3038_v15 = vsel %vm204_vm1, %v3026_v46, 0.0  ;;  %v3025_v20 = vmul.f32 %v8591_v9, %v8591_v9 }
0x11a6   :  { %3039 = vadd.xlane.f32.xlu1 %v3038_v15 }
0x11a7   :  { %v3010_v10 = vpop.xlane.xlu1 %3009  ;;  %v3035_v25 = vsel %vm204_vm1, %v3025_v20, 0.0 }
0x11a8   :  { %v3016_v18 = vmul.f32 0.03125, %v3010_v10  ;;  %3036 = vadd.xlane.f32.xlu0 %v3035_v25 }
0x11a9   :  { %v3007_v17 = vpop.xlane.xlu0 %3006 }
0x11aa   :  { %v8600_v22 = vsub.f32 %v8566_v63, %v3016_v18  ;;  %v3015_v24 = vmul.f32 0.03125, %v3007_v17 }
0x11ac   :  { %v8603_v26 = vsub.f32 %v8569_v52, %v3015_v24  ;;  %v3028_v29 = vmul.f32 %v8600_v22, %v8600_v22 }
0x11ae   :  { %v3044_v30 = vsel %vm204_vm1, %v3028_v29, 0.0  ;;  %v3027_v28 = vmul.f32 %v8603_v26, %v8603_v26 }
0x11af   :  { %3045 = vadd.xlane.f32.xlu1 %v3044_v30 }
0x11b0   :  { %v3041_v41 = vsel %vm204_vm1, %v3027_v28, 0.0 }
0x11b1   :  { %3042 = vadd.xlane.f32.xlu0 %v3041_v41 }
0x1226   :  { %v3034_v62 = vpop.xlane.xlu1 %3033 }
0x1227   :  { %v3048_v38 = vmul.f32 0.03125, %v3034_v62 }
0x1228   :  { %v3031_v42 = vpop.xlane.xlu0 %3030 }
0x1229   :  { %v3054_v34 = vadd.f32 1e-06, %v3048_v38  ;;  %v3047_v48 = vmul.f32 0.03125, %v3031_v42 }
0x122b   :  { %7321 = vrsqrt.f32 %v3054_v34  ;;  %v3053_v2 = vadd.f32 1e-06, %v3047_v48 }
0x122d   :  { %7323 = vrsqrt.f32 %v3053_v2 }
0x122f   :  { %v3040_v16 = vpop.xlane.xlu1 %3039 }
0x1230   :  { %v3050_v49 = vmul.f32 0.03125, %v3040_v16 }
0x1231   :  { %v3037_v44 = vpop.xlane.xlu0 %3036 }
0x1232   :  { %v3056_v56 = vadd.f32 1e-06, %v3050_v49  ;;  %v3049_v27 = vmul.f32 0.03125, %v3037_v44 }
0x1234   :  { %7325 = vrsqrt.f32 %v3056_v56  ;;  %v3055_v45 = vadd.f32 1e-06, %v3049_v27 }
0x1236   :  { %7327 = vrsqrt.f32 %v3055_v45 }
0x1238   :  { %v7322_v53 = vpop.eup %7321  ;;  %v3046_v57 = vpop.xlane.xlu1 %3045 }
0x1239   :  { %v3066_v37 = vmul.f32 %v7322_v53, %v8576_v7  ;;  %v3052_v0 = vmul.f32 0.03125, %v3046_v57 }
0x123a   :  { %v7324_v32 = vpop.eup %7323  ;;  %v3043_v40 = vpop.xlane.xlu0 %3042 }
0x123b   :  { %v3058_v1 = vadd.f32 1e-06, %v3052_v0  ;;  %v3051_v19 = vmul.f32 0.03125, %v3043_v40  ;;  %v3065_v13 = vmul.f32 %v7324_v32, %v8579_v4  ;;  %v3078_v21 = vmul.f32 %v6026_v31, %v3066_v37  ;;  %v8736_v32 = vld [vmem:[%s9482_s24] ss:$0 sm:$0xff] }
0x123d   :  { %7329 = vrsqrt.f32 %v3058_v1  ;;  %v3057_v55 = vadd.f32 1e-06, %v3051_v19  ;;  %v3077_v6 = vmul.f32 %v6026_v31, %v3065_v13  ;;  %v3090_v47 = vadd.f32 %v6027_v60, %v3078_v21 }
0x123f   :  { %7331 = vrsqrt.f32 %v3057_v55  ;;  %v3089_v7 = vadd.f32 %v6027_v60, %v3077_v6 }
0x1241   :  { %v7326_v23 = vpop.eup %7325  ;;  %6836 = vmatprep.mubr.msk.f32.mxu0 %vm204_vm1, %v3089_v7 }
0x1242   :  { %6837 = vmatmul.mubr.msk.f32.vlgmr.msra.gmra.mxu0 %vm204_vm1, %v3090_v47  ;;  %v3068_v8 = vmul.f32 %v7326_v23, %v8588_v39 }
0x1243   :  { %v7328_v3 = vpop.eup %7327 }
0x1244   :  { %v3067_v4 = vmul.f32 %v7328_v3, %v8591_v9  ;;  %v3080_v5 = vmul.f32 %v6026_v31, %v3068_v8  ;;  %v6033_v9 = vld [vmem:[%s9430_s7 + $0x1] ss:$0 sm:$0xff]  ;;  %s9483_s7 = smov 88  }
0x1246   :  { %v3079_v33 = vmul.f32 %v6026_v31, %v3067_v4  ;;  %v3092_v11 = vadd.f32 %v6027_v60, %v3080_v5 }
0x1248   :  { %v3091_v36 = vadd.f32 %v6027_v60, %v3079_v33 }
0x124a   :  { %v7330_v12 = vpop.eup %7329  ;;  %6839 = vmatprep.mubr.msk.f32.mxu0 %vm204_vm1, %v3091_v36 }
0x124b   :  { %6840 = vmatmul.mubr.msk.f32.gmra.mxu0 %vm204_vm1, %v3092_v11  ;;  %v3070_v46 = vmul.f32 %v7330_v12, %v8600_v22 }
0x124c   :  { %v7332_v15 = vpop.eup %7331 }
0x124d   :  { %v3069_v20 = vmul.f32 %v7332_v15, %v8603_v26  ;;  %v3082_v10 = vmul.f32 %v6026_v31, %v3070_v46 }
0x124f   :  { %v3081_v25 = vmul.f32 %v6026_v31, %v3069_v20  ;;  %v3094_v18 = vadd.f32 %v6027_v60, %v3082_v10 }
0x1251   :  { %v3093_v39 = vadd.f32 %v6027_v60, %v3081_v25 }
0x1253   :  { %6842 = vmatprep.mubr.msk.f32.mxu0 %vm204_vm1, %v3093_v39 }
0x1254   :  { %6843 = vmatmul.mubr.msk.f32.gmra.mxu0 %vm204_vm1, %v3094_v18 }
0x1255   :  { %6851 = vmatprep.mubr.msk.f32.mxu0 %vm7504_vm2, %v7502_v54 }
0x1302   :  { %v6838_v17 = vpop.f32.mrf.mxu0 }
0x1303   :  { %v8647_v22 = vadd.f32 %v6838_v17, %v6033_v9 }
0x1304   :  { %v3192_v24 = vpop.f32.mrf.mxu0 }
0x1305   :  { %3226 = vrot.lane.b32.xlu1 %v8647_v22, %s7503_s22  ;;  %v8651_v26 = vadd.f32 %v6033_v9, %v3192_v24 }
0x1309   :  { %3224 = vrot.lane.b32.xlu1 %v8651_v26, %s7503_s22 }
0x130b   :  { %v6841_v29 = vpop.f32.mrf.mxu0 }
0x130c   :  { %v8665_v43 = vadd.f32 %v6841_v29, %v6033_v9 }
0x130d   :  { %v3202_v30 = vpop.f32.mrf.mxu0 }
0x130e   :  { %v8655_v28 = vadd.f32 %v6033_v9, %v3202_v30 }
0x1310   :  { %3228 = vrot.lane.b32.xlu0 %v8655_v28, %s7503_s22 }
0x1314   :  { %v6844_v41 = vpop.f32.mrf.mxu0 }
0x1315   :  { %v8659_v14 = vadd.f32 %v6844_v41, %v6033_v9 }
0x1316   :  { %v3212_v59 = vpop.f32.mrf.mxu0 }
0x1317   :  { %v8661_v35 = vadd.f32 %v6033_v9, %v3212_v59  ;;  %3329 = vrot.lane.b32.xlu1 %v8659_v14, %s7503_s22 }
0x1319   :  { %3327 = vrot.lane.b32.xlu0 %v8661_v35, %s7503_s22 }
0x131b   :  { %3325 = vrot.lane.b32.xlu1 %v8665_v43, %s7503_s22 }
0x131d   :  { %3505 = vrot.lane.b32.xlu0 %v8655_v28, %s7505_s2 }
0x131f   :  { %3503 = vrot.lane.b32.xlu1 %v8647_v22, %s7505_s2 }
0x1321   :  { %3603 = vrot.lane.b32.xlu0 %v8659_v14, %s7505_s2 }
0x1323   :  { %3501 = vrot.lane.b32.xlu1 %v8651_v26, %s7505_s2 }
0x1325   :  { %3601 = vrot.lane.b32.xlu0 %v8661_v35, %s7505_s2 }
0x1327   :  { %3707 = vrot.lane.b32.xlu1 %v8655_v28, %s9483_s7 }
0x132b   :  { %3705 = vrot.lane.b32.xlu1 %v8647_v22, %s9483_s7 }
0x132f   :  { %3599 = vrot.lane.b32.xlu1 %v8665_v43, %s7505_s2 }
0x1377   :  { %v3227_v62 = vpop.permute.xlu1 %3226 }
0x137b   :  { %v3225_v42 = vpop.permute.xlu1 %3224 }
0x1382   :  { %v3229_v38 = vpop.permute.xlu0 %3228 }
0x1383   :  { %6846 = vmatpush3.xpose.msk.msra.mxu0 %vm441_vm3, %v3229_v38 }
0x1384   :  { %6847 = vmatprep.subr.mxu0 %v7502_v54 }
0x1387   :  { %6848 = vmatpush3.xpose.msk.msra.mxu0 %vm441_vm3, %v3227_v62 }
0x1388   :  { %6849 = vmatprep.subr.mxu0 %v7502_v54 }
0x1389   :  { %v3330_v34 = vpop.permute.xlu1 %3329 }
0x138b   :  { %6850 = vmatpush3.xpose.msk.msra.mxu0 %vm441_vm3, %v3225_v42  ;;  %v3328_v48 = vpop.permute.xlu0 %3327 }
0x138c   :  { %6860 = vmatprep.subr.mxu0 %v7502_v54 }
0x138d   :  { %v3326_v2 = vpop.permute.xlu1 %3325 }
0x138e   :  { %6852 = vmatmul.mubr.msk.f32.vlgmr.msra.gmra.mxu0 %vm441_vm3, %v8651_v26 }
0x138f   :  { %6861 = vmatpush3.xpose.msk.msra.mxu0 %vm441_vm3, %v3330_v34  ;;  %v3506_v16 = vpop.permute.xlu0 %3505  ;;  %6854 = vmatprep.mubr.msk.f32.mxu0 %vm7504_vm2, %v7502_v54 }
0x1390   :  { %6876 = vmatpush3.msra.mxu1 %v3506_v16  ;;  %6862 = vmatprep.subr.mxu0 %v7502_v54 }
0x1391   :  { %v3504_v49 = vpop.permute.xlu1 %3503  ;;  %6877 = vmatprep.subr.mxu1 %v7502_v54 }
0x1392   :  { %6855 = vmatmul.mubr.msk.f32.gmra.mxu0 %vm441_vm3, %v8647_v22  ;;  %6878 = vmatpush3.msra.mxu1 %v3504_v49 }
0x1393   :  { %6863 = vmatpush3.xpose.msk.msra.mxu0 %vm441_vm3, %v3328_v48  ;;  %6857 = vmatprep.mubr.msk.f32.mxu0 %vm7504_vm2, %v7502_v54  ;;  %v3604_v56 = vpop.permute.xlu0 %3603 }
0x1394   :  { %6879 = vmatprep.subr.mxu1 %v7502_v54  ;;  %6864 = vmatprep.subr.mxu0 %v7502_v54 }
0x1395   :  { %v3502_v44 = vpop.permute.xlu1 %3501 }
0x1396   :  { %6858 = vmatmul.mubr.msk.f32.gmra.mxu0 %vm441_vm3, %v8655_v28  ;;  %6880 = vmatpush3.msra.mxu1 %v3502_v44 }
0x1397   :  { %6865 = vmatpush3.xpose.msk.msra.mxu0 %vm441_vm3, %v3326_v2  ;;  %6866 = vmatprep.mubr.msk.f32.mxu0 %vm7504_vm2, %v7502_v54  ;;  %v3602_v45 = vpop.permute.xlu0 %3601 }
0x1398   :  { %6890 = vmatprep.subr.mxu0 %v7502_v54  ;;  %6905 = vmatprep.subr.mxu1 %v7502_v54 }
0x1399   :  { %v8714_v27 = vpop.permute.xlu1 %3707 }
0x139a   :  { %6867 = vmatmul.mubr.msk.f32.vlgmr.msra.gmra.mxu0 %vm441_vm3, %v8665_v43 }
0x139b   :  { %6891 = vmatpush3.msra.mxu0 %v3604_v56  ;;  %6869 = vmatprep.mubr.msk.f32.mxu0 %vm7504_vm2, %v7502_v54 }
0x139c   :  { %6892 = vmatprep.subr.mxu0 %v7502_v54 }
0x139d   :  { %v8721_v53 = vpop.permute.xlu1 %3705  ;;  %6893 = vmatpush3.msra.mxu0 %v3602_v45 }
0x139e   :  { %6870 = vmatmul.mubr.msk.f32.gmra.mxu0 %vm441_vm3, %v8661_v35  ;;  %6894 = vmatprep.subr.mxu0 %v7502_v54 }
0x139f   :  { %6872 = vmatprep.mubr.msk.f32.mxu0 %vm7504_vm2, %v7502_v54 }
0x13a1   :  { %v3600_v57 = vpop.permute.xlu1 %3599 }
0x13a2   :  { %6873 = vmatmul.mubr.msk.f32.gmra.mxu0 %vm441_vm3, %v8659_v14 }
0x13a3   :  { %6895 = vmatpush3.msra.mxu0 %v3600_v57  ;;  %6896 = vmatprep.mubr.msk.f32.mxu0 %vm7504_vm2, %v7502_v54 }
0x13a4   :  { %6920 = vmatprep.subr.mxu0 %v7502_v54 }
0x144e   :  { %v3308_v37 = vpop.f32.mrf.mxu0 }
0x144f   :  { %v3423_v0 = vmul.f32 0.35355338, %v3308_v37 }
0x1450   :  { %v6853_v31 = vpop.f32.mrf.mxu0 }
0x1451   :  { %v3429_v40 = vadd.f32 %v8736_v32, %v3423_v0 }
0x1452   :  { %v3313_v1 = vpop.f32.mrf.mxu0 }
0x1453   :  { %v3424_v19 = vmul.f32 0.35355338, %v3313_v1  ;;  %v3435_v13 = vsel %vm653_vm4, %v3429_v40, -inf }
0x1454   :  { %3436 = vmax.xlane.f32.xlu0 %v3435_v13  ;;  %v6856_v21 = vpop.f32.mrf.mxu0 }
0x1455   :  { %v3430_v55 = vadd.f32 %v8736_v32, %v3424_v19 }
0x1456   :  { %v3318_v60 = vpop.f32.mrf.mxu0 }
0x1457   :  { %v3425_v6 = vmul.f32 0.35355338, %v3318_v60  ;;  %v3438_v7 = vsel %vm653_vm4, %v3430_v55, -inf }
0x1458   :  { %3439 = vmax.xlane.f32.xlu1 %v3438_v7  ;;  %v6859_v47 = vpop.f32.mrf.mxu0 }
0x1459   :  { %v3431_v23 = vadd.f32 %v8736_v32, %v3425_v6 }
0x145a   :  { %v3409_v8 = vpop.f32.mrf.mxu0 }
0x145b   :  { %v3426_v3 = vmul.f32 0.35355338, %v3409_v8  ;;  %v3441_v4 = vsel %vm653_vm4, %v3431_v23, -inf }
0x145c   :  { %3442 = vmax.xlane.f32.xlu0 %v3441_v4  ;;  %v6868_v5 = vpop.f32.mrf.mxu0 }
0x145d   :  { %v3432_v33 = vadd.f32 %v8736_v32, %v3426_v3 }
0x145e   :  { %v3414_v36 = vpop.f32.mrf.mxu0 }
0x145f   :  { %v3427_v11 = vmul.f32 0.35355338, %v3414_v36  ;;  %v3444_v12 = vsel %vm653_vm4, %v3432_v33, -inf }
0x1460   :  { %3445 = vmax.xlane.f32.xlu0 %v3444_v12  ;;  %v6871_v46 = vpop.f32.mrf.mxu0 }
0x1461   :  { %v3433_v15 = vadd.f32 %v8736_v32, %v3427_v11 }
0x1462   :  { %v3419_v20 = vpop.f32.mrf.mxu0 }
0x1463   :  { %v3447_v10 = vsel %vm653_vm4, %v3433_v15, -inf  ;;  %v3428_v39 = vmul.f32 0.35355338, %v3419_v20 }
0x1464   :  { %3448 = vmax.xlane.f32.xlu0 %v3447_v10  ;;  %v6874_v25 = vpop.f32.mrf.mxu0 }
0x1465   :  { %v3434_v18 = vadd.f32 %v8736_v32, %v3428_v39 }
0x1467   :  { %v3450_v9 = vsel %vm653_vm4, %v3434_v18, -inf }
0x1469   :  { %3811 = vrot.lane.b32.xlu1 %v8659_v14, %s9483_s7 }
0x147a   :  { %3703 = vrot.lane.b32.xlu0 %v8651_v26, %s9483_s7 }
0x148d   :  { %3451 = vmax.xlane.f32.xlu1 %v3450_v9 }
0x14dd   :  { %v3437_v17 = vpop.xlane.xlu0 %3436 }
0x14de   :  { %v3453_v24 = vsub.f32 %v3429_v40, %v3437_v17 }
0x14e0   :  { %v3459_v29 = vmul.f32 1.442695, %v3453_v24 }
0x14e1   :  { %v3440_v30 = vpop.xlane.xlu1 %3439 }
0x14e2   :  { %7333 = vpow2.f32 %v3459_v29  ;;  %v3454_v41 = vsub.f32 %v3430_v55, %v3440_v30 }
0x14e4   :  { %v3461_v59 = vmul.f32 1.442695, %v3454_v41 }
0x14e5   :  { %v3443_v62 = vpop.xlane.xlu0 %3442  ;;  %v8771_v21 = vpop.permute.xlu1 %3811 }
0x14e6   :  { %7335 = vpow2.f32 %v3461_v59  ;;  %v3455_v38 = vsub.f32 %v3431_v23, %v3443_v62 }
0x14e8   :  { %v3463_v42 = vmul.f32 1.442695, %v3455_v38 }
0x14e9   :  { %v3446_v56 = vpop.xlane.xlu0 %3445 }
0x14ea   :  { %7337 = vpow2.f32 %v3463_v42  ;;  %v3456_v45 = vsub.f32 %v3432_v33, %v3446_v56 }
0x14ec   :  { %v3465_v37 = vmul.f32 1.442695, %v3456_v45 }
0x14ed   :  { %v3449_v57 = vpop.xlane.xlu0 %3448 }
0x14ee   :  { %v3457_v0 = vsub.f32 %v3433_v15, %v3449_v57  ;;  %7339 = vpow2.f32 %v3465_v37 }
0x14ef   :  { %v7334_v34 = vpop.eup %7333 }
0x14f0   :  { %v3471_v48 = vsel %vm653_vm4, %v7334_v34, 0.0  ;;  %v3467_v31 = vmul.f32 1.442695, %v3457_v0 }
0x14f1   :  { %3472 = vadd.xlane.f32.xlu0 %v3471_v48  ;;  %v3704_v23 = vpop.permute.xlu0 %3703 }
0x14f2   :  { %7341 = vpow2.f32 %v3467_v31 }
0x14f3   :  { %v7336_v2 = vpop.eup %7335 }
0x14f4   :  { %v3474_v16 = vsel %vm653_vm4, %v7336_v2, 0.0 }
0x14f5   :  { %3475 = vadd.xlane.f32.xlu1 %v3474_v16 }
0x14f7   :  { %v7338_v49 = vpop.eup %7337 }
0x14f8   :  { %v3477_v44 = vsel %vm653_vm4, %v7338_v49, 0.0 }
0x14f9   :  { %3478 = vadd.xlane.f32.xlu0 %v3477_v44 }
0x14fb   :  { %v8761_v40 = vpop.eup %7339 }
0x14fc   :  { %v3480_v1 = vsel %vm653_vm4, %v8761_v40, 0.0 }
0x14ff   :  { %v8765_v19 = vpop.eup %7341 }
0x1500   :  { %v3483_v13 = vsel %vm653_vm4, %v8765_v19, 0.0 }
0x1506   :  { %3809 = vrot.lane.b32.xlu1 %v8661_v35, %s9483_s7 }
0x150f   :  { %3697 = vrot.lane.b32.xlu0 %v8651_v26, %s9484_s29 }
0x1516   :  { %v3452_v55 = vpop.xlane.xlu1 %3451 }
0x1517   :  { %v3458_v60 = vsub.f32 %v3434_v18, %v3452_v55 }
0x1519   :  { %v3469_v6 = vmul.f32 1.442695, %v3458_v60 }
0x151b   :  { %7343 = vpow2.f32 %v3469_v6 }
0x1528   :  { %v8785_v7 = vpop.eup %7343 }
0x1529   :  { %v3486_v47 = vsel %vm653_vm4, %v8785_v7, 0.0 }
0x152a   :  { %3481 = vadd.xlane.f32.xlu1 %v3480_v1 }
0x152e   :  { %3484 = vadd.xlane.f32.xlu0 %v3483_v13 }
0x153b   :  { %3807 = vrot.lane.b32.xlu1 %v8665_v43, %s9483_s7 }
0x1544   :  { %3699 = vrot.lane.b32.xlu0 %v8647_v22, %s9484_s29 }
0x1548   :  { %3701 = vrot.lane.b32.xlu0 %v8655_v28, %s9484_s29 }
0x154c   :  { %3803 = vrot.lane.b32.xlu0 %v8661_v35, %s9484_s29 }
0x1550   :  { %3987 = vrot.lane.b32.xlu0 %v8655_v28, %s9485_s0 }
0x1554   :  { %4085 = vrot.lane.b32.xlu0 %v8659_v14, %s9485_s0 }
0x1558   :  { %4083 = vrot.lane.b32.xlu0 %v8661_v35, %s9485_s0 }
0x155f   :  { %3487 = vadd.xlane.f32.xlu1 %v3486_v47 }
0x1570   :  { %3801 = vrot.lane.b32.xlu1 %v8665_v43, %s9484_s29 }
0x1574   :  { %3805 = vrot.lane.b32.xlu1 %v8659_v14, %s9484_s29 }
0x1578   :  { %3985 = vrot.lane.b32.xlu1 %v8647_v22, %s9485_s0 }
0x157a   :  { %v3473_v8 = vpop.xlane.xlu0 %3472 }
0x157b   :  { %7345 = vrcp.f32 %v3473_v8 }
0x157c   :  { %3983 = vrot.lane.b32.xlu1 %v8651_v26, %s9485_s0 }
0x157e   :  { %v3476_v3 = vpop.xlane.xlu1 %3475 }
0x157f   :  { %7347 = vrcp.f32 %v3476_v3 }
0x1580   :  { %4189 = vrot.lane.b32.xlu1 %v8655_v28, %s9486_s23 }
0x1582   :  { %v3479_v4 = vpop.xlane.xlu0 %3478 }
0x1583   :  { %7349 = vrcp.f32 %v3479_v4 }
0x1584   :  { %4187 = vrot.lane.b32.xlu1 %v8647_v22, %s9486_s23 }
0x1588   :  { %v7346_v5 = vpop.eup %7345  ;;  %4081 = vrot.lane.b32.xlu1 %v8665_v43, %s9485_s0 }
0x1589   :  { %v3495_v33 = vmul.f32 %v7346_v5, %v7334_v34 }
0x158b   :  { %6882 = vmatmul.mubr.msk.f32.vlgmr.msra.gmra.mxu1 %vm653_vm4, %v3495_v33 }
0x158c   :  { %v7348_v36 = vpop.eup %7347  ;;  %6906 = vmatpush3.xpose.msk.msra.mxu1 %vm441_vm3, %v8714_v27  ;;  %6884 = vmatprep.mubr.msk.f32.mxu1 %vm7504_vm2, %v7502_v54  ;;  %v3698_v27 = vpop.permute.xlu0 %3697 }
0x158d   :  { %6907 = vmatprep.subr.mxu1 %v7502_v54  ;;  %v3496_v11 = vmul.f32 %v7348_v36, %v7336_v2 }
0x158f   :  { %6885 = vmatmul.mubr.msk.f32.gmra.mxu1 %vm653_vm4, %v3496_v11 }
0x1590   :  { %v7350_v12 = vpop.eup %7349  ;;  %6908 = vmatpush3.xpose.msk.msra.mxu1 %vm441_vm3, %v8721_v53  ;;  %6887 = vmatprep.mubr.msk.f32.mxu1 %vm7504_vm2, %v7502_v54  ;;  %v3810_v53 = vpop.permute.xlu1 %3809 }
0x1591   :  { %6909 = vmatprep.subr.mxu1 %v7502_v54  ;;  %v3497_v46 = vmul.f32 %v7350_v12, %v7338_v49 }
0x1593   :  { %6888 = vmatmul.mubr.msk.f32.gmra.mxu1 %vm653_vm4, %v3497_v46 }
0x1594   :  { %6910 = vmatpush3.xpose.msk.msra.mxu1 %vm441_vm3, %v3704_v23  ;;  %6911 = vmatprep.mubr.msk.f32.mxu1 %vm7504_vm2, %v7502_v54 }
0x1595   :  { %6935 = vmatprep.subr.mxu1 %v7502_v54 }
0x1597   :  { %6912 = vmatmul.mubr.msk.f32.vlgmr.msra.gmra.mxu1 %vm441_vm3, %v3698_v27 }
0x1598   :  { %6914 = vmatprep.mubr.msk.f32.mxu1 %vm7504_vm2, %v7502_v54 }
0x15b3   :  { %v3482_v15 = vpop.xlane.xlu1 %3481 }
0x15b4   :  { %7351 = vrcp.f32 %v3482_v15 }
0x15b7   :  { %v3485_v20 = vpop.xlane.xlu0 %3484  ;;  %v3808_v30 = vpop.permute.xlu1 %3807 }
0x15b8   :  { %7353 = vrcp.f32 %v3485_v20 }
0x15bb   :  { %v3700_v10 = vpop.permute.xlu0 %3699 }
0x15bc   :  { %6915 = vmatmul.mubr.msk.f32.gmra.mxu1 %vm441_vm3, %v3700_v10 }
0x15bd   :  { %6917 = vmatprep.mubr.msk.f32.mxu1 %vm7504_vm2, %v7502_v54 }
0x15bf   :  { %v3702_v25 = vpop.permute.xlu0 %3701 }
0x15c0   :  { %6918 = vmatmul.mubr.msk.f32.gmra.mxu1 %vm441_vm3, %v3702_v25 }
0x15c1   :  { %v7352_v39 = vpop.eup %7351  ;;  %6941 = vmatprep.mubr.msk.f32.mxu1 %vm7504_vm2, %v7502_v54 }
0x15c2   :  { %v3498_v18 = vmul.f32 %v7352_v39, %v8761_v40 }
0x15c3   :  { %v3804_v9 = vpop.permute.xlu0 %3803 }
0x15c4   :  { %6897 = vmatmul.mubr.msk.f32.vlgmr.msra.gmra.mxu0 %vm653_vm4, %v3498_v18 }
0x15c5   :  { %v7354_v17 = vpop.eup %7353  ;;  %6921 = vmatpush3.xpose.msk.msra.mxu0 %vm441_vm3, %v8771_v21  ;;  %6899 = vmatprep.mubr.msk.f32.mxu0 %vm7504_vm2, %v7502_v54 }
0x15c6   :  { %6922 = vmatprep.subr.mxu0 %v7502_v54  ;;  %v3499_v24 = vmul.f32 %v7354_v17, %v8765_v19 }
0x15c7   :  { %v3988_v29 = vpop.permute.xlu0 %3987 }
0x15c8   :  { %6900 = vmatmul.mubr.msk.f32.gmra.mxu0 %vm653_vm4, %v3499_v24  ;;  %6936 = vmatpush3.msra.mxu1 %v3988_v29 }
0x15c9   :  { %6923 = vmatpush3.xpose.msk.msra.mxu0 %vm441_vm3, %v3810_v53  ;;  %6937 = vmatprep.subr.mxu1 %v7502_v54 }
0x15ca   :  { %6924 = vmatprep.subr.mxu0 %v7502_v54  ;;  %6902 = vmatprep.mubr.msk.f32.mxu0 %vm7504_vm2, %v7502_v54 }
0x15cb   :  { %v4086_v2 = vpop.permute.xlu0 %4085 }
0x15cd   :  { %6925 = vmatpush3.xpose.msk.msra.mxu0 %vm441_vm3, %v3808_v30 }
0x15ce   :  { %6950 = vmatprep.subr.mxu0 %v7502_v54 }
0x15cf   :  { %v4084_v49 = vpop.permute.xlu0 %4083 }
0x15e8   :  { %v3488_v41 = vpop.xlane.xlu1 %3487 }
0x15e9   :  { %7355 = vrcp.f32 %v3488_v41 }
0x15ec   :  { %v3802_v59 = vpop.permute.xlu1 %3801 }
0x15f0   :  { %v3806_v62 = vpop.permute.xlu1 %3805 }
0x15f4   :  { %v3986_v38 = vpop.permute.xlu1 %3985 }
0x15f5   :  { %6938 = vmatpush3.msra.mxu1 %v3986_v38 }
0x15f6   :  { %v7356_v42 = vpop.eup %7355  ;;  %6939 = vmatprep.subr.mxu1 %v7502_v54 }
0x15f7   :  { %v3500_v34 = vmul.f32 %v7356_v42, %v8785_v7 }
0x15f8   :  { %v3984_v48 = vpop.permute.xlu1 %3983 }
0x15f9   :  { %6903 = vmatmul.mubr.msk.f32.gmra.mxu0 %vm653_vm4, %v3500_v34  ;;  %6940 = vmatpush3.msra.mxu1 %v3984_v48 }
0x15fa   :  { %6926 = vmatprep.mubr.msk.f32.mxu0 %vm7504_vm2, %v7502_v54  ;;  %6965 = vmatprep.subr.mxu1 %v7502_v54 }
0x15fc   :  { %v8851_v16 = vpop.permute.xlu1 %4189 }
0x15fd   :  { %6927 = vmatmul.mubr.msk.f32.vlgmr.msra.gmra.mxu0 %vm441_vm3, %v3802_v59 }
0x15fe   :  { %6951 = vmatpush3.msra.mxu0 %v4086_v2  ;;  %6929 = vmatprep.mubr.msk.f32.mxu0 %vm7504_vm2, %v7502_v54 }
0x15ff   :  { %6952 = vmatprep.subr.mxu0 %v7502_v54 }
0x1600   :  { %6953 = vmatpush3.msra.mxu0 %v4084_v49  ;;  %v8857_v44 = vpop.permute.xlu1 %4187 }
0x1601   :  { %6930 = vmatmul.mubr.msk.f32.gmra.mxu0 %vm441_vm3, %v3804_v9  ;;  %6954 = vmatprep.subr.mxu0 %v7502_v54 }
0x1602   :  { %6932 = vmatprep.mubr.msk.f32.mxu0 %vm7504_vm2, %v7502_v54 }
0x1604   :  { %v4082_v56 = vpop.permute.xlu1 %4081 }
0x1605   :  { %6933 = vmatmul.mubr.msk.f32.gmra.mxu0 %vm441_vm3, %v3806_v62 }
0x1606   :  { %6955 = vmatpush3.msra.mxu0 %v4082_v56  ;;  %6956 = vmatprep.mubr.msk.f32.mxu0 %vm7504_vm2, %v7502_v54 }
0x1607   :  { %6980 = vmatprep.subr.mxu0 %v7502_v54 }
0x164b   :  { %v8867_v45 = vpop.f32.mrf.mxu1 }
0x164d   :  { %v6883_v57 = vpop.f32.mrf.mxu1 }
0x164f   :  { %v8869_v37 = vpop.f32.mrf.mxu1 }
0x1651   :  { %v6886_v0 = vpop.f32.mrf.mxu1 }
0x1653   :  { %v8871_v31 = vpop.f32.mrf.mxu1 }
0x1655   :  { %v6889_v40 = vpop.f32.mrf.mxu1 }
0x1657   :  { %v3787_v1 = vpop.f32.mrf.mxu1 }
0x1658   :  { %v3905_v19 = vmul.f32 0.35355338, %v3787_v1 }
0x1659   :  { %v6913_v13 = vpop.f32.mrf.mxu1 }
0x165a   :  { %v3911_v21 = vadd.f32 %v8736_v32, %v3905_v19 }
0x165c   :  { %v3917_v55 = vsel %vm653_vm4, %v3911_v21, -inf }
0x165d   :  { %3918 = vmax.xlane.f32.xlu0 %v3917_v55 }
0x167c   :  { %v3792_v60 = vpop.f32.mrf.mxu1 }
0x167d   :  { %v3906_v6 = vmul.f32 0.35355338, %v3792_v60 }
0x167e   :  { %v6916_v7 = vpop.f32.mrf.mxu1 }
0x167f   :  { %v3912_v47 = vadd.f32 %v8736_v32, %v3906_v6 }
0x1680   :  { %v3797_v23 = vpop.f32.mrf.mxu1 }
0x1681   :  { %v3907_v8 = vmul.f32 0.35355338, %v3797_v23  ;;  %v3920_v3 = vsel %vm653_vm4, %v3912_v47, -inf }
0x1682   :  { %3921 = vmax.xlane.f32.xlu1 %v3920_v3  ;;  %v6919_v4 = vpop.f32.mrf.mxu1 }
0x1683   :  { %v3913_v5 = vadd.f32 %v8736_v32, %v3907_v8 }
0x1684   :  { %v8878_v33 = vpop.f32.mrf.mxu0 }
0x1685   :  { %v3923_v36 = vsel %vm653_vm4, %v3913_v5, -inf }
0x1686   :  { %v6898_v11 = vpop.f32.mrf.mxu0  ;;  %3924 = vmax.xlane.f32.xlu0 %v3923_v36 }
0x1688   :  { %v8881_v12 = vpop.f32.mrf.mxu0 }
0x168a   :  { %v6901_v46 = vpop.f32.mrf.mxu0 }
0x1693   :  { %4293 = vrot.lane.b32.xlu1 %v8659_v14, %s9486_s23 }
0x16b9   :  { %v8885_v27 = vpop.f32.mrf.mxu0 }
0x16bb   :  { %v6904_v53 = vpop.f32.mrf.mxu0 }
0x16bd   :  { %v3891_v15 = vpop.f32.mrf.mxu0 }
0x16be   :  { %v3908_v20 = vmul.f32 0.35355338, %v3891_v15 }
0x16bf   :  { %v6928_v10 = vpop.f32.mrf.mxu0 }
0x16c0   :  { %v3914_v25 = vadd.f32 %v8736_v32, %v3908_v20 }
0x16c1   :  { %v3896_v39 = vpop.f32.mrf.mxu0 }
0x16c2   :  { %v3909_v18 = vmul.f32 0.35355338, %v3896_v39  ;;  %v3926_v9 = vsel %vm653_vm4, %v3914_v25, -inf }
0x16c3   :  { %3927 = vmax.xlane.f32.xlu0 %v3926_v9  ;;  %v6931_v17 = vpop.f32.mrf.mxu0 }
0x16c4   :  { %v3915_v24 = vadd.f32 %v8736_v32, %v3909_v18 }
0x16c5   :  { %v3901_v29 = vpop.f32.mrf.mxu0 }
0x16c6   :  { %v3910_v30 = vmul.f32 0.35355338, %v3901_v29  ;;  %v3929_v41 = vsel %vm653_vm4, %v3915_v24, -inf }
0x16c7   :  { %3930 = vmax.xlane.f32.xlu0 %v3929_v41  ;;  %v6934_v59 = vpop.f32.mrf.mxu0 }
0x16c8   :  { %v3916_v62 = vadd.f32 %v8736_v32, %v3910_v30 }
0x16ca   :  { %v3932_v38 = vsel %vm653_vm4, %v3916_v62, -inf }
0x16cb   :  { %3933 = vmax.xlane.f32.xlu1 %v3932_v38 }
0x16dd   :  { %4185 = vrot.lane.b32.xlu0 %v8651_v26, %s9486_s23 }
0x16e6   :  { %v3919_v42 = vpop.xlane.xlu0 %3918 }
0x16e7   :  { %v3935_v34 = vsub.f32 %v3911_v21, %v3919_v42 }
0x16e9   :  { %v3941_v48 = vmul.f32 1.442695, %v3935_v34 }
0x16eb   :  { %7357 = vpow2.f32 %v3941_v48 }
0x16f8   :  { %v7358_v2 = vpop.eup %7357 }
0x16f9   :  { %v3953_v49 = vsel %vm653_vm4, %v7358_v2, 0.0 }
0x16fc   :  { %3954 = vadd.xlane.f32.xlu0 %v3953_v49 }
0x170b   :  { %v3922_v56 = vpop.xlane.xlu1 %3921 }
0x170c   :  { %v3936_v57 = vsub.f32 %v3912_v47, %v3922_v56 }
0x170e   :  { %v3943_v0 = vmul.f32 1.442695, %v3936_v57 }
0x170f   :  { %v3925_v40 = vpop.xlane.xlu0 %3924  ;;  %v8912_v46 = vpop.permute.xlu1 %4293 }
0x1710   :  { %7359 = vpow2.f32 %v3943_v0  ;;  %v3937_v1 = vsub.f32 %v3913_v5, %v3925_v40 }
0x1712   :  { %v3945_v19 = vmul.f32 1.442695, %v3937_v1 }
0x1714   :  { %7361 = vpow2.f32 %v3945_v19 }
0x171d   :  { %v7360_v13 = vpop.eup %7359 }
0x171e   :  { %v3956_v55 = vsel %vm653_vm4, %v7360_v13, 0.0 }
0x171f   :  { %3957 = vadd.xlane.f32.xlu1 %v3956_v55 }
0x1721   :  { %v7362_v60 = vpop.eup %7361 }
0x1722   :  { %v3959_v21 = vsel %vm653_vm4, %v7362_v60, 0.0 }
0x1723   :  { %3960 = vadd.xlane.f32.xlu0 %v3959_v21 }
0x1730   :  { %4291 = vrot.lane.b32.xlu1 %v8661_v35, %s9486_s23 }
0x1739   :  { %4179 = vrot.lane.b32.xlu0 %v8651_v26, %s9487_s25 }
0x174c   :  { %v3928_v6 = vpop.xlane.xlu0 %3927 }
0x174d   :  { %v3938_v7 = vsub.f32 %v3914_v25, %v3928_v6 }
0x174f   :  { %v3947_v47 = vmul.f32 1.442695, %v3938_v7 }
0x1750   :  { %v3931_v23 = vpop.xlane.xlu0 %3930 }
0x1751   :  { %7363 = vpow2.f32 %v3947_v47  ;;  %v3939_v8 = vsub.f32 %v3915_v24, %v3931_v23 }
0x1753   :  { %v3949_v3 = vmul.f32 1.442695, %v3939_v8 }
0x1754   :  { %v3934_v53 = vpop.xlane.xlu1 %3933  ;;  %v4186_v10 = vpop.permute.xlu0 %4185 }
0x1755   :  { %7365 = vpow2.f32 %v3949_v3  ;;  %v3940_v15 = vsub.f32 %v3916_v62, %v3934_v53 }
0x1757   :  { %v3951_v20 = vmul.f32 1.442695, %v3940_v15 }
0x1759   :  { %7367 = vpow2.f32 %v3951_v20 }
0x175e   :  { %v8902_v4 = vpop.eup %7363 }
0x175f   :  { %v3962_v5 = vsel %vm653_vm4, %v8902_v4, 0.0 }
0x1760   :  { %3963 = vadd.xlane.f32.xlu1 %v3962_v5 }
0x1762   :  { %v8906_v36 = vpop.eup %7365 }
0x1763   :  { %v3965_v11 = vsel %vm653_vm4, %v8906_v36, 0.0 }
0x1764   :  { %3966 = vadd.xlane.f32.xlu0 %v3965_v11 }
0x1766   :  { %v8926_v39 = vpop.eup %7367 }
0x1767   :  { %v3968_v17 = vsel %vm653_vm4, %v8926_v39, 0.0 }
0x1771   :  { %4289 = vrot.lane.b32.xlu1 %v8665_v43, %s9486_s23 }
0x177a   :  { %4181 = vrot.lane.b32.xlu0 %v8647_v22, %s9487_s25 }
0x177e   :  { %4183 = vrot.lane.b32.xlu0 %v8655_v28, %s9487_s25 }
0x1782   :  { %4285 = vrot.lane.b32.xlu0 %v8661_v35, %s9487_s25 }
0x1785   :  { %v3955_v25 = vpop.xlane.xlu0 %3954 }
0x1786   :  { %7369 = vrcp.f32 %v3955_v25  ;;  %4469 = vrot.lane.b32.xlu0 %v8655_v28, %s9488_s27 }
0x178a   :  { %4567 = vrot.lane.b32.xlu0 %v8659_v14, %s9488_s27 }
0x178e   :  { %4565 = vrot.lane.b32.xlu0 %v8661_v35, %s9488_s27 }
0x1793   :  { %v7370_v18 = vpop.eup %7369 }
0x1794   :  { %v3977_v9 = vmul.f32 %v7370_v18, %v7358_v2 }
0x1795   :  { %3969 = vadd.xlane.f32.xlu1 %v3968_v17 }
0x1796   :  { %6942 = vmatmul.mubr.msk.f32.vlgmr.msra.gmra.mxu1 %vm653_vm4, %v3977_v9 }
0x1797   :  { %6966 = vmatpush3.xpose.msk.msra.mxu1 %vm441_vm3, %v8851_v16  ;;  %6944 = vmatprep.mubr.msk.f32.mxu1 %vm7504_vm2, %v7502_v54 }
0x1798   :  { %6967 = vmatprep.subr.mxu1 %v7502_v54 }
0x179b   :  { %6968 = vmatpush3.xpose.msk.msra.mxu1 %vm441_vm3, %v8857_v44 }
0x179c   :  { %6969 = vmatprep.subr.mxu1 %v7502_v54 }
0x179f   :  { %6970 = vmatpush3.xpose.msk.msra.mxu1 %vm441_vm3, %v4186_v10 }
0x17a0   :  { %6995 = vmatprep.subr.mxu1 %v7502_v54 }
0x17a6   :  { %4283 = vrot.lane.b32.xlu1 %v8665_v43, %s9487_s25 }
0x17a8   :  { %v3958_v24 = vpop.xlane.xlu1 %3957 }
0x17a9   :  { %7371 = vrcp.f32 %v3958_v24 }
0x17aa   :  { %4287 = vrot.lane.b32.xlu1 %v8659_v14, %s9487_s25 }
0x17ac   :  { %v3961_v16 = vpop.xlane.xlu0 %3960  ;;  %v4292_v62 = vpop.permute.xlu1 %4291 }
0x17ad   :  { %7373 = vrcp.f32 %v3961_v16 }
0x17ae   :  { %4467 = vrot.lane.b32.xlu1 %v8647_v22, %s9488_s27 }
0x17b0   :  { %v4180_v59 = vpop.permute.xlu0 %4179 }
0x17b2   :  { %4465 = vrot.lane.b32.xlu1 %v8651_v26, %s9488_s27 }
0x17b6   :  { %v7372_v44 = vpop.eup %7371  ;;  %4671 = vrot.lane.b32.xlu1 %v8655_v28, %s9489_s6 }
0x17b7   :  { %v3978_v29 = vmul.f32 %v7372_v44, %v7360_v13 }
0x17b9   :  { %6945 = vmatmul.mubr.msk.f32.gmra.mxu1 %vm653_vm4, %v3978_v29 }
0x17ba   :  { %v7374_v30 = vpop.eup %7373  ;;  %4669 = vrot.lane.b32.xlu1 %v8647_v22, %s9489_s6  ;;  %6947 = vmatprep.mubr.msk.f32.mxu1 %vm7504_vm2, %v7502_v54 }
0x17bb   :  { %v3979_v41 = vmul.f32 %v7374_v30, %v7362_v60 }
0x17bd   :  { %6948 = vmatmul.mubr.msk.f32.gmra.mxu1 %vm653_vm4, %v3979_v41 }
0x17be   :  { %4563 = vrot.lane.b32.xlu1 %v8665_v43, %s9488_s27  ;;  %6971 = vmatprep.mubr.msk.f32.mxu1 %vm7504_vm2, %v7502_v54 }
0x17c1   :  { %6972 = vmatmul.mubr.msk.f32.vlgmr.msra.gmra.mxu1 %vm441_vm3, %v4180_v59 }
0x17c2   :  { %6974 = vmatprep.mubr.msk.f32.mxu1 %vm7504_vm2, %v7502_v54 }
0x17e9   :  { %v3964_v38 = vpop.xlane.xlu1 %3963 }
0x17ea   :  { %7375 = vrcp.f32 %v3964_v38 }
0x17ed   :  { %v3967_v42 = vpop.xlane.xlu0 %3966  ;;  %v4290_v1 = vpop.permute.xlu1 %4289 }
0x17ee   :  { %7377 = vrcp.f32 %v3967_v42 }
0x17f1   :  { %v4182_v34 = vpop.permute.xlu0 %4181 }
0x17f2   :  { %6975 = vmatmul.mubr.msk.f32.gmra.mxu1 %vm441_vm3, %v4182_v34 }
0x17f3   :  { %6977 = vmatprep.mubr.msk.f32.mxu1 %vm7504_vm2, %v7502_v54 }
0x17f5   :  { %v4184_v48 = vpop.permute.xlu0 %4183 }
0x17f6   :  { %6978 = vmatmul.mubr.msk.f32.gmra.mxu1 %vm441_vm3, %v4184_v48 }
0x17f7   :  { %v7376_v2 = vpop.eup %7375  ;;  %7001 = vmatprep.mubr.msk.f32.mxu1 %vm7504_vm2, %v7502_v54 }
0x17f8   :  { %v3980_v49 = vmul.f32 %v7376_v2, %v8902_v4 }
0x17f9   :  { %v4286_v56 = vpop.permute.xlu0 %4285 }
0x17fa   :  { %6957 = vmatmul.mubr.msk.f32.vlgmr.msra.gmra.mxu0 %vm653_vm4, %v3980_v49 }
0x17fb   :  { %v7378_v57 = vpop.eup %7377  ;;  %6981 = vmatpush3.xpose.msk.msra.mxu0 %vm441_vm3, %v8912_v46  ;;  %6959 = vmatprep.mubr.msk.f32.mxu0 %vm7504_vm2, %v7502_v54 }
0x17fc   :  { %6982 = vmatprep.subr.mxu0 %v7502_v54  ;;  %v3981_v0 = vmul.f32 %v7378_v57, %v8906_v36 }
0x17fd   :  { %v4470_v40 = vpop.permute.xlu0 %4469 }
0x17fe   :  { %6960 = vmatmul.mubr.msk.f32.gmra.mxu0 %vm653_vm4, %v3981_v0  ;;  %6996 = vmatpush3.msra.mxu1 %v4470_v40 }
0x17ff   :  { %6983 = vmatpush3.xpose.msk.msra.mxu0 %vm441_vm3, %v4292_v62  ;;  %6997 = vmatprep.subr.mxu1 %v7502_v54 }
0x1800   :  { %6984 = vmatprep.subr.mxu0 %v7502_v54  ;;  %6962 = vmatprep.mubr.msk.f32.mxu0 %vm7504_vm2, %v7502_v54 }
0x1801   :  { %v4568_v47 = vpop.permute.xlu0 %4567 }
0x1803   :  { %6985 = vmatpush3.xpose.msk.msra.mxu0 %vm441_vm3, %v4290_v1 }
0x1804   :  { %7010 = vmatprep.subr.mxu0 %v7502_v54 }
0x1805   :  { %v4566_v8 = vpop.permute.xlu0 %4565 }
0x181e   :  { %v3970_v19 = vpop.xlane.xlu1 %3969 }
0x181f   :  { %7379 = vrcp.f32 %v3970_v19 }
0x1822   :  { %v4284_v13 = vpop.permute.xlu1 %4283 }
0x1826   :  { %v4288_v55 = vpop.permute.xlu1 %4287 }
0x182a   :  { %v4468_v60 = vpop.permute.xlu1 %4467 }
0x182b   :  { %6998 = vmatpush3.msra.mxu1 %v4468_v60 }
0x182c   :  { %v7380_v21 = vpop.eup %7379  ;;  %6999 = vmatprep.subr.mxu1 %v7502_v54 }
0x182d   :  { %v3982_v6 = vmul.f32 %v7380_v21, %v8926_v39 }
0x182e   :  { %v4466_v7 = vpop.permute.xlu1 %4465 }
0x182f   :  { %6963 = vmatmul.mubr.msk.f32.gmra.mxu0 %vm653_vm4, %v3982_v6  ;;  %7000 = vmatpush3.msra.mxu1 %v4466_v7 }
0x1830   :  { %6986 = vmatprep.mubr.msk.f32.mxu0 %vm7504_vm2, %v7502_v54  ;;  %7025 = vmatprep.subr.mxu1 %v7502_v54 }
0x1832   :  { %v8992_v23 = vpop.permute.xlu1 %4671 }
0x1833   :  { %6987 = vmatmul.mubr.msk.f32.vlgmr.msra.gmra.mxu0 %vm441_vm3, %v4284_v13 }
0x1834   :  { %7011 = vmatpush3.msra.mxu0 %v4568_v47  ;;  %6989 = vmatprep.mubr.msk.f32.mxu0 %vm7504_vm2, %v7502_v54 }
0x1835   :  { %7012 = vmatprep.subr.mxu0 %v7502_v54 }
0x1836   :  { %7013 = vmatpush3.msra.mxu0 %v4566_v8  ;;  %v8998_v3 = vpop.permute.xlu1 %4669 }
0x1837   :  { %6990 = vmatmul.mubr.msk.f32.gmra.mxu0 %vm441_vm3, %v4286_v56  ;;  %7014 = vmatprep.subr.mxu0 %v7502_v54 }
0x1838   :  { %6992 = vmatprep.mubr.msk.f32.mxu0 %vm7504_vm2, %v7502_v54 }
0x183a   :  { %v4564_v4 = vpop.permute.xlu1 %4563 }
0x183b   :  { %6993 = vmatmul.mubr.msk.f32.gmra.mxu0 %vm441_vm3, %v4288_v55 }
0x183c   :  { %7015 = vmatpush3.msra.mxu0 %v4564_v4  ;;  %7016 = vmatprep.mubr.msk.f32.mxu0 %vm7504_vm2, %v7502_v54 }
0x183d   :  { %7040 = vmatprep.subr.mxu0 %v7502_v54 }
0x1856   :  { %v9008_v5 = vpop.f32.mrf.mxu1 }
0x1858   :  { %v6943_v36 = vpop.f32.mrf.mxu1 }
0x1879   :  { %v9010_v11 = vpop.f32.mrf.mxu1 }
0x187b   :  { %v6946_v46 = vpop.f32.mrf.mxu1 }
0x187d   :  { %v9012_v53 = vpop.f32.mrf.mxu1 }
0x187f   :  { %v6949_v15 = vpop.f32.mrf.mxu1 }
0x1881   :  { %v4269_v20 = vpop.f32.mrf.mxu1 }
0x1882   :  { %v4387_v10 = vmul.f32 0.35355338, %v4269_v20 }
0x1883   :  { %v6973_v25 = vpop.f32.mrf.mxu1 }
0x1884   :  { %v4393_v39 = vadd.f32 %v8736_v32, %v4387_v10 }
0x1886   :  { %v4399_v18 = vsel %vm653_vm4, %v4393_v39, -inf }
0x1887   :  { %4400 = vmax.xlane.f32.xlu0 %v4399_v18 }
0x18b2   :  { %v4274_v9 = vpop.f32.mrf.mxu1 }
0x18b3   :  { %v4388_v17 = vmul.f32 0.35355338, %v4274_v9 }
0x18b4   :  { %v6976_v24 = vpop.f32.mrf.mxu1 }
0x18b5   :  { %v4394_v16 = vadd.f32 %v8736_v32, %v4388_v17 }
0x18b6   :  { %v4279_v44 = vpop.f32.mrf.mxu1 }
0x18b7   :  { %v4389_v29 = vmul.f32 0.35355338, %v4279_v44  ;;  %v4402_v30 = vsel %vm653_vm4, %v4394_v16, -inf }
0x18b8   :  { %4403 = vmax.xlane.f32.xlu1 %v4402_v30  ;;  %v6979_v41 = vpop.f32.mrf.mxu1 }
0x18b9   :  { %v4395_v59 = vadd.f32 %v8736_v32, %v4389_v29 }
0x18ba   :  { %v9019_v62 = vpop.f32.mrf.mxu0 }
0x18bb   :  { %v4405_v38 = vsel %vm653_vm4, %v4395_v59, -inf }
0x18bc   :  { %v6958_v42 = vpop.f32.mrf.mxu0  ;;  %4406 = vmax.xlane.f32.xlu0 %v4405_v38 }
0x18be   :  { %v9022_v34 = vpop.f32.mrf.mxu0 }
0x18c0   :  { %v6961_v48 = vpop.f32.mrf.mxu0 }
0x18c9   :  { %4775 = vrot.lane.b32.xlu1 %v8659_v14, %s9489_s6 }
0x18ef   :  { %v9026_v2 = vpop.f32.mrf.mxu0 }
0x18f1   :  { %v6964_v49 = vpop.f32.mrf.mxu0 }
0x18f3   :  { %v4373_v56 = vpop.f32.mrf.mxu0 }
0x18f4   :  { %v4390_v57 = vmul.f32 0.35355338, %v4373_v56 }
0x18f5   :  { %v6988_v0 = vpop.f32.mrf.mxu0 }
0x18f6   :  { %v4396_v40 = vadd.f32 %v8736_v32, %v4390_v57 }
0x18f7   :  { %v4378_v1 = vpop.f32.mrf.mxu0 }
0x18f8   :  { %v4391_v19 = vmul.f32 0.35355338, %v4378_v1  ;;  %v4408_v13 = vsel %vm653_vm4, %v4396_v40, -inf }
0x18f9   :  { %4409 = vmax.xlane.f32.xlu0 %v4408_v13  ;;  %v6991_v55 = vpop.f32.mrf.mxu0 }
0x18fa   :  { %v4397_v60 = vadd.f32 %v8736_v32, %v4391_v19 }
0x18fb   :  { %v4383_v21 = vpop.f32.mrf.mxu0 }
0x18fc   :  { %v4392_v6 = vmul.f32 0.35355338, %v4383_v21  ;;  %v4411_v7 = vsel %vm653_vm4, %v4397_v60, -inf }
0x18fd   :  { %4412 = vmax.xlane.f32.xlu0 %v4411_v7  ;;  %v6994_v47 = vpop.f32.mrf.mxu0 }
0x18fe   :  { %v4398_v8 = vadd.f32 %v8736_v32, %v4392_v6 }
0x1900   :  { %v4414_v4 = vsel %vm653_vm4, %v4398_v8, -inf }
0x1901   :  { %4415 = vmax.xlane.f32.xlu1 %v4414_v4 }
0x1910   :  { %v4401_v36 = vpop.xlane.xlu0 %4400 }
0x1911   :  { %v4417_v46 = vsub.f32 %v4393_v39, %v4401_v36 }
0x1913   :  { %4667 = vrot.lane.b32.xlu0 %v8651_v26, %s9489_s6  ;;  %v4423_v15 = vmul.f32 1.442695, %v4417_v46 }
0x1915   :  { %7381 = vpow2.f32 %v4423_v15 }
0x1922   :  { %v7382_v20 = vpop.eup %7381 }
0x1923   :  { %v4435_v10 = vsel %vm653_vm4, %v7382_v20, 0.0 }
0x1932   :  { %4436 = vadd.xlane.f32.xlu0 %v4435_v10 }
0x1941   :  { %v4404_v25 = vpop.xlane.xlu1 %4403 }
0x1942   :  { %v4418_v18 = vsub.f32 %v4394_v16, %v4404_v25 }
0x1944   :  { %v4425_v9 = vmul.f32 1.442695, %v4418_v18 }
0x1945   :  { %v4407_v17 = vpop.xlane.xlu0 %4406  ;;  %v4776_v1 = vpop.permute.xlu1 %4775 }
0x1946   :  { %7383 = vpow2.f32 %v4425_v9  ;;  %v4419_v32 = vsub.f32 %v4395_v59, %v4407_v17 }
0x1948   :  { %v4427_v24 = vmul.f32 1.442695, %v4419_v32 }
0x194a   :  { %7385 = vpow2.f32 %v4427_v24 }
0x1953   :  { %v7384_v44 = vpop.eup %7383 }
0x1954   :  { %v4438_v29 = vsel %vm653_vm4, %v7384_v44, 0.0 }
0x1955   :  { %4439 = vadd.xlane.f32.xlu1 %v4438_v29 }
0x1957   :  { %v7386_v30 = vpop.eup %7385 }
0x1958   :  { %v4441_v39 = vsel %vm653_vm4, %v7386_v30, 0.0 }
0x1959   :  { %4442 = vadd.xlane.f32.xlu0 %v4441_v39 }
0x1966   :  { %4773 = vrot.lane.b32.xlu1 %v8661_v35, %s9489_s6 }
0x196f   :  { %4661 = vrot.lane.b32.xlu0 %v8651_v26, %s9490_s4 }
0x1982   :  { %v4410_v16 = vpop.xlane.xlu0 %4409 }
0x1983   :  { %v4420_v41 = vsub.f32 %v4396_v40, %v4410_v16 }
0x1985   :  { %v4429_v38 = vmul.f32 1.442695, %v4420_v41 }
0x1986   :  { %v4413_v59 = vpop.xlane.xlu0 %4412 }
0x1987   :  { %7387 = vpow2.f32 %v4429_v38  ;;  %v4421_v42 = vsub.f32 %v4397_v60, %v4413_v59 }
0x1989   :  { %v4431_v48 = vmul.f32 1.442695, %v4421_v42 }
0x198a   :  { %v4416_v19 = vpop.xlane.xlu1 %4415  ;;  %v4668_v55 = vpop.permute.xlu0 %4667 }
0x198b   :  { %7389 = vpow2.f32 %v4431_v48  ;;  %v4422_v40 = vsub.f32 %v4398_v8, %v4416_v19  ;;  %v9107_v19 = vld [vmem:[%s9482_s24] ss:$0 sm:$0xff]  ;;  %s9491_s24 = smov 40  }
0x198d   :  { %v4433_v13 = vmul.f32 1.442695, %v4422_v40 }
0x198f   :  { %7391 = vpow2.f32 %v4433_v13 }
0x1994   :  { %v7388_v49 = vpop.eup %7387 }
0x1995   :  { %v4444_v56 = vsel %vm653_vm4, %v7388_v49, 0.0 }
0x1996   :  { %4445 = vadd.xlane.f32.xlu1 %v4444_v56 }
0x1998   :  { %v7390_v57 = vpop.eup %7389 }
0x1999   :  { %v4447_v0 = vsel %vm653_vm4, %v7390_v57, 0.0 }
0x199a   :  { %4448 = vadd.xlane.f32.xlu0 %v4447_v0 }
0x199c   :  { %v7392_v21 = vpop.eup %7391 }
0x199d   :  { %v4450_v47 = vsel %vm653_vm4, %v7392_v21, 0.0 }
0x19a7   :  { %4771 = vrot.lane.b32.xlu1 %v8665_v43, %s9489_s6 }
0x19b0   :  { %4663 = vrot.lane.b32.xlu0 %v8647_v22, %s9490_s4 }
0x19b4   :  { %4665 = vrot.lane.b32.xlu0 %v8655_v28, %s9490_s4 }
0x19bb   :  { %v4437_v60 = vpop.xlane.xlu0 %4436 }
0x19bc   :  { %7393 = vrcp.f32 %v4437_v60 }
0x19c9   :  { %v7394_v6 = vpop.eup %7393 }
0x19ca   :  { %v4459_v7 = vmul.f32 %v7394_v6, %v7382_v20 }
0x19cb   :  { %4451 = vadd.xlane.f32.xlu1 %v4450_v47 }
0x19cc   :  { %7002 = vmatmul.mubr.msk.f32.vlgmr.msra.gmra.mxu1 %vm653_vm4, %v4459_v7 }
0x19cd   :  { %7026 = vmatpush3.xpose.msk.msra.mxu1 %vm441_vm3, %v8992_v23  ;;  %7004 = vmatprep.mubr.msk.f32.mxu1 %vm7504_vm2, %v7502_v54 }
0x19ce   :  { %7027 = vmatprep.subr.mxu1 %v7502_v54 }
0x19d1   :  { %7028 = vmatpush3.xpose.msk.msra.mxu1 %vm441_vm3, %v8998_v3 }
0x19d2   :  { %7029 = vmatprep.subr.mxu1 %v7502_v54 }
0x19d5   :  { %7030 = vmatpush3.xpose.msk.msra.mxu1 %vm441_vm3, %v4668_v55 }
0x19d6   :  { %7055 = vmatprep.subr.mxu1 %v7502_v54 }
0x19dc   :  { %4765 = vrot.lane.b32.xlu1 %v8665_v43, %s9490_s4 }
0x19de   :  { %v4440_v8 = vpop.xlane.xlu1 %4439 }
0x19df   :  { %7395 = vrcp.f32 %v4440_v8 }
0x19e2   :  { %v4443_v23 = vpop.xlane.xlu0 %4442  ;;  %v4774_v20 = vpop.permute.xlu1 %4773 }
0x19e3   :  { %7397 = vrcp.f32 %v4443_v23 }
0x19e6   :  { %v4662_v15 = vpop.permute.xlu0 %4661 }
0x19ec   :  { %v7396_v4 = vpop.eup %7395 }
0x19ed   :  { %v4460_v36 = vmul.f32 %v7396_v4, %v7384_v44 }
0x19ef   :  { %7005 = vmatmul.mubr.msk.f32.gmra.mxu1 %vm653_vm4, %v4460_v36 }
0x19f0   :  { %v7398_v46 = vpop.eup %7397  ;;  %7007 = vmatprep.mubr.msk.f32.mxu1 %vm7504_vm2, %v7502_v54 }
0x19f1   :  { %v4461_v3 = vmul.f32 %v7398_v46, %v7386_v30 }
0x19f3   :  { %7008 = vmatmul.mubr.msk.f32.gmra.mxu1 %vm653_vm4, %v4461_v3 }
0x19f4   :  { %7031 = vmatprep.mubr.msk.f32.mxu1 %vm7504_vm2, %v7502_v54 }
0x19f7   :  { %7032 = vmatmul.mubr.msk.f32.vlgmr.msra.gmra.mxu1 %vm441_vm3, %v4662_v15 }
0x19f8   :  { %7034 = vmatprep.mubr.msk.f32.mxu1 %vm7504_vm2, %v7502_v54 }
0x1a1f   :  { %v4446_v10 = vpop.xlane.xlu1 %4445 }
0x1a20   :  { %7399 = vrcp.f32 %v4446_v10 }
0x1a23   :  { %v4449_v25 = vpop.xlane.xlu0 %4448  ;;  %v4772_v29 = vpop.permute.xlu1 %4771 }
0x1a24   :  { %7401 = vrcp.f32 %v4449_v25 }
0x1a27   :  { %v4664_v18 = vpop.permute.xlu0 %4663 }
0x1a28   :  { %7035 = vmatmul.mubr.msk.f32.gmra.mxu1 %vm441_vm3, %v4664_v18 }
0x1a29   :  { %7037 = vmatprep.mubr.msk.f32.mxu1 %vm7504_vm2, %v7502_v54 }
0x1a2b   :  { %v4666_v9 = vpop.permute.xlu0 %4665 }
0x1a2c   :  { %7038 = vmatmul.mubr.msk.f32.gmra.mxu1 %vm441_vm3, %v4666_v9 }
0x1a2d   :  { %v7400_v17 = vpop.eup %7399  ;;  %7061 = vmatprep.mubr.msk.f32.mxu1 %vm7504_vm2, %v7502_v54 }
0x1a2e   :  { %v4462_v32 = vmul.f32 %v7400_v17, %v7388_v49 }
0x1a30   :  { %7017 = vmatmul.mubr.msk.f32.vlgmr.msra.gmra.mxu0 %vm653_vm4, %v4462_v32 }
0x1a31   :  { %v7402_v24 = vpop.eup %7401  ;;  %7041 = vmatpush3.xpose.msk.msra.mxu0 %vm441_vm3, %v4776_v1  ;;  %7019 = vmatprep.mubr.msk.f32.mxu0 %vm7504_vm2, %v7502_v54 }
0x1a32   :  { %7042 = vmatprep.subr.mxu0 %v7502_v54  ;;  %v4463_v44 = vmul.f32 %v7402_v24, %v7390_v57 }
0x1a34   :  { %7020 = vmatmul.mubr.msk.f32.gmra.mxu0 %vm653_vm4, %v4463_v44 }
0x1a35   :  { %7043 = vmatpush3.xpose.msk.msra.mxu0 %vm441_vm3, %v4774_v20  ;;  %7022 = vmatprep.mubr.msk.f32.mxu0 %vm7504_vm2, %v7502_v54 }
0x1a36   :  { %7044 = vmatprep.subr.mxu0 %v7502_v54 }
0x1a39   :  { %7045 = vmatpush3.xpose.msk.msra.mxu0 %vm441_vm3, %v4772_v29 }
0x1a3a   :  { %7070 = vmatprep.subr.mxu0 %v7502_v54 }
0x1a54   :  { %v4452_v30 = vpop.xlane.xlu1 %4451 }
0x1a55   :  { %7403 = vrcp.f32 %v4452_v30 }
0x1a58   :  { %v4766_v41 = vpop.permute.xlu1 %4765 }
0x1a62   :  { %v7404_v39 = vpop.eup %7403 }
0x1a63   :  { %v4464_v16 = vmul.f32 %v7404_v39, %v7392_v21 }
0x1a65   :  { %7023 = vmatmul.mubr.msk.f32.gmra.mxu0 %vm653_vm4, %v4464_v16 }
0x1a66   :  { %7046 = vmatprep.mubr.msk.f32.mxu0 %vm7504_vm2, %v7502_v54 }
0x1a69   :  { %7047 = vmatmul.mubr.msk.f32.vlgmr.msra.gmra.mxu0 %vm441_vm3, %v4766_v41 }
0x1a6a   :  { %7049 = vmatprep.mubr.msk.f32.mxu0 %vm7504_vm2, %v7502_v54 }
0x1a8c   :  { %v9098_v38 = vpop.f32.mrf.mxu1 }
0x1a8e   :  { %v7003_v59 = vpop.f32.mrf.mxu1 }
0x1aaf   :  { %v9100_v42 = vpop.f32.mrf.mxu1 }
0x1ab1   :  { %v7006_v48 = vpop.f32.mrf.mxu1 }
0x1ab3   :  { %v9102_v49 = vpop.f32.mrf.mxu1 }
0x1ab5   :  { %v7009_v56 = vpop.f32.mrf.mxu1 }
0x1ab7   :  { %v4751_v57 = vpop.f32.mrf.mxu1 }
0x1ab8   :  { %v4869_v0 = vmul.f32 0.35355338, %v4751_v57 }
0x1ab9   :  { %v7033_v1 = vpop.f32.mrf.mxu1 }
0x1aba   :  { %v4875_v40 = vadd.f32 %v9107_v19, %v4869_v0 }
0x1abc   :  { %v4881_v13 = vsel %vm653_vm4, %v4875_v40, -inf }
0x1abd   :  { %4882 = vmax.xlane.f32.xlu0 %v4881_v13 }
0x1ae8   :  { %v4756_v55 = vpop.f32.mrf.mxu1 }
0x1ae9   :  { %v4870_v60 = vmul.f32 0.35355338, %v4756_v55 }
0x1aea   :  { %v7036_v21 = vpop.f32.mrf.mxu1 }
0x1aeb   :  { %v4876_v6 = vadd.f32 %v9107_v19, %v4870_v60 }
0x1aec   :  { %v4761_v7 = vpop.f32.mrf.mxu1 }
0x1aed   :  { %v4871_v47 = vmul.f32 0.35355338, %v4761_v7  ;;  %v4884_v8 = vsel %vm653_vm4, %v4876_v6, -inf }
0x1aee   :  { %4885 = vmax.xlane.f32.xlu1 %v4884_v8  ;;  %v7039_v23 = vpop.f32.mrf.mxu1 }
0x1aef   :  { %v4877_v4 = vadd.f32 %v9107_v19, %v4871_v47 }
0x1af0   :  { %v9114_v36 = vpop.f32.mrf.mxu0 }
0x1af1   :  { %v4887_v46 = vsel %vm653_vm4, %v4877_v4, -inf }
0x1af2   :  { %v7018_v3 = vpop.f32.mrf.mxu0  ;;  %4888 = vmax.xlane.f32.xlu0 %v4887_v46 }
0x1af4   :  { %v9117_v15 = vpop.f32.mrf.mxu0 }
0x1af6   :  { %v7021_v20 = vpop.f32.mrf.mxu0 }
0x1aff   :  { %4949 = vrot.lane.b32.xlu1 %v8647_v22, %s9491_s24 }
0x1b03   :  { %4947 = vrot.lane.b32.xlu1 %v8651_v26, %s9491_s24 }
0x1b07   :  { %4767 = vrot.lane.b32.xlu1 %v8661_v35, %s9490_s4 }
0x1b0b   :  { %4769 = vrot.lane.b32.xlu1 %v8659_v14, %s9490_s4 }
0x1b25   :  { %v9127_v10 = vpop.f32.mrf.mxu0 }
0x1b27   :  { %v7024_v25 = vpop.f32.mrf.mxu0 }
0x1b29   :  { %v4855_v18 = vpop.f32.mrf.mxu0 }
0x1b2a   :  { %v4872_v9 = vmul.f32 0.35355338, %v4855_v18 }
0x1b2b   :  { %v7048_v17 = vpop.f32.mrf.mxu0 }
0x1b2c   :  { %v4878_v32 = vadd.f32 %v9107_v19, %v4872_v9 }
0x1b2e   :  { %v4890_v24 = vsel %vm653_vm4, %v4878_v32, -inf }
0x1b2f   :  { %4891 = vmax.xlane.f32.xlu0 %v4890_v24 }
0x1b45   :  { %4951 = vrot.lane.b32.xlu0 %v8655_v28, %s9491_s24 }
0x1b46   :  { %v4883_v22 = vpop.xlane.xlu0 %4882 }
0x1b47   :  { %v4899_v26 = vsub.f32 %v4875_v40, %v4883_v22  ;;  %v6115_v22 = vld [vmem:[%s9431_s8 + $0x38] sm:$0xff] }
0x1b49   :  { %5049 = vrot.lane.b32.xlu0 %v8659_v14, %s9491_s24  ;;  %v4905_v44 = vmul.f32 1.442695, %v4899_v26  ;;  %v6114_v26 = vld [vmem:[%s9431_s8 + $0x30] sm:$0xff] }
0x1b4b   :  { %7405 = vpow2.f32 %v4905_v44  ;;  %v6113_v44 = vld [vmem:[%s9431_s8 + $0x28] sm:$0xff] }
0x1b58   :  { %v7406_v29 = vpop.eup %7405 }
0x1b59   :  { %v4917_v30 = vsel %vm653_vm4, %v7406_v29, 0.0 }
0x1b68   :  { %4918 = vadd.xlane.f32.xlu0 %v4917_v30 }
0x1b77   :  { %v4886_v39 = vpop.xlane.xlu1 %4885 }
0x1b78   :  { %v4900_v16 = vsub.f32 %v4876_v6, %v4886_v39 }
0x1b7a   :  { %v4907_v41 = vmul.f32 1.442695, %v4900_v16 }
0x1b7b   :  { %v4950_v59 = vpop.permute.xlu1 %4949  ;;  %v4889_v48 = vpop.xlane.xlu0 %4888 }
0x1b7c   :  { %7407 = vpow2.f32 %v4907_v41  ;;  %v4901_v56 = vsub.f32 %v4877_v4, %v4889_v48 }
0x1b7e   :  { %v4909_v57 = vmul.f32 1.442695, %v4901_v56 }
0x1b7f   :  { %v4948_v28 = vpop.permute.xlu1 %4947 }
0x1b80   :  { %7409 = vpow2.f32 %v4909_v57 }
0x1b83   :  { %v4768_v0 = vpop.permute.xlu1 %4767 }
0x1b84   :  { %7050 = vmatmul.mubr.msk.f32.gmra.mxu0 %vm441_vm3, %v4768_v0 }
0x1b85   :  { %7052 = vmatprep.mubr.msk.f32.mxu0 %vm7504_vm2, %v7502_v54 }
0x1b87   :  { %v4770_v14 = vpop.permute.xlu1 %4769 }
0x1b88   :  { %7053 = vmatmul.mubr.msk.f32.gmra.mxu0 %vm441_vm3, %v4770_v14 }
0x1b89   :  { %v7408_v1 = vpop.eup %7407  ;;  %7076 = vmatprep.mubr.msk.f32.mxu0 %vm7504_vm2, %v7502_v54 }
0x1b8a   :  { %v4920_v40 = vsel %vm653_vm4, %v7408_v1, 0.0 }
0x1b8b   :  { %4921 = vadd.xlane.f32.xlu1 %v4920_v40 }
0x1b8d   :  { %v7410_v13 = vpop.eup %7409 }
0x1b8e   :  { %v4923_v55 = vsel %vm653_vm4, %v7410_v13, 0.0 }
0x1b8f   :  { %4924 = vadd.xlane.f32.xlu0 %v4923_v55 }
0x1ba5   :  { %5047 = vrot.lane.b32.xlu0 %v8661_v35, %s9491_s24 }
0x1ba9   :  { %5149 = vrot.lane.b32.xlu0 %v9008_v5, %s7515_s1 }
0x1bad   :  { %5173 = vrot.lane.b32.xlu0 %v9098_v38, %s7516_s5 }
0x1bb1   :  { %5153 = vrot.lane.b32.xlu0 %v9012_v53, %s7515_s1 }
0x1bb5   :  { %5177 = vrot.lane.b32.xlu0 %v9102_v49, %s7516_s5 }
0x1bb8   :  { %v4892_v60 = vpop.xlane.xlu0 %4891 }
0x1bb9   :  { %v4902_v21 = vsub.f32 %v4878_v32, %v4892_v60 }
0x1bbb   :  { %v4911_v6 = vmul.f32 1.442695, %v4902_v21 }
0x1bbc   :  { %v4952_v7 = vpop.permute.xlu0 %4951 }
0x1bbd   :  { %7411 = vpow2.f32 %v4911_v6  ;;  %7056 = vmatpush3.msra.mxu1 %v4952_v7 }
0x1bbe   :  { %7057 = vmatprep.subr.mxu1 %v7502_v54 }
0x1bbf   :  { %7058 = vmatpush3.msra.mxu1 %v4950_v59 }
0x1bc0   :  { %7059 = vmatprep.subr.mxu1 %v7502_v54  ;;  %v5050_v35 = vpop.permute.xlu0 %5049 }
0x1bc1   :  { %7060 = vmatpush3.msra.mxu1 %v4948_v28  ;;  %7071 = vmatpush3.msra.mxu0 %v5050_v35 }
0x1bc2   :  { %7072 = vmatprep.subr.mxu0 %v7502_v54  ;;  %7085 = vmatprep.subr.mxu1 %v6115_v22 }
0x1bca   :  { %v7412_v5 = vpop.eup %7411 }
0x1bcb   :  { %v4926_v53 = vsel %vm653_vm4, %v7412_v5, 0.0 }
0x1bcc   :  { %4927 = vadd.xlane.f32.xlu1 %v4926_v53 }
0x1bdd   :  { %5045 = vrot.lane.b32.xlu1 %v8665_v43, %s9491_s24 }
0x1be1   :  { %5151 = vrot.lane.b32.xlu1 %v9010_v11, %s7515_s1 }
0x1be5   :  { %5175 = vrot.lane.b32.xlu1 %v9100_v42, %s7516_s5 }
0x1be9   :  { %5155 = vrot.lane.b32.xlu1 %v9019_v62, %s7515_s1 }
0x1bed   :  { %5179 = vrot.lane.b32.xlu1 %v9114_v36, %s7516_s5 }
0x1bf1   :  { %v4919_v38 = vpop.xlane.xlu0 %4918 }
0x1bf2   :  { %7413 = vrcp.f32 %v4919_v38 }
0x1bff   :  { %v7414_v49 = vpop.eup %7413 }
0x1c00   :  { %v4941_v47 = vmul.f32 %v7414_v49, %v7406_v29  ;;  %v6112_v29 = vld [vmem:[%s9431_s8 + $0x20] sm:$0xff] }
0x1c02   :  { %7062 = vmatmul.mubr.msk.f32.vlgmr.msra.gmra.mxu1 %vm653_vm4, %v4941_v47 }
0x1c03   :  { %7064 = vmatprep.mubr.msk.f32.mxu1 %vm7504_vm2, %v7502_v54  ;;  %7086 = vmatpush3.msra.mxu1 %v6115_v22 }
0x1c04   :  { %7087 = vmatprep.subr.mxu1 %v6114_v26 }
0x1c05   :  { %7088 = vmatpush3.msra.mxu1 %v6114_v26 }
0x1c06   :  { %7089 = vmatprep.subr.mxu1 %v6113_v44 }
0x1c07   :  { %7090 = vmatpush3.msra.mxu1 %v6113_v44 }
0x1c08   :  { %7091 = vmatprep.subr.mxu1 %v6112_v29 }
0x1c09   :  { %7092 = vmatpush3.msra.mxu1 %v6112_v29 }
0x1c14   :  { %v4922_v43 = vpop.xlane.xlu1 %4921 }
0x1c15   :  { %7415 = vrcp.f32 %v4922_v43 }
0x1c18   :  { %v4925_v11 = vpop.xlane.xlu0 %4924 }
0x1c19   :  { %7417 = vrcp.f32 %v4925_v11 }
0x1c1c   :  { %v5048_v42 = vpop.permute.xlu0 %5047 }
0x1c1d   :  { %7073 = vmatpush3.msra.mxu0 %v5048_v42 }
0x1c1e   :  { %7074 = vmatprep.subr.mxu0 %v7502_v54 }
0x1c20   :  { %v5150_v57 = vpop.permute.xlu0 %5149 }
0x1c22   :  { %v7416_v62 = vpop.eup %7415 }
0x1c23   :  { %v4942_v8 = vmul.f32 %v7416_v62, %v7408_v1 }
0x1c24   :  { %v5174_v28 = vpop.permute.xlu0 %5173 }
0x1c25   :  { %7065 = vmatmul.mubr.msk.f32.gmra.mxu1 %vm653_vm4, %v4942_v8 }
0x1c26   :  { %v7418_v23 = vpop.eup %7417  ;;  %7067 = vmatprep.mubr.msk.f32.mxu1 %vm7504_vm2, %v7502_v54 }
0x1c27   :  { %v4943_v4 = vmul.f32 %v7418_v23, %v7410_v13  ;;  %v5215_v13 = vsel %vm441_vm3, %v8867_v45, %v5150_v57 }
0x1c28   :  { %v5154_v1 = vpop.permute.xlu0 %5153  ;;  %v5221_v55 = vsel %vm2440_vm5, %v5215_v13, %v5174_v28 }
0x1c29   :  { %7068 = vmatmul.mubr.msk.f32.gmra.mxu1 %vm653_vm4, %v4943_v4  ;;  %v5217_v42 = vsel %vm441_vm3, %v8871_v31, %v5154_v1 }
0x1c2c   :  { %v5178_v40 = vpop.permute.xlu0 %5177 }
0x1c44   :  { %v4860_v36 = vpop.f32.mrf.mxu0 }
0x1c45   :  { %v4873_v59 = vmul.f32 0.35355338, %v4860_v36 }
0x1c46   :  { %v7051_v46 = vpop.f32.mrf.mxu0 }
0x1c47   :  { %v4879_v48 = vadd.f32 %v9107_v19, %v4873_v59 }
0x1c48   :  { %v4865_v3 = vpop.f32.mrf.mxu0 }
0x1c49   :  { %v4893_v56 = vsel %vm653_vm4, %v4879_v48, -inf  ;;  %v4874_v6 = vmul.f32 0.35355338, %v4865_v3 }
0x1c4a   :  { %v7054_v20 = vpop.f32.mrf.mxu0 }
0x1c4b   :  { %v4880_v35 = vadd.f32 %v9107_v19, %v4874_v6  ;;  %v5223_v19 = vsel %vm2440_vm5, %v5217_v42, %v5178_v40 }
0x1c4d   :  { %v4896_v53 = vsel %vm653_vm4, %v4880_v35, -inf }
0x1c55   :  { %v4928_v25 = vpop.xlane.xlu1 %4927 }
0x1c56   :  { %7419 = vrcp.f32 %v4928_v25 }
0x1c59   :  { %v5046_v18 = vpop.permute.xlu1 %5045 }
0x1c5a   :  { %7075 = vmatpush3.msra.mxu0 %v5046_v18 }
0x1c5d   :  { %v5152_v7 = vpop.permute.xlu1 %5151 }
0x1c5e   :  { %v5216_v45 = vsel %vm441_vm3, %v8869_v37, %v5152_v7 }
0x1c63   :  { %v7420_v9 = vpop.eup %7419 }
0x1c64   :  { %v4944_v17 = vmul.f32 %v7420_v9, %v7412_v5  ;;  %v5176_v5 = vpop.permute.xlu1 %5175 }
0x1c65   :  { %v5222_v47 = vsel %vm2440_vm5, %v5216_v45, %v5176_v5  ;;  %v6131_v45 = vld [vmem:[%s9435_s12 + $0x38] sm:$0xff] }
0x1c66   :  { %7077 = vmatmul.mubr.msk.f32.vlgmr.msra.gmra.mxu0 %vm653_vm4, %v4944_v17  ;;  %7102 = vmatprep.subr.mxu0 %v6131_v45 }
0x1c67   :  { %7079 = vmatprep.mubr.msk.f32.mxu0 %vm7504_vm2, %v7502_v54  ;;  %7103 = vmatpush3.msra.mxu0 %v6131_v45  ;;  %v6153_v45 = vld [vmem:[%s9437_s14 + $0xe8] sm:$0xff] }
0x1c68   :  { %v5156_v38 = vpop.permute.xlu1 %5155 }
0x1c69   :  { %v5218_v36 = vsel %vm441_vm3, %v8878_v33, %v5156_v38  ;;  %v9224_v33 = vld [vmem:[%s9432_s9 + $0x1] ss:$0 sm:$0xff] }
0x1c6c   :  { %v5180_v49 = vpop.permute.xlu1 %5179 }
0x1c6d   :  { %v5224_v46 = vsel %vm2440_vm5, %v5218_v36, %v5180_v49 }
0x1cc2   :  { %v5031_v32 = vpop.f32.mrf.mxu1 }
0x1cc3   :  { %5197 = vrot.lane.b32.xlu0 %v5031_v32, %s9492_s28 }
0x1cc4   :  { %v7063_v24 = vpop.f32.mrf.mxu1 }
0x1ce5   :  { %v5036_v30 = vpop.f32.mrf.mxu1 }
0x1ce6   :  { %5199 = vrot.lane.b32.xlu1 %v5036_v30, %s9492_s28 }
0x1ce7   :  { %v7066_v39 = vpop.f32.mrf.mxu1 }
0x1ce9   :  { %v5041_v16 = vpop.f32.mrf.mxu1 }
0x1cea   :  { %5201 = vrot.lane.b32.xlu0 %v5041_v16, %s9492_s28 }
0x1ceb   :  { %v7069_v41 = vpop.f32.mrf.mxu1 }
0x1d09   :  { %4894 = vmax.xlane.f32.xlu0 %v4893_v56 }
0x1d26   :  { %v5129_v0 = vpop.f32.mrf.mxu0 }
0x1d27   :  { %5203 = vrot.lane.b32.xlu1 %v5129_v0, %s9492_s28 }
0x1d28   :  { %v7078_v14 = vpop.f32.mrf.mxu0 }
0x1d35   :  { %v5198_v60 = vpop.permute.xlu0 %5197 }
0x1d36   :  { %v5227_v21 = vsel %vm653_vm4, %v5221_v55, %v5198_v60 }
0x1d37   :  { %7093 = vmatprep.mubr.msk.f32.mxu1 %vm204_vm1, %v5227_v21 }
0x1d4b   :  { %4897 = vmax.xlane.f32.xlu1 %v4896_v53 }
0x1d58   :  { %v5200_v43 = vpop.permute.xlu1 %5199 }
0x1d59   :  { %v5228_v11 = vsel %vm653_vm4, %v5222_v47, %v5200_v43  ;;  %v6130_v47 = vld [vmem:[%s9435_s12 + $0x30] sm:$0xff]  ;;  %v6129_v43 = vld [vmem:[%s9435_s12 + $0x28] sm:$0xff] }
0x1d5a   :  { %7094 = vmatmul.mubr.msk.f32.vlgmr.msra.gmra.mxu1 %vm204_vm1, %v5228_v11  ;;  %7104 = vmatprep.subr.mxu0 %v6130_v47  ;;  %v6128_v11 = vld [vmem:[%s9435_s12 + $0x20] sm:$0xff] }
0x1d5b   :  { %7105 = vmatpush3.msra.mxu0 %v6130_v47  ;;  %v6152_v47 = vld [vmem:[%s9437_s14 + $0xe0] sm:$0xff] }
0x1d5c   :  { %v5202_v62 = vpop.permute.xlu0 %5201  ;;  %7106 = vmatprep.subr.mxu0 %v6129_v43 }
0x1d5d   :  { %v5229_v8 = vsel %vm653_vm4, %v5223_v19, %v5202_v62  ;;  %7107 = vmatpush3.msra.mxu0 %v6129_v43  ;;  %v6151_v43 = vld [vmem:[%s9437_s14 + $0xd8] sm:$0xff] }
0x1d5e   :  { %7096 = vmatprep.mubr.msk.f32.mxu1 %vm204_vm1, %v5229_v8  ;;  %7108 = vmatprep.subr.mxu0 %v6128_v11 }
0x1d5f   :  { %7109 = vmatpush3.msra.mxu0 %v6128_v11  ;;  %v6150_v11 = vld [vmem:[%s9437_s14 + $0xd0] sm:$0xff] }
0x1d60   :  { %7160 = vmatprep.subr.mxu0 %v7502_v54 }
0x1d92   :  { %v4895_v23 = vpop.xlane.xlu0 %4894 }
0x1d93   :  { %v4903_v4 = vsub.f32 %v4879_v48, %v4895_v23 }
0x1d95   :  { %v4913_v37 = vmul.f32 1.442695, %v4903_v4 }
0x1d97   :  { %7421 = vpow2.f32 %v4913_v37 }
0x1d99   :  { %v5204_v3 = vpop.permute.xlu1 %5203 }
0x1d9a   :  { %v5230_v20 = vsel %vm653_vm4, %v5224_v46, %v5204_v3 }
0x1d9b   :  { %7097 = vmatmul.mubr.msk.f32.gmra.mxu1 %vm204_vm1, %v5230_v20 }
0x1da4   :  { %v7422_v31 = vpop.eup %7421 }
0x1da5   :  { %v4929_v25 = vsel %vm653_vm4, %v7422_v31, 0.0 }
0x1da6   :  { %4930 = vadd.xlane.f32.xlu0 %v4929_v25 }
0x1dd4   :  { %v4898_v18 = vpop.xlane.xlu1 %4897 }
0x1dd5   :  { %v4904_v9 = vsub.f32 %v4880_v35, %v4898_v18 }
0x1dd7   :  { %v4915_v17 = vmul.f32 1.442695, %v4904_v9 }
0x1dd9   :  { %7423 = vpow2.f32 %v4915_v17 }
0x1de6   :  { %v7424_v32 = vpop.eup %7423 }
0x1de7   :  { %v4932_v24 = vsel %vm653_vm4, %v7424_v32, 0.0 }
0x1de8   :  { %4933 = vadd.xlane.f32.xlu0 %v4932_v24 }
0x1e1a   :  { %v7095_v22 = vpop.f32.mrf.mxu1 }
0x1e1b   :  { %v5336_v26 = vadd.f32 %v7095_v22, %v9224_v33 }
0x1e1c   :  { %v5330_v44 = vpop.f32.mrf.mxu1 }
0x1e1d   :  { %v5360_v29 = vadd.f32 %v5336_v26, %v8546_v51  ;;  %v5331_v30 = vadd.f32 %v9224_v33, %v5330_v44 }
0x1e1f   :  { %v9230_v39 = vadd.f32 %v5331_v30, %v8549_v50  ;;  %v5372_v16 = vsel %vm204_vm1, %v5360_v29, 0.0  ;;  %v9286_v30 = vld [vmem:[%s9434_s11 + $0x1] ss:$0 sm:$0xff] }
0x1e20   :  { %5373 = vadd.xlane.f32.xlu1 %v5372_v16 }
0x1e21   :  { %v5369_v41 = vsel %vm204_vm1, %v9230_v39, 0.0 }
0x1e22   :  { %5370 = vadd.xlane.f32.xlu0 %v5369_v41 }
0x1e2f   :  { %v4931_v59 = vpop.xlane.xlu0 %4930 }
0x1e30   :  { %7425 = vrcp.f32 %v4931_v59 }
0x1e3d   :  { %v7426_v48 = vpop.eup %7425 }
0x1e3e   :  { %v4945_v56 = vmul.f32 %v7426_v48, %v7422_v31 }
0x1e40   :  { %7080 = vmatmul.mubr.msk.f32.gmra.mxu0 %vm653_vm4, %v4945_v56 }
0x1e41   :  { %7082 = vmatprep.mubr.msk.f32.mxu0 %vm7504_vm2, %v7502_v54 }
0x1e5b   :  { %v7098_v51 = vpop.f32.mrf.mxu1 }
0x1e5c   :  { %v5346_v50 = vadd.f32 %v7098_v51, %v9224_v33 }
0x1e5d   :  { %v5340_v57 = vpop.f32.mrf.mxu1 }
0x1e5e   :  { %v9240_v28 = vadd.f32 %v5346_v50, %v8556_v58  ;;  %v5341_v0 = vadd.f32 %v9224_v33, %v5340_v57 }
0x1e60   :  { %v5361_v14 = vadd.f32 %v5341_v0, %v8559_v61  ;;  %v5378_v1 = vsel %vm204_vm1, %v9240_v28, 0.0 }
0x1e61   :  { %5379 = vadd.xlane.f32.xlu1 %v5378_v1 }
0x1e62   :  { %v5375_v40 = vsel %vm204_vm1, %v5361_v14, 0.0 }
0x1e63   :  { %5376 = vadd.xlane.f32.xlu0 %v5375_v40 }
0x1e71   :  { %v4934_v13 = vpop.xlane.xlu0 %4933 }
0x1e72   :  { %7427 = vrcp.f32 %v4934_v13 }
0x1e7f   :  { %v7428_v55 = vpop.eup %7427 }
0x1e80   :  { %v4946_v60 = vmul.f32 %v7428_v55, %v7424_v32 }
0x1e82   :  { %7083 = vmatmul.mubr.msk.f32.gmra.mxu0 %vm653_vm4, %v4946_v60 }
0x1ea9   :  { %v5374_v21 = vpop.xlane.xlu1 %5373 }
0x1eaa   :  { %v5388_v58 = vmul.f32 0.03125, %v5374_v21 }
0x1eab   :  { %v5371_v6 = vpop.xlane.xlu0 %5370 }
0x1eac   :  { %v5394_v7 = vsub.f32 %v5360_v29, %v5388_v58  ;;  %v5387_v35 = vmul.f32 0.03125, %v5371_v6 }
0x1eae   :  { %v5393_v61 = vsub.f32 %v9230_v39, %v5387_v35  ;;  %v5400_v5 = vmul.f32 %v5394_v7, %v5394_v7 }
0x1eb0   :  { %v5408_v53 = vsel %vm204_vm1, %v5400_v5, 0.0  ;;  %v5399_v38 = vmul.f32 %v5393_v61, %v5393_v61 }
0x1eb1   :  { %5409 = vadd.xlane.f32.xlu1 %v5408_v53 }
0x1eb2   :  { %v5405_v49 = vsel %vm204_vm1, %v5399_v38, 0.0  ;;  %v6155_v38 = vld [vmem:[%s9437_s14 + $0xf8] sm:$0xff] }
0x1eb3   :  { %5406 = vadd.xlane.f32.xlu0 %v5405_v49  ;;  %7119 = vmatprep.subr.mxu1 %v6155_v38  ;;  %v6154_v49 = vld [vmem:[%s9437_s14 + $0xf0] sm:$0xff] }
0x1eb4   :  { %7120 = vmatpush3.msra.mxu1 %v6155_v38 }
0x1eb5   :  { %7121 = vmatprep.subr.mxu1 %v6154_v49 }
0x1eb6   :  { %7122 = vmatpush3.msra.mxu1 %v6154_v49 }
0x1eb7   :  { %7123 = vmatprep.subr.mxu1 %v6153_v45 }
0x1eb8   :  { %7124 = vmatpush3.msra.mxu1 %v6153_v45 }
0x1eb9   :  { %7125 = vmatprep.subr.mxu1 %v6152_v47 }
0x1eba   :  { %7126 = vmatpush3.msra.mxu1 %v6152_v47 }
0x1ebb   :  { %7127 = vmatprep.subr.mxu1 %v6151_v43 }
0x1ebc   :  { %7128 = vmatpush3.msra.mxu1 %v6151_v43 }
0x1ebd   :  { %7129 = vmatprep.subr.mxu1 %v6150_v11 }
0x1ebe   :  { %7130 = vmatpush3.msra.mxu1 %v6150_v11 }
0x1eea   :  { %v5380_v42 = vpop.xlane.xlu1 %5379 }
0x1eeb   :  { %v5390_v19 = vmul.f32 0.03125, %v5380_v42  ;;  %v6149_v42 = vld [vmem:[%s9437_s14 + $0xc8] sm:$0xff] }
0x1eec   :  { %v5377_v62 = vpop.xlane.xlu0 %5376  ;;  %7131 = vmatprep.subr.mxu1 %v6149_v42 }
0x1eed   :  { %v5396_v8 = vsub.f32 %v9240_v28, %v5390_v19  ;;  %v5389_v23 = vmul.f32 0.03125, %v5377_v62  ;;  %7132 = vmatpush3.msra.mxu1 %v6149_v42  ;;  %v6148_v19 = vld [vmem:[%s9437_s14 + $0xc0] sm:$0xff]  ;;  %v6147_v62 = vld [vmem:[%s9437_s14 + $0xb8] sm:$0xff] }
0x1eee   :  { %7133 = vmatprep.subr.mxu1 %v6148_v19 }
0x1eef   :  { %v5395_v4 = vsub.f32 %v5361_v14, %v5389_v23  ;;  %v5402_v37 = vmul.f32 %v5396_v8, %v5396_v8  ;;  %7134 = vmatpush3.msra.mxu1 %v6148_v19  ;;  %v6145_v23 = vld [vmem:[%s9437_s14 + $0xa8] sm:$0xff] }
0x1ef0   :  { %7135 = vmatprep.subr.mxu1 %v6147_v62 }
0x1ef1   :  { %v5414_v36 = vsel %vm204_vm1, %v5402_v37, 0.0  ;;  %v5401_v46 = vmul.f32 %v5395_v4, %v5395_v4  ;;  %7136 = vmatpush3.msra.mxu1 %v6147_v62 }
0x1ef2   :  { %5415 = vadd.xlane.f32.xlu1 %v5414_v36  ;;  %v6143_v36 = vld [vmem:[%s9437_s14 + $0x98] sm:$0xff] }
0x1ef3   :  { %v5411_v3 = vsel %vm204_vm1, %v5401_v46, 0.0 }
0x1ef4   :  { %5412 = vadd.xlane.f32.xlu0 %v5411_v3  ;;  %v6142_v3 = vld [vmem:[%s9437_s14 + $0x90] sm:$0xff] }
0x1f00   :  { %v5134_v20 = vpop.f32.mrf.mxu0 }
0x1f02   :  { %v7081_v31 = vpop.f32.mrf.mxu0 }
0x1f03   :  { %5159 = vrot.lane.b32.xlu1 %v9026_v2, %s7515_s1 }
0x1f07   :  { %5181 = vrot.lane.b32.xlu1 %v9117_v15, %s7516_s5 }
0x1f0a   :  { %5157 = vrot.lane.b32.xlu0 %v9022_v34, %s7515_s1  ;;  %v9280_v34 = vld [vmem:[%s9433_s10 + $0x1] ss:$0 sm:$0xff] }
0x1f0b   :  { %5183 = vrot.lane.b32.xlu1 %v9127_v10, %s7516_s5 }
0x1f0e   :  { %5205 = vrot.lane.b32.xlu0 %v5134_v20, %s9492_s28 }
0x1f3a   :  { %v5410_v25 = vpop.xlane.xlu1 %5409 }
0x1f3b   :  { %v5424_v18 = vmul.f32 0.03125, %v5410_v25  ;;  %v6141_v25 = vld [vmem:[%s9437_s14 + $0x88] sm:$0xff] }
0x1f3c   :  { %v5407_v9 = vpop.xlane.xlu0 %5406 }
0x1f3d   :  { %v5430_v17 = vadd.f32 1e-06, %v5424_v18  ;;  %v5423_v32 = vmul.f32 0.03125, %v5407_v9  ;;  %v9360_v9 = vld [vmem:[%s9436_s13 + $0x1] ss:$0 sm:$0xff] }
0x1f3f   :  { %7429 = vrsqrt.f32 %v5430_v17  ;;  %v5429_v24 = vadd.f32 1e-06, %v5423_v32 }
0x1f41   :  { %7431 = vrsqrt.f32 %v5429_v24 }
0x1f42   :  { %v5139_v2 = vpop.f32.mrf.mxu0 }
0x1f43   :  { %5207 = vrot.lane.b32.xlu1 %v5139_v2, %s9492_s28 }
0x1f44   :  { %v7084_v15 = vpop.f32.mrf.mxu0 }
0x1f4c   :  { %v7430_v22 = vpop.eup %7429 }
0x1f4d   :  { %v5442_v10 = vmul.f32 %v7430_v22, %v5394_v7 }
0x1f4e   :  { %v7432_v26 = vpop.eup %7431 }
0x1f4f   :  { %v5441_v44 = vmul.f32 %v7432_v26, %v5393_v61  ;;  %v5454_v29 = vmul.f32 %v9280_v34, %v5442_v10 }
0x1f51   :  { %v5453_v16 = vmul.f32 %v9280_v34, %v5441_v44  ;;  %v5466_v59 = vadd.f32 %v9286_v30, %v5454_v29 }
0x1f53   :  { %v5465_v41 = vadd.f32 %v9286_v30, %v5453_v16 }
0x1f55   :  { %7110 = vmatprep.mubr.msk.f32.mxu0 %vm204_vm1, %v5465_v41 }
0x1f56   :  { %7111 = vmatmul.mubr.msk.f32.vlgmr.msra.gmra.mxu0 %vm204_vm1, %v5466_v59 }
0x1f7b   :  { %v5416_v48 = vpop.xlane.xlu1 %5415 }
0x1f7c   :  { %v5426_v56 = vmul.f32 0.03125, %v5416_v48 }
0x1f7d   :  { %v5413_v51 = vpop.xlane.xlu0 %5412 }
0x1f7e   :  { %v5432_v50 = vadd.f32 1e-06, %v5426_v56  ;;  %v5425_v57 = vmul.f32 0.03125, %v5413_v51 }
0x1f7f   :  { %v5160_v0 = vpop.permute.xlu1 %5159 }
0x1f80   :  { %7433 = vrsqrt.f32 %v5432_v50  ;;  %v5431_v14 = vadd.f32 1e-06, %v5425_v57  ;;  %v5220_v46 = vsel %vm441_vm3, %v8885_v27, %v5160_v0  ;;  %v6140_v27 = vld [vmem:[%s9437_s14 + $0x80] sm:$0xff] }
0x1f81   :  { %v5158_v1 = vpop.permute.xlu0 %5157 }
0x1f82   :  { %7435 = vrsqrt.f32 %v5431_v14  ;;  %v5219_v40 = vsel %vm441_vm3, %v8881_v12, %v5158_v1 }
0x1f83   :  { %v5182_v13 = vpop.permute.xlu1 %5181 }
0x1f84   :  { %v5225_v55 = vsel %vm2440_vm5, %v5219_v40, %v5182_v13 }
0x1f85   :  { %v5206_v60 = vpop.permute.xlu0 %5205 }
0x1f86   :  { %v5231_v21 = vsel %vm653_vm4, %v5225_v55, %v5206_v60 }
0x1f87   :  { %7099 = vmatprep.mubr.msk.f32.mxu1 %vm204_vm1, %v5231_v21  ;;  %v5184_v37 = vpop.permute.xlu1 %5183 }
0x1f88   :  { %v5226_v20 = vsel %vm2440_vm5, %v5220_v46, %v5184_v37 }
0x1f8d   :  { %v7434_v58 = vpop.eup %7433 }
0x1f8e   :  { %v5444_v6 = vmul.f32 %v7434_v58, %v5396_v8  ;;  %v6146_v8 = vld [vmem:[%s9437_s14 + $0xb0] sm:$0xff] }
0x1f8f   :  { %v7436_v7 = vpop.eup %7435  ;;  %7137 = vmatprep.subr.mxu1 %v6146_v8 }
0x1f90   :  { %v5443_v35 = vmul.f32 %v7436_v7, %v5395_v4  ;;  %v5456_v61 = vmul.f32 %v9280_v34, %v5444_v6  ;;  %7138 = vmatpush3.msra.mxu1 %v6146_v8  ;;  %v6144_v4 = vld [vmem:[%s9437_s14 + $0xa0] sm:$0xff] }
0x1f91   :  { %7139 = vmatprep.subr.mxu1 %v6145_v23 }
0x1f92   :  { %v5455_v5 = vmul.f32 %v9280_v34, %v5443_v35  ;;  %v5468_v12 = vadd.f32 %v9286_v30, %v5456_v61  ;;  %7140 = vmatpush3.msra.mxu1 %v6145_v23 }
0x1f93   :  { %7141 = vmatprep.subr.mxu1 %v6144_v4 }
0x1f94   :  { %v5467_v53 = vadd.f32 %v9286_v30, %v5455_v5  ;;  %7142 = vmatpush3.msra.mxu1 %v6144_v4 }
0x1f95   :  { %7143 = vmatprep.subr.mxu1 %v6143_v36 }
0x1f96   :  { %7113 = vmatprep.mubr.msk.f32.mxu0 %vm204_vm1, %v5467_v53  ;;  %7144 = vmatpush3.msra.mxu1 %v6143_v36 }
0x1f97   :  { %7114 = vmatmul.mubr.msk.f32.gmra.mxu0 %vm204_vm1, %v5468_v12  ;;  %7145 = vmatprep.subr.mxu1 %v6142_v3 }
0x1f98   :  { %7146 = vmatpush3.msra.mxu1 %v6142_v3 }
0x1f99   :  { %7147 = vmatprep.subr.mxu1 %v6141_v25 }
0x1f9a   :  { %7148 = vmatpush3.msra.mxu1 %v6141_v25 }
0x1f9b   :  { %7149 = vmatprep.subr.mxu1 %v6140_v27 }
0x1f9c   :  { %7150 = vmatpush3.msra.mxu1 %v6140_v27 }
0x1fb5   :  { %v5208_v31 = vpop.permute.xlu1 %5207 }
0x1fb6   :  { %v5232_v18 = vsel %vm653_vm4, %v5226_v20, %v5208_v31 }
0x1fb7   :  { %7100 = vmatmul.mubr.msk.f32.gmra.mxu1 %vm204_vm1, %v5232_v18 }
0x2016   :  { %v7112_v17 = vpop.f32.mrf.mxu0 }
0x2017   :  { %v5574_v32 = vadd.f32 %v7112_v17, %v9360_v9 }
0x2018   :  { %v5568_v24 = vpop.f32.mrf.mxu0 }
0x2019   :  { %v5598_v2 = vmul.f32 %v5574_v32, %v5574_v32  ;;  %v5569_v15 = vadd.f32 %v9360_v9, %v5568_v24 }
0x201b   :  { %v5604_v22 = vmul.f32 %v5598_v2, %v5574_v32  ;;  %v5597_v10 = vmul.f32 %v5569_v15, %v5569_v15 }
0x201d   :  { %v5610_v26 = vmul.f32 0.044715, %v5604_v22  ;;  %v5603_v44 = vmul.f32 %v5597_v10, %v5569_v15  ;;  %v6157_v10 = vld [vmem:[%s9438_s15 + $0x1] ss:$0 sm:$0xff] }
0x201f   :  { %v5616_v29 = vadd.f32 %v5610_v26, %v5574_v32  ;;  %v5609_v16 = vmul.f32 0.044715, %v5603_v44 }
0x2021   :  { %v5622_v41 = vmul.f32 0.7978846, %v5616_v29  ;;  %v5615_v59 = vadd.f32 %v5609_v16, %v5569_v15 }
0x2023   :  { %7437 = vtanh.f32 %v5622_v41  ;;  %v5621_v48 = vmul.f32 0.7978846, %v5615_v59 }
0x2025   :  { %7439 = vtanh.f32 %v5621_v48 }
0x2030   :  { %v7438_v56 = vpop.eup %7437 }
0x2031   :  { %v5634_v51 = vadd.f32 1.0, %v7438_v56 }
0x2032   :  { %v7440_v50 = vpop.eup %7439 }
0x2033   :  { %v5633_v57 = vadd.f32 1.0, %v7440_v50  ;;  %v5640_v0 = vmul.f32 0.5, %v5634_v51 }
0x2035   :  { %v5639_v14 = vmul.f32 0.5, %v5633_v57  ;;  %v5646_v40 = vmul.f32 %v5640_v0, %v5574_v32 }
0x2037   :  { %v5645_v1 = vmul.f32 %v5639_v14, %v5569_v15 }
0x2039   :  { %7151 = vmatprep.mubr.f32.mxu1 %v5645_v1 }
0x203a   :  { %7152 = vmatmul.mubr.f32.vlgmr.msra.gmra.mxu1 %v5646_v40 }
0x2057   :  { %v7115_v13 = vpop.f32.mrf.mxu0 }
0x2058   :  { %v5584_v55 = vadd.f32 %v7115_v13, %v9360_v9 }
0x2059   :  { %v5578_v60 = vpop.f32.mrf.mxu0 }
0x205a   :  { %v5600_v21 = vmul.f32 %v5584_v55, %v5584_v55  ;;  %v5579_v58 = vadd.f32 %v9360_v9, %v5578_v60 }
0x205c   :  { %v5606_v6 = vmul.f32 %v5600_v21, %v5584_v55  ;;  %v5599_v7 = vmul.f32 %v5579_v58, %v5579_v58 }
0x205e   :  { %v5612_v35 = vmul.f32 0.044715, %v5606_v6  ;;  %v5605_v61 = vmul.f32 %v5599_v7, %v5579_v58 }
0x2060   :  { %v5618_v5 = vadd.f32 %v5612_v35, %v5584_v55  ;;  %v5611_v53 = vmul.f32 0.044715, %v5605_v61 }
0x2062   :  { %v5624_v12 = vmul.f32 0.7978846, %v5618_v5  ;;  %v5617_v38 = vadd.f32 %v5611_v53, %v5579_v58 }
0x2064   :  { %7441 = vtanh.f32 %v5624_v12  ;;  %v5623_v49 = vmul.f32 0.7978846, %v5617_v38  ;;  %v5808_v12 = vld [vmem:[%s9441_s18 + $0x18] sm:$0xff]  ;;  %v5805_v38 = vld [vmem:[%s9441_s18] sm:$0xff] }
0x2065   :  { %7161 = vmatpush3.msra.mxu0 %v5808_v12 }
0x2066   :  { %7443 = vtanh.f32 %v5623_v49  ;;  %7162 = vmatprep.subr.mxu0 %v7502_v54 }
0x2071   :  { %v7442_v45 = vpop.eup %7441 }
0x2072   :  { %v5636_v47 = vadd.f32 1.0, %v7442_v45 }
0x2073   :  { %v7444_v43 = vpop.eup %7443 }
0x2074   :  { %v5635_v11 = vadd.f32 1.0, %v7444_v43  ;;  %v5642_v42 = vmul.f32 0.5, %v5636_v47 }
0x2076   :  { %v5641_v19 = vmul.f32 0.5, %v5635_v11  ;;  %v5648_v37 = vmul.f32 %v5642_v42, %v5584_v55  ;;  %v6158_v11 = vld [vmem:[%s9439_s16] ss:$0 sm:$0xff]  ;;  %s7518_s16 = smov [#allocation2]  }
0x2077   :  { %v7101_v62 = vpop.f32.mrf.mxu1 }
0x2078   :  { %v5356_v8 = vadd.f32 %v7101_v62, %v9224_v33  ;;  %v5647_v23 = vmul.f32 %v5641_v19, %v5579_v58  ;;  %v6159_v19 = vld [vmem:[%s9440_s17] ss:$0 sm:$0xff]  ;;  %s5897_s17 = sshll.u32 %s7518_s16, 4  ;;  %s5898_s17 = int_to_ptr.vmem [resolvable:$true] %s5897_s17 }
0x2079   :  { %v5350_v4 = vpop.f32.mrf.mxu1  ;;  %p7463_p1 = scmp.lt.s32.totalorder %s5898_s17, %s5898_s17 }
0x207a   :  { %v5364_v36 = vadd.f32 %v5356_v8, %v8566_v63  ;;  %v5351_v46 = vadd.f32 %v9224_v33, %v5350_v4  ;;  %7154 = vmatprep.mubr.f32.mxu1 %v5647_v23 }
0x207b   :  { %7155 = vmatmul.mubr.f32.gmra.mxu1 %v5648_v37 }
0x207c   :  { %v5363_v3 = vadd.f32 %v5351_v46, %v8569_v52  ;;  %v5384_v20 = vsel %vm204_vm1, %v5364_v36, 0.0 }
0x207d   :  { %5385 = vadd.xlane.f32.xlu1 %v5384_v20 }
0x207e   :  { %v5381_v31 = vsel %vm204_vm1, %v5363_v3, 0.0 }
0x207f   :  { %5382 = vadd.xlane.f32.xlu0 %v5381_v31 }
0x20fa   :  { %v7153_v25 = vpop.f32.mrf.mxu1 }
0x20fc   :  { %v5742_v22 = vpop.f32.mrf.mxu1 }
0x20fd   :  { %v5743_v44 = vadd.f32 %v6157_v10, %v5742_v22 }
0x20ff   :  { %v5767_v59 = vadd.f32 %v5743_v44, %v9230_v39 }
0x2106   :  { %v5386_v18 = vpop.xlane.xlu1 %5385 }
0x2107   :  { %v5392_v27 = vmul.f32 0.03125, %v5386_v18 }
0x2108   :  { %v5383_v17 = vpop.xlane.xlu0 %5382 }
0x2109   :  { %v5391_v32 = vmul.f32 0.03125, %v5383_v17  ;;  %v5398_v24 = vsub.f32 %v5364_v36, %v5392_v27 }
0x210b   :  { %v5397_v2 = vsub.f32 %v5363_v3, %v5391_v32  ;;  %v5404_v15 = vmul.f32 %v5398_v24, %v5398_v24 }
0x210d   :  { %v5403_v63 = vmul.f32 %v5397_v2, %v5397_v2  ;;  %v5420_v52 = vsel %vm204_vm1, %v5404_v15, 0.0 }
0x210f   :  { %v5417_v33 = vsel %vm204_vm1, %v5403_v63, 0.0 }
0x2110   :  { %5418 = vadd.xlane.f32.xlu0 %v5417_v33 }
0x2114   :  { %5421 = vadd.xlane.f32.xlu0 %v5420_v52 }
0x213b   :  { %v7156_v26 = vpop.f32.mrf.mxu1 }
0x213c   :  { %v5756_v29 = vadd.f32 %v7156_v26, %v6157_v10 }
0x213d   :  { %v5751_v16 = vpop.f32.mrf.mxu1 }
0x213e   :  { %v5768_v41 = vadd.f32 %v5756_v29, %v9240_v28 }
0x2140   :  { %v5770_v48 = vrot.slane %v5768_v41, 7 }
0x2142   :  { %v5773_v56 = vsel %vm5772_vm6, %v5767_v59, %v5770_v48 }
0x2143   :  { %v5777_v51 = vsel %vm5776_vm7, %v5773_v56, 0.0 }
0x2144   :  { %5778 = vadd.xlane.f32.xlu0 %v5777_v51 }
0x2199   :  { %v5419_v50 = vpop.xlane.xlu0 %5418 }
0x219a   :  { %v5427_v57 = vmul.f32 0.03125, %v5419_v50 }
0x219c   :  { %v5433_v0 = vadd.f32 1e-06, %v5427_v57 }
0x219d   :  { %v5422_v14 = vpop.xlane.xlu0 %5421 }
0x219e   :  { %7445 = vrsqrt.f32 %v5433_v0  ;;  %v5428_v1 = vmul.f32 0.03125, %v5422_v14 }
0x21a0   :  { %v5434_v40 = vadd.f32 1e-06, %v5428_v1 }
0x21a2   :  { %7447 = vrsqrt.f32 %v5434_v40 }
0x21ab   :  { %v7446_v13 = vpop.eup %7445 }
0x21ac   :  { %v5445_v55 = vmul.f32 %v7446_v13, %v5397_v2 }
0x21ae   :  { %v5457_v28 = vmul.f32 %v9280_v34, %v5445_v55 }
0x21af   :  { %v7448_v60 = vpop.eup %7447 }
0x21b0   :  { %v5446_v39 = vmul.f32 %v7448_v60, %v5398_v24  ;;  %v5469_v21 = vadd.f32 %v9286_v30, %v5457_v28 }
0x21b2   :  { %7116 = vmatprep.mubr.msk.f32.mxu0 %vm204_vm1, %v5469_v21  ;;  %v5458_v58 = vmul.f32 %v9280_v34, %v5446_v39  ;;  %v5807_v34 = vld [vmem:[%s9441_s18 + $0x10] sm:$0xff] }
0x21b3   :  { %7163 = vmatpush3.msra.mxu0 %v5807_v34 }
0x21b4   :  { %v5470_v6 = vadd.f32 %v9286_v30, %v5458_v58  ;;  %7164 = vmatprep.subr.mxu0 %v7502_v54  ;;  %v5806_v30 = vld [vmem:[%s9441_s18 + $0x8] sm:$0xff]  ;;  %s7458_s18 = scalar_lea.vmem %s5898_s17, 32 }
0x21b5   :  { %7165 = vmatpush3.msra.mxu0 %v5806_v30  ;;  %p7459_p0 = scmp.ne.s32.totalorder %s5898_s17, %s7458_s18  ;;  %p7464_p2 = scmp.lt.s32.totalorder %s7458_s18, %s7458_s18 }
0x21b6   :  { %7117 = vmatmul.mubr.msk.f32.gmra.mxu0 %vm204_vm1, %v5470_v6  ;;  %7166 = vmatprep.subr.mxu0 %v7502_v54 }
0x21b7   :  { %7168 = vmatprep.mubr.msk.f32.mxu0 %vm7504_vm2, %v7502_v54  ;;  %7167 = vmatpush3.msra.mxu0 %v5805_v38  ;;  %p7465_p3 = por %p7464_p2, %p7463_p1 }
0x21b9   :  { %p7466_p4 = pnand %p7465_p3, %p7459_p0 }
0x21cd   :  { %v5779_v7 = vpop.xlane.xlu0 %5778 }
0x21ce   :  { %v5780_v35 = vmul.f32 0.03125, %v5779_v7 }
0x21d0   :  { %v5781_v61 = vsub.f32 %v5773_v56, %v5780_v35 }
0x21d2   :  { %v5782_v5 = vmul.f32 %v5781_v61, %v5781_v61 }
0x21d4   :  { %v5783_v53 = vsel %vm5776_vm7, %v5782_v5, 0.0 }
0x21d5   :  { %5784 = vadd.xlane.f32.xlu1 %v5783_v53 }
0x225e   :  { %v5785_v49 = vpop.xlane.xlu1 %5784 }
0x225f   :  { %v5786_v45 = vmul.f32 0.03125, %v5785_v49 }
0x2261   :  { %v5787_v47 = vadd.f32 1e-06, %v5786_v45 }
0x2263   :  { %7449 = vrsqrt.f32 %v5787_v47 }
0x2270   :  { %v7450_v43 = vpop.eup %7449 }
0x2271   :  { %v5789_v42 = vmul.f32 %v7450_v43, %v5781_v61 }
0x2273   :  { %v5796_v54 = vmul.f32 %v6158_v11, %v5789_v42 }
0x2275   :  { %v5803_v62 = vadd.f32 %v6159_v19, %v5796_v54 }
0x2276   :  { %v7118_v8 = vpop.f32.mrf.mxu0 }
0x2277   :  { %5804 = vst.msk [vmem:[#allocation2] sm:$0x3] %vm5776_vm7, %v5803_v62  ;;  %v5594_v23 = vadd.f32 %v7118_v8, %v9360_v9  ;;  %7169 = vmatmul.mubr.msk.f32.vlgmr.msra.gmra.mxu0 %vm204_vm1, %v5803_v62 }
0x2278   :  { %v5588_v4 = vpop.f32.mrf.mxu0 }
0x2279   :  { %v5602_v37 = vmul.f32 %v5594_v23, %v5594_v23  ;;  %v5589_v36 = vadd.f32 %v9360_v9, %v5588_v4 }
0x227b   :  { %v5608_v46 = vmul.f32 %v5602_v37, %v5594_v23  ;;  %v5601_v3 = vmul.f32 %v5589_v36, %v5589_v36 }
0x227d   :  { %v5614_v20 = vmul.f32 0.044715, %v5608_v46  ;;  %v5607_v31 = vmul.f32 %v5601_v3, %v5589_v36 }
0x227f   :  { %v5620_v25 = vadd.f32 %v5614_v20, %v5594_v23  ;;  %v5613_v18 = vmul.f32 0.044715, %v5607_v31 }
0x2281   :  { %v5626_v27 = vmul.f32 0.7978846, %v5620_v25  ;;  %v5619_v17 = vadd.f32 %v5613_v18, %v5589_v36 }
0x2283   :  { %7451 = vtanh.f32 %v5626_v27  ;;  %v5625_v32 = vmul.f32 0.7978846, %v5619_v17 }
0x2285   :  { %7453 = vtanh.f32 %v5625_v32 }
0x2290   :  { %v7452_v24 = vpop.eup %7451 }
0x2291   :  { %v5638_v2 = vadd.f32 1.0, %v7452_v24 }
0x2292   :  { %v7454_v63 = vpop.eup %7453 }
0x2293   :  { %v5637_v33 = vadd.f32 1.0, %v7454_v63  ;;  %v5644_v15 = vmul.f32 0.5, %v5638_v2 }
0x2295   :  { %v5643_v52 = vmul.f32 0.5, %v5637_v33  ;;  %v5650_v10 = vmul.f32 %v5644_v15, %v5594_v23 }
0x2297   :  { %v5649_v22 = vmul.f32 %v5643_v52, %v5589_v36 }
0x2299   :  { %7157 = vmatprep.mubr.f32.mxu1 %v5649_v22 }
0x229a   :  { %7158 = vmatmul.mubr.f32.gmra.mxu1 %v5650_v10 }
0x229b   :  { %7469 = shalt.err (!%p7466_p4)
}
0x229c   :  { %5900 = dma.vmem_to_hbm [thread:$0]  %s5898_s17, 32, %s9443_s20, [#allocation3]   ;;  %v6160_v9 = vld [vmem:[%s9442_s19] ss:$0 sm:$0xff]  ;;  %vm5889_vm8 = vcmask 74752  }
0x229d   :  { %s7519_s0 = smov [#allocation4]  }
0x229e   :  { %s5907_s23 = sshll.u32 %s7519_s0, 4  ;;  %s5908_s23 = int_to_ptr.vmem [resolvable:$true] %s5907_s23 }
0x229f   :  { %s7478_s25 = scalar_lea.vmem %s5908_s23, 32  ;;  %p7483_p6 = scmp.lt.s32.totalorder %s5908_s23, %s5908_s23 }
0x22a0   :  { %p7479_p5 = scmp.ne.s32.totalorder %s5908_s23, %s7478_s25  ;;  %p7484_p7 = scmp.lt.s32.totalorder %s7478_s25, %s7478_s25 }
0x22a2   :  { %p7485_p8 = por %p7484_p7, %p7483_p6 }
0x22a4   :  { %p7486_p9 = pnand %p7485_p8, %p7479_p5 }
0x2337   :  { %v5885_v26 = vpop.f32.mrf.mxu0 }
0x2338   :  { %v5886_v44 = vadd.f32 %v6160_v9, %v5885_v26 }
0x2339   :  { %v7170_v29 = vpop.f32.mrf.mxu0 }
0x233a   :  { %5890 = vst.msk [vmem:[#allocation4] sm:$0x3] %vm5889_vm8, %v5886_v44 }
0x233b   :  { %7489 = shalt.err (!%p7486_p9)
}
0x233c   :  { %5910 = dma.vmem_to_hbm [thread:$0]  %s5908_s23, 32, %s9444_s21, [#allocation5]  }
0x235a   :  { %v7159_v16 = vpop.f32.mrf.mxu1 }
0x235c   :  { %v5760_v41 = vpop.f32.mrf.mxu1 }
0x235d   :  { %7498 = dma.done.wait [#allocation3], 32  }
0x235e   :  { %7499 = vsyncadd [#allocation3], 4294967264 }
0x235f   :  { %7500 = dma.done.wait [#allocation5], 32  }
0x2360   :  { %7501 = vsyncadd [#allocation5], 4294967264 }
0x2361   :  { %5917 = vsyncpa [#allocation3], 1 }
0x2362   :  { %5918 = vsyncpa [#allocation5], 1 }

</bundles_post_ra>
